<compile_context>
chip_gen: v5e
topology: v5e:2x2
jax: 0.10.0
libtpu: 0.0.40
codegen_flags: <defaults>
</compile_context>

<pallas_src>
import functools

import jax
import jax.numpy as jnp
from jax.experimental import pallas as pl
from jax.experimental.pallas import tpu as pltpu


def _cbam_kernel(x_ref, w1t_ref, b1_ref, w2t_ref, b2_ref, rc_ref, wc_ref,
                 o_ref, *, height, width, ksize, bblk):
    H, W, K, Bb = height, width, ksize, bblk
    P = (K - 1) // 2
    KK = K * K

    x = x_ref[...].astype(jnp.float32)                # (Bb, C, HW), lane dense
    _, C, HW = x.shape

    # ---- channel attention: batched avg/max bottleneck, lane-dense on C -----
    avg = jnp.mean(x, axis=2)                          # (Bb, C)  == avg_pool2d
    mx = jnp.max(x, axis=2)                            # (Bb, C)  == max_pool2d
    pooled = jnp.concatenate([avg, mx], axis=0)        # (2*Bb, C) rows=[avg;max]

    # Linear(C -> mid) with pre-transposed weight (C, mid); C on the MXU K axis.
    h = jnp.dot(pooled, w1t_ref[...], preferred_element_type=jnp.float32)
    h = jnp.maximum(h + b1_ref[...], 0.0)              # (2*Bb, mid), ReLU
    # Linear(mid -> C) with pre-transposed weight (mid, C); result lane-dense.
    z = jnp.dot(h, w2t_ref[...], preferred_element_type=jnp.float32) + b2_ref[...]
    chan = jax.nn.sigmoid(z[:Bb] + z[Bb:])             # (Bb, C) channel gate
    # (b2 added to both rows before the sum matches the reference, which runs
    #  the full bottleneck -- including b2 -- on avg and max separately.)

    fp = chan[:, :, None] * x                          # (Bb, C, HW) gated feats

    # ---- spatial attention: channel pools + KxK conv on stacked maps --------
    sp_max = jnp.max(fp, axis=1)                       # (Bb, HW) max over C
    sp_avg = jnp.mean(fp, axis=1)                      # (Bb, HW) avg over C
    stacked = jnp.concatenate([sp_max, sp_avg], axis=0)   # (2*Bb, HW)

    # Hoisted row/col validity masks: one compare pair per offset, reused by
    # every tap (each tap then does a single AND).
    ri = rc_ref[0:1, :]                                # (1, HW) row index
    ci = rc_ref[1:2, :]                                # (1, HW) col index
    rvalid = [(ri >= (P - dy)) & (ri <= (H - 1 + P - dy)) for dy in range(K)]
    cvalid = [(ci >= (P - dx)) & (ci <= (W - 1 + P - dx)) for dx in range(K)]

    # Row selector: 1.0 on the max-map rows, 0.0 on the avg-map rows.
    rows = jax.lax.broadcasted_iota(jnp.int32, (2 * Bb, 1), 0)
    sel_max = (rows < Bb).astype(jnp.float32)          # (2*Bb, 1)

    # Hoist all SMEM scalar reads (conv taps + bias) out of the tap loop.
    wm = [wc_ref[t] for t in range(KK)]                # taps for the max map
    wa = [wc_ref[KK + t] for t in range(KK)]           # taps for the avg map
    bias = wc_ref[2 * KK]

    # Conv2d(in=2, out=1, K, padding=P) on the flattened maps:
    #   out[i,j] = bias + sum_{dy,dx} (wm*max + wa*avg)[i+dy-P, j+dx-P]
    # A spatial shift is a static circular lane roll of the stacked (2*Bb, HW)
    # array; out-of-image taps are removed with the hoisted index masks.
    acc = jnp.zeros((2 * Bb, HW), dtype=jnp.float32)
    for dy in range(K):
        for dx in range(K):
            t = dy * K + dx
            shift = (-((dy - P) * W + (dx - P))) % HW
            s = stacked if shift == 0 else pltpu.roll(stacked, shift=shift, axis=1)
            valid = rvalid[dy] & cvalid[dx]            # single AND per tap
            # Per-tap 2-block weight column: wm on max rows, wa on avg rows.
            wcol = wa[t] + (wm[t] - wa[t]) * sel_max   # (2*Bb, 1)
            acc = acc + jnp.where(valid, s * wcol, 0.0)

    conv = acc[:Bb] + acc[Bb:] + bias                  # (Bb, HW): sum channels
    spat = jax.nn.sigmoid(conv)                        # (Bb, HW) spatial gate
    o_ref[...] = (spat[:, None, :] * fp).astype(o_ref.dtype)   # lane-dense store


def _choose_block_batch(B, C, HW, itemsize):
    """Largest divisor of B whose block fits VMEM / vreg budgets, preferring
    >= 2 grid steps when B >= 2 (so v7x's two TensorCores both get work)."""
    best = 1
    for bb in range(1, B + 1):
        if B % bb:
            continue
        # Per-step VMEM: double-buffered I/O blocks + f32 intermediates (x, fp).
        vmem_needed = bb * C * HW * (4 * itemsize + 6 * 4)
        if vmem_needed > (24 << 20):                       # stay well inside v7x 64 MiB
            break
        # Keep the unrolled tap loop's live set (stacked + acc + rolled temp)
        # comfortably inside the 256 KiB vreg file (v5e spill/store-slot note).
        if 3 * (2 * bb * HW * 4) > (96 << 10):
            break
        if B >= 2 and B // bb < 2:                         # keep >= 2 parallel steps
            continue
        best = bb
    return best


def cbam_forward(x, w1, b1, w2, b2, conv_w, conv_b, *, kernel_size,
                 io_dtype=jnp.float32, block_batch=None):
    B, C, H, W = x.shape
    mid = w1.shape[0]
    K = kernel_size
    assert K % 2 == 1, "Odd kernel size required"
    HW = H * W

    itemsize = jnp.dtype(io_dtype).itemsize
    Bb = block_batch if block_batch is not None else _choose_block_batch(B, C, HW, itemsize)
    assert B % Bb == 0

    # Lane-dense layout: full H*W extent on the 128-wide lane axis.
    x_flat = x.reshape(B, C, HW).astype(io_dtype)

    # Pre-transposed MLP weights (review item: lane-dense C on the MXU result).
    w1t = jnp.transpose(w1).astype(jnp.float32)        # (C, mid)
    w2t = jnp.transpose(w2).astype(jnp.float32)        # (mid, C)
    b1r = b1.reshape(1, mid).astype(jnp.float32)
    b2r = b2.reshape(1, C).astype(jnp.float32)

    # Conv taps + bias flattened into one SMEM scalar vector:
    #   [w(max channel, K*K), w(avg channel, K*K), bias]
    wc = jnp.concatenate([conv_w[0, 0].reshape(-1),
                          conv_w[0, 1].reshape(-1),
                          conv_b.reshape(-1)]).astype(jnp.float32)

    # Row/col index of every flattened spatial position, stacked into one
    # constant (2, HW) input (fetched once; index map never changes).
    p = jnp.arange(HW, dtype=jnp.int32)
    rc = jnp.stack([p // W, p % W], axis=0)            # (2, HW) int32

    # Explicit VMEM budget: double-buffered I/O blocks + f32 intermediates.
    io_block = Bb * C * HW * itemsize
    f32_block = Bb * C * HW * 4
    vmem_limit = int(min(max(4 * io_block + 6 * f32_block + (2 << 20), 16 << 20),
                         64 << 20))

    kernel = functools.partial(_cbam_kernel, height=H, width=W, ksize=K, bblk=Bb)
    out_flat = pl.pallas_call(
        kernel,
        out_shape=jax.ShapeDtypeStruct((B, C, HW), io_dtype),
        grid_spec=pltpu.PrefetchScalarGridSpec(
            num_scalar_prefetch=0,
            grid=(B // Bb,),
            in_specs=[
                pl.BlockSpec((Bb, C, HW), lambda b: (b, 0, 0)),       # x
                pl.BlockSpec((C, mid), lambda b: (0, 0)),             # w1.T
                pl.BlockSpec((1, mid), lambda b: (0, 0)),             # b1
                pl.BlockSpec((mid, C), lambda b: (0, 0)),             # w2.T
                pl.BlockSpec((1, C), lambda b: (0, 0)),               # b2
                pl.BlockSpec((2, HW), lambda b: (0, 0)),              # row/col idx
                pl.BlockSpec(memory_space=pltpu.MemorySpace.SMEM),    # conv taps+bias
            ],
            out_specs=pl.BlockSpec((Bb, C, HW), lambda b: (b, 0, 0)),
        ),
        compiler_params=pltpu.CompilerParams(
            dimension_semantics=("parallel",),   # batch blocks are independent
            vmem_limit_bytes=vmem_limit),
    )(x_flat, w1t, b1r, w2t, b2r, rc, wc)
    return out_flat.reshape(B, C, H, W)


def cbam_reference(x, w1, b1, w2, b2, conv_w, conv_b):
    """Pure-JAX reference matching the PyTorch forward."""
    avg = x.mean(axis=(2, 3))                                      # (B, C)
    mx = x.max(axis=(2, 3))                                        # (B, C)

    def bottleneck(v):
        h = jnp.maximum(v @ w1.T + b1, 0.0)                        # (B, mid)
        return h @ w2.T + b2                                       # (B, C)

    chan = jax.nn.sigmoid(bottleneck(avg) + bottleneck(mx))        # (B, C)
    fp = chan[:, :, None, None] * x
    sp_max = fp.max(axis=1, keepdims=True)
    sp_avg = fp.mean(axis=1, keepdims=True)
    pool = jnp.concatenate([sp_max, sp_avg], axis=1)               # (B, 2, H, W)
    conv = jax.lax.conv_general_dilated(
        pool, conv_w, window_strides=(1, 1), padding="SAME",
        dimension_numbers=("NCHW", "OIHW", "NCHW")) + conv_b[None, :, None, None]
    spat = jax.nn.sigmoid(conv)                                    # (B, 1, H, W)
    return spat * fp


if __name__ == "__main__":
    B, C, H, W = 2, 32, 16, 16
    reduction_ratio = 4
    kernel_size = 7
    mid = int(C / float(reduction_ratio))

    key = jax.random.PRNGKey(0)
    ks = jax.random.split(key, 7)
    x = jax.random.normal(ks[0], (B, C, H, W), jnp.float32)
    w1 = jax.random.normal(ks[1], (mid, C), jnp.float32) * 0.1     # Linear(C->mid).weight
    b1 = jax.random.normal(ks[2], (mid,), jnp.float32) * 0.1
    w2 = jax.random.normal(ks[3], (C, mid), jnp.float32) * 0.1     # Linear(mid->C).weight
    b2 = jax.random.normal(ks[4], (C,), jnp.float32) * 0.1
    conv_w = jax.random.normal(ks[5], (1, 2, kernel_size, kernel_size),
                               jnp.float32) * 0.2
    conv_b = jax.random.normal(ks[6], (1,), jnp.float32) * 0.1

    ref = cbam_reference(x, w1, b1, w2, b2, conv_w, conv_b)

    # f32 HBM I/O (module-native precision).
    out = cbam_forward(x, w1, b1, w2, b2, conv_w, conv_b, kernel_size=kernel_size)
    out = jax.block_until_ready(out)
    assert out.shape == (B, C, H, W)
    err = float(jnp.max(jnp.abs(out - ref)))
    assert jnp.allclose(out, ref, atol=5e-3, rtol=5e-3), err

    # bf16 HBM I/O path (memory-roofline optimization); all compute stays f32.
    out_bf = cbam_forward(x, w1, b1, w2, b2, conv_w, conv_b,
                          kernel_size=kernel_size, io_dtype=jnp.bfloat16)
    out_bf = jax.block_until_ready(out_bf).astype(jnp.float32)
    ref_bf = cbam_reference(x.astype(jnp.bfloat16).astype(jnp.float32),
                            w1, b1, w2, b2, conv_w, conv_b)
    err_bf = float(jnp.max(jnp.abs(out_bf - ref_bf)))
    assert jnp.allclose(out_bf, ref_bf, atol=6e-2, rtol=6e-2), err_bf

    print("KERNEL_OK")
</pallas_src>

<mosaic_0001>
module attributes {stable_mosaic.version = 11 : i64} {
  func.func @_cbam_kernel(%arg0: i32, %arg1: memref<1x32x256xf32, #tpu.memory_space<vmem>>, %arg2: memref<32x8xf32, #tpu.memory_space<vmem>>, %arg3: memref<1x8xf32, #tpu.memory_space<vmem>>, %arg4: memref<8x32xf32, #tpu.memory_space<vmem>>, %arg5: memref<1x32xf32, #tpu.memory_space<vmem>>, %arg6: memref<2x256xi32, #tpu.memory_space<vmem>>, %arg7: memref<99xf32, #tpu.memory_space<smem>>, %arg8: memref<1x32x256xf32, #tpu.memory_space<vmem>>) attributes {dimension_semantics = [#tpu.dimension_semantics<parallel>], iteration_bounds = array<i64: 2>, scalar_prefetch = 0 : i64, scratch_operands = 0 : i64, tpu.core_type = #tpu.core_type<tc>, window_params = [{transform_indices = @transform_0, window_bounds = array<i64: 1, 32, 256>}, {pipeline_mode = #tpu.pipeline_mode<synchronous>, transform_indices = @transform_1, window_bounds = array<i64: 32, 8>}, {pipeline_mode = #tpu.pipeline_mode<synchronous>, transform_indices = @transform_2, window_bounds = array<i64: 1, 8>}, {pipeline_mode = #tpu.pipeline_mode<synchronous>, transform_indices = @transform_3, window_bounds = array<i64: 8, 32>}, {pipeline_mode = #tpu.pipeline_mode<synchronous>, transform_indices = @transform_4, window_bounds = array<i64: 1, 32>}, {pipeline_mode = #tpu.pipeline_mode<synchronous>, transform_indices = @transform_5, window_bounds = array<i64: 2, 256>}, {transform_indices = @transform_6, window_bounds = array<i64: 99>}, {transform_indices = @transform_7, window_bounds = array<i64: 1, 32, 256>}]} {
    %c0 = arith.constant 0 : index
    %c0_0 = arith.constant 0 : index
    %c0_1 = arith.constant 0 : index
    %0 = vector.load %arg1[%c0, %c0_0, %c0_1] : memref<1x32x256xf32, #tpu.memory_space<vmem>>, vector<1x32x256xf32>
    %cst = arith.constant dense<0.000000e+00> : vector<1x32xf32>
    %1 = vector.multi_reduction <add>, %0, %cst [2] : vector<1x32x256xf32> to vector<1x32xf32>
    %cst_2 = arith.constant 2.560000e+02 : f32
    %2 = vector.broadcast %cst_2 : f32 to vector<1x32xf32>
    %3 = arith.divf %1, %2 : vector<1x32xf32>
    %cst_3 = arith.constant dense<0xFF800000> : vector<1x32xf32>
    %4 = vector.multi_reduction <maximumf>, %0, %cst_3 [2] : vector<1x32x256xf32> to vector<1x32xf32>
    %5 = tpu.concatenate %3, %4 in 0 : vector<1x32xf32>, vector<1x32xf32> -> vector<2x32xf32>
    %c0_4 = arith.constant 0 : index
    %c0_5 = arith.constant 0 : index
    %6 = vector.load %arg2[%c0_4, %c0_5] : memref<32x8xf32, #tpu.memory_space<vmem>>, vector<32x8xf32>
    %cst_6 = arith.constant dense<0.000000e+00> : vector<2x8xf32>
    %7 = tpu.matmul %5, %6, %cst_6 {dimension_numbers = #tpu.dot_dimension_numbers<[1], [0], [0], [1], [0, 0, 1, 1], [], []>} : vector<2x32xf32>, vector<32x8xf32>, vector<2x8xf32> -> vector<2x8xf32>
    %c0_7 = arith.constant 0 : index
    %c0_8 = arith.constant 0 : index
    %8 = vector.load %arg3[%c0_7, %c0_8] : memref<1x8xf32, #tpu.memory_space<vmem>>, vector<1x8xf32>
    %9 = vector.broadcast %8 : vector<1x8xf32> to vector<2x8xf32>
    %10 = arith.addf %7, %9 : vector<2x8xf32>
    %cst_9 = arith.constant 0.000000e+00 : f32
    %11 = vector.broadcast %cst_9 : f32 to vector<2x8xf32>
    %12 = arith.maximumf %10, %11 : vector<2x8xf32>
    %c0_10 = arith.constant 0 : index
    %c0_11 = arith.constant 0 : index
    %13 = vector.load %arg4[%c0_10, %c0_11] : memref<8x32xf32, #tpu.memory_space<vmem>>, vector<8x32xf32>
    %cst_12 = arith.constant dense<0.000000e+00> : vector<2x32xf32>
    %14 = tpu.matmul %12, %13, %cst_12 {dimension_numbers = #tpu.dot_dimension_numbers<[1], [0], [0], [1], [0, 0, 1, 1], [], []>} : vector<2x8xf32>, vector<8x32xf32>, vector<2x32xf32> -> vector<2x32xf32>
    %c0_13 = arith.constant 0 : index
    %c0_14 = arith.constant 0 : index
    %15 = vector.load %arg5[%c0_13, %c0_14] : memref<1x32xf32, #tpu.memory_space<vmem>>, vector<1x32xf32>
    %16 = vector.broadcast %15 : vector<1x32xf32> to vector<2x32xf32>
    %17 = arith.addf %14, %16 : vector<2x32xf32>
    %18 = vector.extract_strided_slice %17 {offsets = [0, 0], sizes = [1, 32], strides = [1, 1]} : vector<2x32xf32> to vector<1x32xf32>
    %19 = vector.extract_strided_slice %17 {offsets = [1, 0], sizes = [1, 32], strides = [1, 1]} : vector<2x32xf32> to vector<1x32xf32>
    %20 = arith.addf %18, %19 : vector<1x32xf32>
    %21 = arith.negf %20 : vector<1x32xf32>
    %22 = math.exp %21 : vector<1x32xf32>
    %cst_15 = arith.constant 1.000000e+00 : f32
    %23 = vector.broadcast %cst_15 : f32 to vector<1x32xf32>
    %24 = arith.addf %23, %22 : vector<1x32xf32>
    %25 = arith.divf %23, %24 : vector<1x32xf32>
    %26 = vector.shape_cast %25 : vector<1x32xf32> to vector<1x32x1xf32>
    %27 = vector.broadcast %26 : vector<1x32x1xf32> to vector<1x32x256xf32>
    %28 = arith.mulf %27, %0 : vector<1x32x256xf32>
    %cst_16 = arith.constant dense<0xFF800000> : vector<1x256xf32>
    %29 = vector.multi_reduction <maximumf>, %28, %cst_16 [1] : vector<1x32x256xf32> to vector<1x256xf32>
    %cst_17 = arith.constant dense<0.000000e+00> : vector<1x256xf32>
    %30 = vector.multi_reduction <add>, %28, %cst_17 [1] : vector<1x32x256xf32> to vector<1x256xf32>
    %cst_18 = arith.constant 3.200000e+01 : f32
    %31 = vector.broadcast %cst_18 : f32 to vector<1x256xf32>
    %32 = arith.divf %30, %31 : vector<1x256xf32>
    %33 = tpu.concatenate %29, %32 in 0 : vector<1x256xf32>, vector<1x256xf32> -> vector<2x256xf32>
    %c0_19 = arith.constant 0 : index
    %c0_20 = arith.constant 0 : index
    %34 = vector.load %arg6[%c0_19, %c0_20] : memref<2x256xi32, #tpu.memory_space<vmem>>, vector<1x256xi32>
    %c1 = arith.constant 1 : index
    %c0_21 = arith.constant 0 : index
    %35 = vector.load %arg6[%c1, %c0_21] : memref<2x256xi32, #tpu.memory_space<vmem>>, vector<1x256xi32>
    %c3_i32 = arith.constant 3 : i32
    %36 = vector.broadcast %c3_i32 : i32 to vector<1x256xi32>
    %37 = arith.cmpi sge, %34, %36 : vector<1x256xi32>
    %c18_i32 = arith.constant 18 : i32
    %38 = vector.broadcast %c18_i32 : i32 to vector<1x256xi32>
    %39 = arith.cmpi sle, %34, %38 : vector<1x256xi32>
    %40 = arith.andi %37, %39 : vector<1x256xi1>
    %c2_i32 = arith.constant 2 : i32
    %41 = vector.broadcast %c2_i32 : i32 to vector<1x256xi32>
    %42 = arith.cmpi sge, %34, %41 : vector<1x256xi32>
    %c17_i32 = arith.constant 17 : i32
    %43 = vector.broadcast %c17_i32 : i32 to vector<1x256xi32>
    %44 = arith.cmpi sle, %34, %43 : vector<1x256xi32>
    %45 = arith.andi %42, %44 : vector<1x256xi1>
    %c1_i32 = arith.constant 1 : i32
    %46 = vector.broadcast %c1_i32 : i32 to vector<1x256xi32>
    %47 = arith.cmpi sge, %34, %46 : vector<1x256xi32>
    %c16_i32 = arith.constant 16 : i32
    %48 = vector.broadcast %c16_i32 : i32 to vector<1x256xi32>
    %49 = arith.cmpi sle, %34, %48 : vector<1x256xi32>
    %50 = arith.andi %47, %49 : vector<1x256xi1>
    %c0_i32 = arith.constant 0 : i32
    %51 = vector.broadcast %c0_i32 : i32 to vector<1x256xi32>
    %52 = arith.cmpi sge, %34, %51 : vector<1x256xi32>
    %c15_i32 = arith.constant 15 : i32
    %53 = vector.broadcast %c15_i32 : i32 to vector<1x256xi32>
    %54 = arith.cmpi sle, %34, %53 : vector<1x256xi32>
    %55 = arith.andi %52, %54 : vector<1x256xi1>
    %c-1_i32 = arith.constant -1 : i32
    %56 = vector.broadcast %c-1_i32 : i32 to vector<1x256xi32>
    %57 = arith.cmpi sge, %34, %56 : vector<1x256xi32>
    %c14_i32 = arith.constant 14 : i32
    %58 = vector.broadcast %c14_i32 : i32 to vector<1x256xi32>
    %59 = arith.cmpi sle, %34, %58 : vector<1x256xi32>
    %60 = arith.andi %57, %59 : vector<1x256xi1>
    %c-2_i32 = arith.constant -2 : i32
    %61 = vector.broadcast %c-2_i32 : i32 to vector<1x256xi32>
    %62 = arith.cmpi sge, %34, %61 : vector<1x256xi32>
    %c13_i32 = arith.constant 13 : i32
    %63 = vector.broadcast %c13_i32 : i32 to vector<1x256xi32>
    %64 = arith.cmpi sle, %34, %63 : vector<1x256xi32>
    %65 = arith.andi %62, %64 : vector<1x256xi1>
    %c-3_i32 = arith.constant -3 : i32
    %66 = vector.broadcast %c-3_i32 : i32 to vector<1x256xi32>
    %67 = arith.cmpi sge, %34, %66 : vector<1x256xi32>
    %c12_i32 = arith.constant 12 : i32
    %68 = vector.broadcast %c12_i32 : i32 to vector<1x256xi32>
    %69 = arith.cmpi sle, %34, %68 : vector<1x256xi32>
    %70 = arith.andi %67, %69 : vector<1x256xi1>
    %c3_i32_22 = arith.constant 3 : i32
    %71 = vector.broadcast %c3_i32_22 : i32 to vector<1x256xi32>
    %72 = arith.cmpi sge, %35, %71 : vector<1x256xi32>
    %c18_i32_23 = arith.constant 18 : i32
    %73 = vector.broadcast %c18_i32_23 : i32 to vector<1x256xi32>
    %74 = arith.cmpi sle, %35, %73 : vector<1x256xi32>
    %75 = arith.andi %72, %74 : vector<1x256xi1>
    %c2_i32_24 = arith.constant 2 : i32
    %76 = vector.broadcast %c2_i32_24 : i32 to vector<1x256xi32>
    %77 = arith.cmpi sge, %35, %76 : vector<1x256xi32>
    %c17_i32_25 = arith.constant 17 : i32
    %78 = vector.broadcast %c17_i32_25 : i32 to vector<1x256xi32>
    %79 = arith.cmpi sle, %35, %78 : vector<1x256xi32>
    %80 = arith.andi %77, %79 : vector<1x256xi1>
    %c1_i32_26 = arith.constant 1 : i32
    %81 = vector.broadcast %c1_i32_26 : i32 to vector<1x256xi32>
    %82 = arith.cmpi sge, %35, %81 : vector<1x256xi32>
    %c16_i32_27 = arith.constant 16 : i32
    %83 = vector.broadcast %c16_i32_27 : i32 to vector<1x256xi32>
    %84 = arith.cmpi sle, %35, %83 : vector<1x256xi32>
    %85 = arith.andi %82, %84 : vector<1x256xi1>
    %c0_i32_28 = arith.constant 0 : i32
    %86 = vector.broadcast %c0_i32_28 : i32 to vector<1x256xi32>
    %87 = arith.cmpi sge, %35, %86 : vector<1x256xi32>
    %c15_i32_29 = arith.constant 15 : i32
    %88 = vector.broadcast %c15_i32_29 : i32 to vector<1x256xi32>
    %89 = arith.cmpi sle, %35, %88 : vector<1x256xi32>
    %90 = arith.andi %87, %89 : vector<1x256xi1>
    %c-1_i32_30 = arith.constant -1 : i32
    %91 = vector.broadcast %c-1_i32_30 : i32 to vector<1x256xi32>
    %92 = arith.cmpi sge, %35, %91 : vector<1x256xi32>
    %c14_i32_31 = arith.constant 14 : i32
    %93 = vector.broadcast %c14_i32_31 : i32 to vector<1x256xi32>
    %94 = arith.cmpi sle, %35, %93 : vector<1x256xi32>
    %95 = arith.andi %92, %94 : vector<1x256xi1>
    %c-2_i32_32 = arith.constant -2 : i32
    %96 = vector.broadcast %c-2_i32_32 : i32 to vector<1x256xi32>
    %97 = arith.cmpi sge, %35, %96 : vector<1x256xi32>
    %c13_i32_33 = arith.constant 13 : i32
    %98 = vector.broadcast %c13_i32_33 : i32 to vector<1x256xi32>
    %99 = arith.cmpi sle, %35, %98 : vector<1x256xi32>
    %100 = arith.andi %97, %99 : vector<1x256xi1>
    %c-3_i32_34 = arith.constant -3 : i32
    %101 = vector.broadcast %c-3_i32_34 : i32 to vector<1x256xi32>
    %102 = arith.cmpi sge, %35, %101 : vector<1x256xi32>
    %c12_i32_35 = arith.constant 12 : i32
    %103 = vector.broadcast %c12_i32_35 : i32 to vector<1x256xi32>
    %104 = arith.cmpi sle, %35, %103 : vector<1x256xi32>
    %105 = arith.andi %102, %104 : vector<1x256xi1>
    %106 = tpu.iota {dimensions = array<i32: 0>} : vector<2x1xi32>
    %c1_i32_36 = arith.constant 1 : i32
    %107 = vector.broadcast %c1_i32_36 : i32 to vector<2x1xi32>
    %108 = arith.cmpi slt, %106, %107 : vector<2x1xi32>
    %109 = arith.extui %108 : vector<2x1xi1> to vector<2x1xi32>
    %110 = arith.sitofp %109 : vector<2x1xi32> to vector<2x1xf32>
    %c0_37 = arith.constant 0 : index
    %111 = memref.load %arg7[%c0_37] : memref<99xf32, #tpu.memory_space<smem>>
    %c1_38 = arith.constant 1 : index
    %112 = memref.load %arg7[%c1_38] : memref<99xf32, #tpu.memory_space<smem>>
    %c2 = arith.constant 2 : index
    %113 = memref.load %arg7[%c2] : memref<99xf32, #tpu.memory_space<smem>>
    %c3 = arith.constant 3 : index
    %114 = memref.load %arg7[%c3] : memref<99xf32, #tpu.memory_space<smem>>
    %c4 = arith.constant 4 : index
    %115 = memref.load %arg7[%c4] : memref<99xf32, #tpu.memory_space<smem>>
    %c5 = arith.constant 5 : index
    %116 = memref.load %arg7[%c5] : memref<99xf32, #tpu.memory_space<smem>>
    %c6 = arith.constant 6 : index
    %117 = memref.load %arg7[%c6] : memref<99xf32, #tpu.memory_space<smem>>
    %c7 = arith.constant 7 : index
    %118 = memref.load %arg7[%c7] : memref<99xf32, #tpu.memory_space<smem>>
    %c8 = arith.constant 8 : index
    %119 = memref.load %arg7[%c8] : memref<99xf32, #tpu.memory_space<smem>>
    %c9 = arith.constant 9 : index
    %120 = memref.load %arg7[%c9] : memref<99xf32, #tpu.memory_space<smem>>
    %c10 = arith.constant 10 : index
    %121 = memref.load %arg7[%c10] : memref<99xf32, #tpu.memory_space<smem>>
    %c11 = arith.constant 11 : index
    %122 = memref.load %arg7[%c11] : memref<99xf32, #tpu.memory_space<smem>>
    %c12 = arith.constant 12 : index
    %123 = memref.load %arg7[%c12] : memref<99xf32, #tpu.memory_space<smem>>
    %c13 = arith.constant 13 : index
    %124 = memref.load %arg7[%c13] : memref<99xf32, #tpu.memory_space<smem>>
    %c14 = arith.constant 14 : index
    %125 = memref.load %arg7[%c14] : memref<99xf32, #tpu.memory_space<smem>>
    %c15 = arith.constant 15 : index
    %126 = memref.load %arg7[%c15] : memref<99xf32, #tpu.memory_space<smem>>
    %c16 = arith.constant 16 : index
    %127 = memref.load %arg7[%c16] : memref<99xf32, #tpu.memory_space<smem>>
    %c17 = arith.constant 17 : index
    %128 = memref.load %arg7[%c17] : memref<99xf32, #tpu.memory_space<smem>>
    %c18 = arith.constant 18 : index
    %129 = memref.load %arg7[%c18] : memref<99xf32, #tpu.memory_space<smem>>
    %c19 = arith.constant 19 : index
    %130 = memref.load %arg7[%c19] : memref<99xf32, #tpu.memory_space<smem>>
    %c20 = arith.constant 20 : index
    %131 = memref.load %arg7[%c20] : memref<99xf32, #tpu.memory_space<smem>>
    %c21 = arith.constant 21 : index
    %132 = memref.load %arg7[%c21] : memref<99xf32, #tpu.memory_space<smem>>
    %c22 = arith.constant 22 : index
    %133 = memref.load %arg7[%c22] : memref<99xf32, #tpu.memory_space<smem>>
    %c23 = arith.constant 23 : index
    %134 = memref.load %arg7[%c23] : memref<99xf32, #tpu.memory_space<smem>>
    %c24 = arith.constant 24 : index
    %135 = memref.load %arg7[%c24] : memref<99xf32, #tpu.memory_space<smem>>
    %c25 = arith.constant 25 : index
    %136 = memref.load %arg7[%c25] : memref<99xf32, #tpu.memory_space<smem>>
    %c26 = arith.constant 26 : index
    %137 = memref.load %arg7[%c26] : memref<99xf32, #tpu.memory_space<smem>>
    %c27 = arith.constant 27 : index
    %138 = memref.load %arg7[%c27] : memref<99xf32, #tpu.memory_space<smem>>
    %c28 = arith.constant 28 : index
    %139 = memref.load %arg7[%c28] : memref<99xf32, #tpu.memory_space<smem>>
    %c29 = arith.constant 29 : index
    %140 = memref.load %arg7[%c29] : memref<99xf32, #tpu.memory_space<smem>>
    %c30 = arith.constant 30 : index
    %141 = memref.load %arg7[%c30] : memref<99xf32, #tpu.memory_space<smem>>
    %c31 = arith.constant 31 : index
    %142 = memref.load %arg7[%c31] : memref<99xf32, #tpu.memory_space<smem>>
    %c32 = arith.constant 32 : index
    %143 = memref.load %arg7[%c32] : memref<99xf32, #tpu.memory_space<smem>>
    %c33 = arith.constant 33 : index
    %144 = memref.load %arg7[%c33] : memref<99xf32, #tpu.memory_space<smem>>
    %c34 = arith.constant 34 : index
    %145 = memref.load %arg7[%c34] : memref<99xf32, #tpu.memory_space<smem>>
    %c35 = arith.constant 35 : index
    %146 = memref.load %arg7[%c35] : memref<99xf32, #tpu.memory_space<smem>>
    %c36 = arith.constant 36 : index
    %147 = memref.load %arg7[%c36] : memref<99xf32, #tpu.memory_space<smem>>
    %c37 = arith.constant 37 : index
    %148 = memref.load %arg7[%c37] : memref<99xf32, #tpu.memory_space<smem>>
    %c38 = arith.constant 38 : index
    %149 = memref.load %arg7[%c38] : memref<99xf32, #tpu.memory_space<smem>>
    %c39 = arith.constant 39 : index
    %150 = memref.load %arg7[%c39] : memref<99xf32, #tpu.memory_space<smem>>
    %c40 = arith.constant 40 : index
    %151 = memref.load %arg7[%c40] : memref<99xf32, #tpu.memory_space<smem>>
    %c41 = arith.constant 41 : index
    %152 = memref.load %arg7[%c41] : memref<99xf32, #tpu.memory_space<smem>>
    %c42 = arith.constant 42 : index
    %153 = memref.load %arg7[%c42] : memref<99xf32, #tpu.memory_space<smem>>
    %c43 = arith.constant 43 : index
    %154 = memref.load %arg7[%c43] : memref<99xf32, #tpu.memory_space<smem>>
    %c44 = arith.constant 44 : index
    %155 = memref.load %arg7[%c44] : memref<99xf32, #tpu.memory_space<smem>>
    %c45 = arith.constant 45 : index
    %156 = memref.load %arg7[%c45] : memref<99xf32, #tpu.memory_space<smem>>
    %c46 = arith.constant 46 : index
    %157 = memref.load %arg7[%c46] : memref<99xf32, #tpu.memory_space<smem>>
    %c47 = arith.constant 47 : index
    %158 = memref.load %arg7[%c47] : memref<99xf32, #tpu.memory_space<smem>>
    %c48 = arith.constant 48 : index
    %159 = memref.load %arg7[%c48] : memref<99xf32, #tpu.memory_space<smem>>
    %c49 = arith.constant 49 : index
    %160 = memref.load %arg7[%c49] : memref<99xf32, #tpu.memory_space<smem>>
    %c50 = arith.constant 50 : index
    %161 = memref.load %arg7[%c50] : memref<99xf32, #tpu.memory_space<smem>>
    %c51 = arith.constant 51 : index
    %162 = memref.load %arg7[%c51] : memref<99xf32, #tpu.memory_space<smem>>
    %c52 = arith.constant 52 : index
    %163 = memref.load %arg7[%c52] : memref<99xf32, #tpu.memory_space<smem>>
    %c53 = arith.constant 53 : index
    %164 = memref.load %arg7[%c53] : memref<99xf32, #tpu.memory_space<smem>>
    %c54 = arith.constant 54 : index
    %165 = memref.load %arg7[%c54] : memref<99xf32, #tpu.memory_space<smem>>
    %c55 = arith.constant 55 : index
    %166 = memref.load %arg7[%c55] : memref<99xf32, #tpu.memory_space<smem>>
    %c56 = arith.constant 56 : index
    %167 = memref.load %arg7[%c56] : memref<99xf32, #tpu.memory_space<smem>>
    %c57 = arith.constant 57 : index
    %168 = memref.load %arg7[%c57] : memref<99xf32, #tpu.memory_space<smem>>
    %c58 = arith.constant 58 : index
    %169 = memref.load %arg7[%c58] : memref<99xf32, #tpu.memory_space<smem>>
    %c59 = arith.constant 59 : index
    %170 = memref.load %arg7[%c59] : memref<99xf32, #tpu.memory_space<smem>>
    %c60 = arith.constant 60 : index
    %171 = memref.load %arg7[%c60] : memref<99xf32, #tpu.memory_space<smem>>
    %c61 = arith.constant 61 : index
    %172 = memref.load %arg7[%c61] : memref<99xf32, #tpu.memory_space<smem>>
    %c62 = arith.constant 62 : index
    %173 = memref.load %arg7[%c62] : memref<99xf32, #tpu.memory_space<smem>>
    %c63 = arith.constant 63 : index
    %174 = memref.load %arg7[%c63] : memref<99xf32, #tpu.memory_space<smem>>
    %c64 = arith.constant 64 : index
    %175 = memref.load %arg7[%c64] : memref<99xf32, #tpu.memory_space<smem>>
    %c65 = arith.constant 65 : index
    %176 = memref.load %arg7[%c65] : memref<99xf32, #tpu.memory_space<smem>>
    %c66 = arith.constant 66 : index
    %177 = memref.load %arg7[%c66] : memref<99xf32, #tpu.memory_space<smem>>
    %c67 = arith.constant 67 : index
    %178 = memref.load %arg7[%c67] : memref<99xf32, #tpu.memory_space<smem>>
    %c68 = arith.constant 68 : index
    %179 = memref.load %arg7[%c68] : memref<99xf32, #tpu.memory_space<smem>>
    %c69 = arith.constant 69 : index
    %180 = memref.load %arg7[%c69] : memref<99xf32, #tpu.memory_space<smem>>
    %c70 = arith.constant 70 : index
    %181 = memref.load %arg7[%c70] : memref<99xf32, #tpu.memory_space<smem>>
    %c71 = arith.constant 71 : index
    %182 = memref.load %arg7[%c71] : memref<99xf32, #tpu.memory_space<smem>>
    %c72 = arith.constant 72 : index
    %183 = memref.load %arg7[%c72] : memref<99xf32, #tpu.memory_space<smem>>
    %c73 = arith.constant 73 : index
    %184 = memref.load %arg7[%c73] : memref<99xf32, #tpu.memory_space<smem>>
    %c74 = arith.constant 74 : index
    %185 = memref.load %arg7[%c74] : memref<99xf32, #tpu.memory_space<smem>>
    %c75 = arith.constant 75 : index
    %186 = memref.load %arg7[%c75] : memref<99xf32, #tpu.memory_space<smem>>
    %c76 = arith.constant 76 : index
    %187 = memref.load %arg7[%c76] : memref<99xf32, #tpu.memory_space<smem>>
    %c77 = arith.constant 77 : index
    %188 = memref.load %arg7[%c77] : memref<99xf32, #tpu.memory_space<smem>>
    %c78 = arith.constant 78 : index
    %189 = memref.load %arg7[%c78] : memref<99xf32, #tpu.memory_space<smem>>
    %c79 = arith.constant 79 : index
    %190 = memref.load %arg7[%c79] : memref<99xf32, #tpu.memory_space<smem>>
    %c80 = arith.constant 80 : index
    %191 = memref.load %arg7[%c80] : memref<99xf32, #tpu.memory_space<smem>>
    %c81 = arith.constant 81 : index
    %192 = memref.load %arg7[%c81] : memref<99xf32, #tpu.memory_space<smem>>
    %c82 = arith.constant 82 : index
    %193 = memref.load %arg7[%c82] : memref<99xf32, #tpu.memory_space<smem>>
    %c83 = arith.constant 83 : index
    %194 = memref.load %arg7[%c83] : memref<99xf32, #tpu.memory_space<smem>>
    %c84 = arith.constant 84 : index
    %195 = memref.load %arg7[%c84] : memref<99xf32, #tpu.memory_space<smem>>
    %c85 = arith.constant 85 : index
    %196 = memref.load %arg7[%c85] : memref<99xf32, #tpu.memory_space<smem>>
    %c86 = arith.constant 86 : index
    %197 = memref.load %arg7[%c86] : memref<99xf32, #tpu.memory_space<smem>>
    %c87 = arith.constant 87 : index
    %198 = memref.load %arg7[%c87] : memref<99xf32, #tpu.memory_space<smem>>
    %c88 = arith.constant 88 : index
    %199 = memref.load %arg7[%c88] : memref<99xf32, #tpu.memory_space<smem>>
    %c89 = arith.constant 89 : index
    %200 = memref.load %arg7[%c89] : memref<99xf32, #tpu.memory_space<smem>>
    %c90 = arith.constant 90 : index
    %201 = memref.load %arg7[%c90] : memref<99xf32, #tpu.memory_space<smem>>
    %c91 = arith.constant 91 : index
    %202 = memref.load %arg7[%c91] : memref<99xf32, #tpu.memory_space<smem>>
    %c92 = arith.constant 92 : index
    %203 = memref.load %arg7[%c92] : memref<99xf32, #tpu.memory_space<smem>>
    %c93 = arith.constant 93 : index
    %204 = memref.load %arg7[%c93] : memref<99xf32, #tpu.memory_space<smem>>
    %c94 = arith.constant 94 : index
    %205 = memref.load %arg7[%c94] : memref<99xf32, #tpu.memory_space<smem>>
    %c95 = arith.constant 95 : index
    %206 = memref.load %arg7[%c95] : memref<99xf32, #tpu.memory_space<smem>>
    %c96 = arith.constant 96 : index
    %207 = memref.load %arg7[%c96] : memref<99xf32, #tpu.memory_space<smem>>
    %c97 = arith.constant 97 : index
    %208 = memref.load %arg7[%c97] : memref<99xf32, #tpu.memory_space<smem>>
    %c98 = arith.constant 98 : index
    %209 = memref.load %arg7[%c98] : memref<99xf32, #tpu.memory_space<smem>>
    %cst_39 = arith.constant 0.000000e+00 : f32
    %210 = vector.broadcast %cst_39 : f32 to vector<2x256xf32>
    %c51_i32 = arith.constant 51 : i32
    %211 = tpu.dynamic_rotate %33 by %c51_i32 dim 1 : vector<2x256xf32>, i32 -> vector<2x256xf32>
    %212 = arith.andi %40, %75 : vector<1x256xi1>
    %213 = arith.subf %111, %160 : f32
    %214 = vector.broadcast %213 : f32 to vector<2x1xf32>
    %215 = arith.mulf %214, %110 : vector<2x1xf32>
    %216 = vector.broadcast %160 : f32 to vector<2x1xf32>
    %217 = arith.addf %216, %215 : vector<2x1xf32>
    %218 = vector.broadcast %217 : vector<2x1xf32> to vector<2x256xf32>
    %219 = arith.mulf %211, %218 : vector<2x256xf32>
    %cst_40 = arith.constant 0.000000e+00 : f32
    %220 = vector.shape_cast %212 : vector<1x256xi1> to vector<1x256xi1>
    %221 = vector.broadcast %220 : vector<1x256xi1> to vector<2x256xi1>
    %222 = vector.broadcast %cst_40 : f32 to vector<2x256xf32>
    %223 = arith.select %221, %219, %222 : vector<2x256xi1>, vector<2x256xf32>
    %224 = arith.addf %210, %223 : vector<2x256xf32>
    %c50_i32 = arith.constant 50 : i32
    %225 = tpu.dynamic_rotate %33 by %c50_i32 dim 1 : vector<2x256xf32>, i32 -> vector<2x256xf32>
    %226 = arith.andi %40, %80 : vector<1x256xi1>
    %227 = arith.subf %112, %161 : f32
    %228 = vector.broadcast %227 : f32 to vector<2x1xf32>
    %229 = arith.mulf %228, %110 : vector<2x1xf32>
    %230 = vector.broadcast %161 : f32 to vector<2x1xf32>
    %231 = arith.addf %230, %229 : vector<2x1xf32>
    %232 = vector.broadcast %231 : vector<2x1xf32> to vector<2x256xf32>
    %233 = arith.mulf %225, %232 : vector<2x256xf32>
    %cst_41 = arith.constant 0.000000e+00 : f32
    %234 = vector.shape_cast %226 : vector<1x256xi1> to vector<1x256xi1>
    %235 = vector.broadcast %234 : vector<1x256xi1> to vector<2x256xi1>
    %236 = vector.broadcast %cst_41 : f32 to vector<2x256xf32>
    %237 = arith.select %235, %233, %236 : vector<2x256xi1>, vector<2x256xf32>
    %238 = arith.addf %224, %237 : vector<2x256xf32>
    %c49_i32 = arith.constant 49 : i32
    %239 = tpu.dynamic_rotate %33 by %c49_i32 dim 1 : vector<2x256xf32>, i32 -> vector<2x256xf32>
    %240 = arith.andi %40, %85 : vector<1x256xi1>
    %241 = arith.subf %113, %162 : f32
    %242 = vector.broadcast %241 : f32 to vector<2x1xf32>
    %243 = arith.mulf %242, %110 : vector<2x1xf32>
    %244 = vector.broadcast %162 : f32 to vector<2x1xf32>
    %245 = arith.addf %244, %243 : vector<2x1xf32>
    %246 = vector.broadcast %245 : vector<2x1xf32> to vector<2x256xf32>
    %247 = arith.mulf %239, %246 : vector<2x256xf32>
    %cst_42 = arith.constant 0.000000e+00 : f32
    %248 = vector.shape_cast %240 : vector<1x256xi1> to vector<1x256xi1>
    %249 = vector.broadcast %248 : vector<1x256xi1> to vector<2x256xi1>
    %250 = vector.broadcast %cst_42 : f32 to vector<2x256xf32>
    %251 = arith.select %249, %247, %250 : vector<2x256xi1>, vector<2x256xf32>
    %252 = arith.addf %238, %251 : vector<2x256xf32>
    %c48_i32 = arith.constant 48 : i32
    %253 = tpu.dynamic_rotate %33 by %c48_i32 dim 1 : vector<2x256xf32>, i32 -> vector<2x256xf32>
    %254 = arith.andi %40, %90 : vector<1x256xi1>
    %255 = arith.subf %114, %163 : f32
    %256 = vector.broadcast %255 : f32 to vector<2x1xf32>
    %257 = arith.mulf %256, %110 : vector<2x1xf32>
    %258 = vector.broadcast %163 : f32 to vector<2x1xf32>
    %259 = arith.addf %258, %257 : vector<2x1xf32>
    %260 = vector.broadcast %259 : vector<2x1xf32> to vector<2x256xf32>
    %261 = arith.mulf %253, %260 : vector<2x256xf32>
    %cst_43 = arith.constant 0.000000e+00 : f32
    %262 = vector.shape_cast %254 : vector<1x256xi1> to vector<1x256xi1>
    %263 = vector.broadcast %262 : vector<1x256xi1> to vector<2x256xi1>
    %264 = vector.broadcast %cst_43 : f32 to vector<2x256xf32>
    %265 = arith.select %263, %261, %264 : vector<2x256xi1>, vector<2x256xf32>
    %266 = arith.addf %252, %265 : vector<2x256xf32>
    %c47_i32 = arith.constant 47 : i32
    %267 = tpu.dynamic_rotate %33 by %c47_i32 dim 1 : vector<2x256xf32>, i32 -> vector<2x256xf32>
    %268 = arith.andi %40, %95 : vector<1x256xi1>
    %269 = arith.subf %115, %164 : f32
    %270 = vector.broadcast %269 : f32 to vector<2x1xf32>
    %271 = arith.mulf %270, %110 : vector<2x1xf32>
    %272 = vector.broadcast %164 : f32 to vector<2x1xf32>
    %273 = arith.addf %272, %271 : vector<2x1xf32>
    %274 = vector.broadcast %273 : vector<2x1xf32> to vector<2x256xf32>
    %275 = arith.mulf %267, %274 : vector<2x256xf32>
    %cst_44 = arith.constant 0.000000e+00 : f32
    %276 = vector.shape_cast %268 : vector<1x256xi1> to vector<1x256xi1>
    %277 = vector.broadcast %276 : vector<1x256xi1> to vector<2x256xi1>
    %278 = vector.broadcast %cst_44 : f32 to vector<2x256xf32>
    %279 = arith.select %277, %275, %278 : vector<2x256xi1>, vector<2x256xf32>
    %280 = arith.addf %266, %279 : vector<2x256xf32>
    %c46_i32 = arith.constant 46 : i32
    %281 = tpu.dynamic_rotate %33 by %c46_i32 dim 1 : vector<2x256xf32>, i32 -> vector<2x256xf32>
    %282 = arith.andi %40, %100 : vector<1x256xi1>
    %283 = arith.subf %116, %165 : f32
    %284 = vector.broadcast %283 : f32 to vector<2x1xf32>
    %285 = arith.mulf %284, %110 : vector<2x1xf32>
    %286 = vector.broadcast %165 : f32 to vector<2x1xf32>
    %287 = arith.addf %286, %285 : vector<2x1xf32>
    %288 = vector.broadcast %287 : vector<2x1xf32> to vector<2x256xf32>
    %289 = arith.mulf %281, %288 : vector<2x256xf32>
    %cst_45 = arith.constant 0.000000e+00 : f32
    %290 = vector.shape_cast %282 : vector<1x256xi1> to vector<1x256xi1>
    %291 = vector.broadcast %290 : vector<1x256xi1> to vector<2x256xi1>
    %292 = vector.broadcast %cst_45 : f32 to vector<2x256xf32>
    %293 = arith.select %291, %289, %292 : vector<2x256xi1>, vector<2x256xf32>
    %294 = arith.addf %280, %293 : vector<2x256xf32>
    %c45_i32 = arith.constant 45 : i32
    %295 = tpu.dynamic_rotate %33 by %c45_i32 dim 1 : vector<2x256xf32>, i32 -> vector<2x256xf32>
    %296 = arith.andi %40, %105 : vector<1x256xi1>
    %297 = arith.subf %117, %166 : f32
    %298 = vector.broadcast %297 : f32 to vector<2x1xf32>
    %299 = arith.mulf %298, %110 : vector<2x1xf32>
    %300 = vector.broadcast %166 : f32 to vector<2x1xf32>
    %301 = arith.addf %300, %299 : vector<2x1xf32>
    %302 = vector.broadcast %301 : vector<2x1xf32> to vector<2x256xf32>
    %303 = arith.mulf %295, %302 : vector<2x256xf32>
    %cst_46 = arith.constant 0.000000e+00 : f32
    %304 = vector.shape_cast %296 : vector<1x256xi1> to vector<1x256xi1>
    %305 = vector.broadcast %304 : vector<1x256xi1> to vector<2x256xi1>
    %306 = vector.broadcast %cst_46 : f32 to vector<2x256xf32>
    %307 = arith.select %305, %303, %306 : vector<2x256xi1>, vector<2x256xf32>
    %308 = arith.addf %294, %307 : vector<2x256xf32>
    %c35_i32 = arith.constant 35 : i32
    %309 = tpu.dynamic_rotate %33 by %c35_i32 dim 1 : vector<2x256xf32>, i32 -> vector<2x256xf32>
    %310 = arith.andi %45, %75 : vector<1x256xi1>
    %311 = arith.subf %118, %167 : f32
    %312 = vector.broadcast %311 : f32 to vector<2x1xf32>
    %313 = arith.mulf %312, %110 : vector<2x1xf32>
    %314 = vector.broadcast %167 : f32 to vector<2x1xf32>
    %315 = arith.addf %314, %313 : vector<2x1xf32>
    %316 = vector.broadcast %315 : vector<2x1xf32> to vector<2x256xf32>
    %317 = arith.mulf %309, %316 : vector<2x256xf32>
    %cst_47 = arith.constant 0.000000e+00 : f32
    %318 = vector.shape_cast %310 : vector<1x256xi1> to vector<1x256xi1>
    %319 = vector.broadcast %318 : vector<1x256xi1> to vector<2x256xi1>
    %320 = vector.broadcast %cst_47 : f32 to vector<2x256xf32>
    %321 = arith.select %319, %317, %320 : vector<2x256xi1>, vector<2x256xf32>
    %322 = arith.addf %308, %321 : vector<2x256xf32>
    %c34_i32 = arith.constant 34 : i32
    %323 = tpu.dynamic_rotate %33 by %c34_i32 dim 1 : vector<2x256xf32>, i32 -> vector<2x256xf32>
    %324 = arith.andi %45, %80 : vector<1x256xi1>
    %325 = arith.subf %119, %168 : f32
    %326 = vector.broadcast %325 : f32 to vector<2x1xf32>
    %327 = arith.mulf %326, %110 : vector<2x1xf32>
    %328 = vector.broadcast %168 : f32 to vector<2x1xf32>
    %329 = arith.addf %328, %327 : vector<2x1xf32>
    %330 = vector.broadcast %329 : vector<2x1xf32> to vector<2x256xf32>
    %331 = arith.mulf %323, %330 : vector<2x256xf32>
    %cst_48 = arith.constant 0.000000e+00 : f32
    %332 = vector.shape_cast %324 : vector<1x256xi1> to vector<1x256xi1>
    %333 = vector.broadcast %332 : vector<1x256xi1> to vector<2x256xi1>
    %334 = vector.broadcast %cst_48 : f32 to vector<2x256xf32>
    %335 = arith.select %333, %331, %334 : vector<2x256xi1>, vector<2x256xf32>
    %336 = arith.addf %322, %335 : vector<2x256xf32>
    %c33_i32 = arith.constant 33 : i32
    %337 = tpu.dynamic_rotate %33 by %c33_i32 dim 1 : vector<2x256xf32>, i32 -> vector<2x256xf32>
    %338 = arith.andi %45, %85 : vector<1x256xi1>
    %339 = arith.subf %120, %169 : f32
    %340 = vector.broadcast %339 : f32 to vector<2x1xf32>
    %341 = arith.mulf %340, %110 : vector<2x1xf32>
    %342 = vector.broadcast %169 : f32 to vector<2x1xf32>
    %343 = arith.addf %342, %341 : vector<2x1xf32>
    %344 = vector.broadcast %343 : vector<2x1xf32> to vector<2x256xf32>
    %345 = arith.mulf %337, %344 : vector<2x256xf32>
    %cst_49 = arith.constant 0.000000e+00 : f32
    %346 = vector.shape_cast %338 : vector<1x256xi1> to vector<1x256xi1>
    %347 = vector.broadcast %346 : vector<1x256xi1> to vector<2x256xi1>
    %348 = vector.broadcast %cst_49 : f32 to vector<2x256xf32>
    %349 = arith.select %347, %345, %348 : vector<2x256xi1>, vector<2x256xf32>
    %350 = arith.addf %336, %349 : vector<2x256xf32>
    %c32_i32 = arith.constant 32 : i32
    %351 = tpu.dynamic_rotate %33 by %c32_i32 dim 1 : vector<2x256xf32>, i32 -> vector<2x256xf32>
    %352 = arith.andi %45, %90 : vector<1x256xi1>
    %353 = arith.subf %121, %170 : f32
    %354 = vector.broadcast %353 : f32 to vector<2x1xf32>
    %355 = arith.mulf %354, %110 : vector<2x1xf32>
    %356 = vector.broadcast %170 : f32 to vector<2x1xf32>
    %357 = arith.addf %356, %355 : vector<2x1xf32>
    %358 = vector.broadcast %357 : vector<2x1xf32> to vector<2x256xf32>
    %359 = arith.mulf %351, %358 : vector<2x256xf32>
    %cst_50 = arith.constant 0.000000e+00 : f32
    %360 = vector.shape_cast %352 : vector<1x256xi1> to vector<1x256xi1>
    %361 = vector.broadcast %360 : vector<1x256xi1> to vector<2x256xi1>
    %362 = vector.broadcast %cst_50 : f32 to vector<2x256xf32>
    %363 = arith.select %361, %359, %362 : vector<2x256xi1>, vector<2x256xf32>
    %364 = arith.addf %350, %363 : vector<2x256xf32>
    %c31_i32 = arith.constant 31 : i32
    %365 = tpu.dynamic_rotate %33 by %c31_i32 dim 1 : vector<2x256xf32>, i32 -> vector<2x256xf32>
    %366 = arith.andi %45, %95 : vector<1x256xi1>
    %367 = arith.subf %122, %171 : f32
    %368 = vector.broadcast %367 : f32 to vector<2x1xf32>
    %369 = arith.mulf %368, %110 : vector<2x1xf32>
    %370 = vector.broadcast %171 : f32 to vector<2x1xf32>
    %371 = arith.addf %370, %369 : vector<2x1xf32>
    %372 = vector.broadcast %371 : vector<2x1xf32> to vector<2x256xf32>
    %373 = arith.mulf %365, %372 : vector<2x256xf32>
    %cst_51 = arith.constant 0.000000e+00 : f32
    %374 = vector.shape_cast %366 : vector<1x256xi1> to vector<1x256xi1>
    %375 = vector.broadcast %374 : vector<1x256xi1> to vector<2x256xi1>
    %376 = vector.broadcast %cst_51 : f32 to vector<2x256xf32>
    %377 = arith.select %375, %373, %376 : vector<2x256xi1>, vector<2x256xf32>
    %378 = arith.addf %364, %377 : vector<2x256xf32>
    %c30_i32 = arith.constant 30 : i32
    %379 = tpu.dynamic_rotate %33 by %c30_i32 dim 1 : vector<2x256xf32>, i32 -> vector<2x256xf32>
    %380 = arith.andi %45, %100 : vector<1x256xi1>
    %381 = arith.subf %123, %172 : f32
    %382 = vector.broadcast %381 : f32 to vector<2x1xf32>
    %383 = arith.mulf %382, %110 : vector<2x1xf32>
    %384 = vector.broadcast %172 : f32 to vector<2x1xf32>
    %385 = arith.addf %384, %383 : vector<2x1xf32>
    %386 = vector.broadcast %385 : vector<2x1xf32> to vector<2x256xf32>
    %387 = arith.mulf %379, %386 : vector<2x256xf32>
    %cst_52 = arith.constant 0.000000e+00 : f32
    %388 = vector.shape_cast %380 : vector<1x256xi1> to vector<1x256xi1>
    %389 = vector.broadcast %388 : vector<1x256xi1> to vector<2x256xi1>
    %390 = vector.broadcast %cst_52 : f32 to vector<2x256xf32>
    %391 = arith.select %389, %387, %390 : vector<2x256xi1>, vector<2x256xf32>
    %392 = arith.addf %378, %391 : vector<2x256xf32>
    %c29_i32 = arith.constant 29 : i32
    %393 = tpu.dynamic_rotate %33 by %c29_i32 dim 1 : vector<2x256xf32>, i32 -> vector<2x256xf32>
    %394 = arith.andi %45, %105 : vector<1x256xi1>
    %395 = arith.subf %124, %173 : f32
    %396 = vector.broadcast %395 : f32 to vector<2x1xf32>
    %397 = arith.mulf %396, %110 : vector<2x1xf32>
    %398 = vector.broadcast %173 : f32 to vector<2x1xf32>
    %399 = arith.addf %398, %397 : vector<2x1xf32>
    %400 = vector.broadcast %399 : vector<2x1xf32> to vector<2x256xf32>
    %401 = arith.mulf %393, %400 : vector<2x256xf32>
    %cst_53 = arith.constant 0.000000e+00 : f32
    %402 = vector.shape_cast %394 : vector<1x256xi1> to vector<1x256xi1>
    %403 = vector.broadcast %402 : vector<1x256xi1> to vector<2x256xi1>
    %404 = vector.broadcast %cst_53 : f32 to vector<2x256xf32>
    %405 = arith.select %403, %401, %404 : vector<2x256xi1>, vector<2x256xf32>
    %406 = arith.addf %392, %405 : vector<2x256xf32>
    %c19_i32 = arith.constant 19 : i32
    %407 = tpu.dynamic_rotate %33 by %c19_i32 dim 1 : vector<2x256xf32>, i32 -> vector<2x256xf32>
    %408 = arith.andi %50, %75 : vector<1x256xi1>
    %409 = arith.subf %125, %174 : f32
    %410 = vector.broadcast %409 : f32 to vector<2x1xf32>
    %411 = arith.mulf %410, %110 : vector<2x1xf32>
    %412 = vector.broadcast %174 : f32 to vector<2x1xf32>
    %413 = arith.addf %412, %411 : vector<2x1xf32>
    %414 = vector.broadcast %413 : vector<2x1xf32> to vector<2x256xf32>
    %415 = arith.mulf %407, %414 : vector<2x256xf32>
    %cst_54 = arith.constant 0.000000e+00 : f32
    %416 = vector.shape_cast %408 : vector<1x256xi1> to vector<1x256xi1>
    %417 = vector.broadcast %416 : vector<1x256xi1> to vector<2x256xi1>
    %418 = vector.broadcast %cst_54 : f32 to vector<2x256xf32>
    %419 = arith.select %417, %415, %418 : vector<2x256xi1>, vector<2x256xf32>
    %420 = arith.addf %406, %419 : vector<2x256xf32>
    %c18_i32_55 = arith.constant 18 : i32
    %421 = tpu.dynamic_rotate %33 by %c18_i32_55 dim 1 : vector<2x256xf32>, i32 -> vector<2x256xf32>
    %422 = arith.andi %50, %80 : vector<1x256xi1>
    %423 = arith.subf %126, %175 : f32
    %424 = vector.broadcast %423 : f32 to vector<2x1xf32>
    %425 = arith.mulf %424, %110 : vector<2x1xf32>
    %426 = vector.broadcast %175 : f32 to vector<2x1xf32>
    %427 = arith.addf %426, %425 : vector<2x1xf32>
    %428 = vector.broadcast %427 : vector<2x1xf32> to vector<2x256xf32>
    %429 = arith.mulf %421, %428 : vector<2x256xf32>
    %cst_56 = arith.constant 0.000000e+00 : f32
    %430 = vector.shape_cast %422 : vector<1x256xi1> to vector<1x256xi1>
    %431 = vector.broadcast %430 : vector<1x256xi1> to vector<2x256xi1>
    %432 = vector.broadcast %cst_56 : f32 to vector<2x256xf32>
    %433 = arith.select %431, %429, %432 : vector<2x256xi1>, vector<2x256xf32>
    %434 = arith.addf %420, %433 : vector<2x256xf32>
    %c17_i32_57 = arith.constant 17 : i32
    %435 = tpu.dynamic_rotate %33 by %c17_i32_57 dim 1 : vector<2x256xf32>, i32 -> vector<2x256xf32>
    %436 = arith.andi %50, %85 : vector<1x256xi1>
    %437 = arith.subf %127, %176 : f32
    %438 = vector.broadcast %437 : f32 to vector<2x1xf32>
    %439 = arith.mulf %438, %110 : vector<2x1xf32>
    %440 = vector.broadcast %176 : f32 to vector<2x1xf32>
    %441 = arith.addf %440, %439 : vector<2x1xf32>
    %442 = vector.broadcast %441 : vector<2x1xf32> to vector<2x256xf32>
    %443 = arith.mulf %435, %442 : vector<2x256xf32>
    %cst_58 = arith.constant 0.000000e+00 : f32
    %444 = vector.shape_cast %436 : vector<1x256xi1> to vector<1x256xi1>
    %445 = vector.broadcast %444 : vector<1x256xi1> to vector<2x256xi1>
    %446 = vector.broadcast %cst_58 : f32 to vector<2x256xf32>
    %447 = arith.select %445, %443, %446 : vector<2x256xi1>, vector<2x256xf32>
    %448 = arith.addf %434, %447 : vector<2x256xf32>
    %c16_i32_59 = arith.constant 16 : i32
    %449 = tpu.dynamic_rotate %33 by %c16_i32_59 dim 1 : vector<2x256xf32>, i32 -> vector<2x256xf32>
    %450 = arith.andi %50, %90 : vector<1x256xi1>
    %451 = arith.subf %128, %177 : f32
    %452 = vector.broadcast %451 : f32 to vector<2x1xf32>
    %453 = arith.mulf %452, %110 : vector<2x1xf32>
    %454 = vector.broadcast %177 : f32 to vector<2x1xf32>
    %455 = arith.addf %454, %453 : vector<2x1xf32>
    %456 = vector.broadcast %455 : vector<2x1xf32> to vector<2x256xf32>
    %457 = arith.mulf %449, %456 : vector<2x256xf32>
    %cst_60 = arith.constant 0.000000e+00 : f32
    %458 = vector.shape_cast %450 : vector<1x256xi1> to vector<1x256xi1>
    %459 = vector.broadcast %458 : vector<1x256xi1> to vector<2x256xi1>
    %460 = vector.broadcast %cst_60 : f32 to vector<2x256xf32>
    %461 = arith.select %459, %457, %460 : vector<2x256xi1>, vector<2x256xf32>
    %462 = arith.addf %448, %461 : vector<2x256xf32>
    %c15_i32_61 = arith.constant 15 : i32
    %463 = tpu.dynamic_rotate %33 by %c15_i32_61 dim 1 : vector<2x256xf32>, i32 -> vector<2x256xf32>
    %464 = arith.andi %50, %95 : vector<1x256xi1>
    %465 = arith.subf %129, %178 : f32
    %466 = vector.broadcast %465 : f32 to vector<2x1xf32>
    %467 = arith.mulf %466, %110 : vector<2x1xf32>
    %468 = vector.broadcast %178 : f32 to vector<2x1xf32>
    %469 = arith.addf %468, %467 : vector<2x1xf32>
    %470 = vector.broadcast %469 : vector<2x1xf32> to vector<2x256xf32>
    %471 = arith.mulf %463, %470 : vector<2x256xf32>
    %cst_62 = arith.constant 0.000000e+00 : f32
    %472 = vector.shape_cast %464 : vector<1x256xi1> to vector<1x256xi1>
    %473 = vector.broadcast %472 : vector<1x256xi1> to vector<2x256xi1>
    %474 = vector.broadcast %cst_62 : f32 to vector<2x256xf32>
    %475 = arith.select %473, %471, %474 : vector<2x256xi1>, vector<2x256xf32>
    %476 = arith.addf %462, %475 : vector<2x256xf32>
    %c14_i32_63 = arith.constant 14 : i32
    %477 = tpu.dynamic_rotate %33 by %c14_i32_63 dim 1 : vector<2x256xf32>, i32 -> vector<2x256xf32>
    %478 = arith.andi %50, %100 : vector<1x256xi1>
    %479 = arith.subf %130, %179 : f32
    %480 = vector.broadcast %479 : f32 to vector<2x1xf32>
    %481 = arith.mulf %480, %110 : vector<2x1xf32>
    %482 = vector.broadcast %179 : f32 to vector<2x1xf32>
    %483 = arith.addf %482, %481 : vector<2x1xf32>
    %484 = vector.broadcast %483 : vector<2x1xf32> to vector<2x256xf32>
    %485 = arith.mulf %477, %484 : vector<2x256xf32>
    %cst_64 = arith.constant 0.000000e+00 : f32
    %486 = vector.shape_cast %478 : vector<1x256xi1> to vector<1x256xi1>
    %487 = vector.broadcast %486 : vector<1x256xi1> to vector<2x256xi1>
    %488 = vector.broadcast %cst_64 : f32 to vector<2x256xf32>
    %489 = arith.select %487, %485, %488 : vector<2x256xi1>, vector<2x256xf32>
    %490 = arith.addf %476, %489 : vector<2x256xf32>
    %c13_i32_65 = arith.constant 13 : i32
    %491 = tpu.dynamic_rotate %33 by %c13_i32_65 dim 1 : vector<2x256xf32>, i32 -> vector<2x256xf32>
    %492 = arith.andi %50, %105 : vector<1x256xi1>
    %493 = arith.subf %131, %180 : f32
    %494 = vector.broadcast %493 : f32 to vector<2x1xf32>
    %495 = arith.mulf %494, %110 : vector<2x1xf32>
    %496 = vector.broadcast %180 : f32 to vector<2x1xf32>
    %497 = arith.addf %496, %495 : vector<2x1xf32>
    %498 = vector.broadcast %497 : vector<2x1xf32> to vector<2x256xf32>
    %499 = arith.mulf %491, %498 : vector<2x256xf32>
    %cst_66 = arith.constant 0.000000e+00 : f32
    %500 = vector.shape_cast %492 : vector<1x256xi1> to vector<1x256xi1>
    %501 = vector.broadcast %500 : vector<1x256xi1> to vector<2x256xi1>
    %502 = vector.broadcast %cst_66 : f32 to vector<2x256xf32>
    %503 = arith.select %501, %499, %502 : vector<2x256xi1>, vector<2x256xf32>
    %504 = arith.addf %490, %503 : vector<2x256xf32>
    %c3_i32_67 = arith.constant 3 : i32
    %505 = tpu.dynamic_rotate %33 by %c3_i32_67 dim 1 : vector<2x256xf32>, i32 -> vector<2x256xf32>
    %506 = arith.andi %55, %75 : vector<1x256xi1>
    %507 = arith.subf %132, %181 : f32
    %508 = vector.broadcast %507 : f32 to vector<2x1xf32>
    %509 = arith.mulf %508, %110 : vector<2x1xf32>
    %510 = vector.broadcast %181 : f32 to vector<2x1xf32>
    %511 = arith.addf %510, %509 : vector<2x1xf32>
    %512 = vector.broadcast %511 : vector<2x1xf32> to vector<2x256xf32>
    %513 = arith.mulf %505, %512 : vector<2x256xf32>
    %cst_68 = arith.constant 0.000000e+00 : f32
    %514 = vector.shape_cast %506 : vector<1x256xi1> to vector<1x256xi1>
    %515 = vector.broadcast %514 : vector<1x256xi1> to vector<2x256xi1>
    %516 = vector.broadcast %cst_68 : f32 to vector<2x256xf32>
    %517 = arith.select %515, %513, %516 : vector<2x256xi1>, vector<2x256xf32>
    %518 = arith.addf %504, %517 : vector<2x256xf32>
    %c2_i32_69 = arith.constant 2 : i32
    %519 = tpu.dynamic_rotate %33 by %c2_i32_69 dim 1 : vector<2x256xf32>, i32 -> vector<2x256xf32>
    %520 = arith.andi %55, %80 : vector<1x256xi1>
    %521 = arith.subf %133, %182 : f32
    %522 = vector.broadcast %521 : f32 to vector<2x1xf32>
    %523 = arith.mulf %522, %110 : vector<2x1xf32>
    %524 = vector.broadcast %182 : f32 to vector<2x1xf32>
    %525 = arith.addf %524, %523 : vector<2x1xf32>
    %526 = vector.broadcast %525 : vector<2x1xf32> to vector<2x256xf32>
    %527 = arith.mulf %519, %526 : vector<2x256xf32>
    %cst_70 = arith.constant 0.000000e+00 : f32
    %528 = vector.shape_cast %520 : vector<1x256xi1> to vector<1x256xi1>
    %529 = vector.broadcast %528 : vector<1x256xi1> to vector<2x256xi1>
    %530 = vector.broadcast %cst_70 : f32 to vector<2x256xf32>
    %531 = arith.select %529, %527, %530 : vector<2x256xi1>, vector<2x256xf32>
    %532 = arith.addf %518, %531 : vector<2x256xf32>
    %c1_i32_71 = arith.constant 1 : i32
    %533 = tpu.dynamic_rotate %33 by %c1_i32_71 dim 1 : vector<2x256xf32>, i32 -> vector<2x256xf32>
    %534 = arith.andi %55, %85 : vector<1x256xi1>
    %535 = arith.subf %134, %183 : f32
    %536 = vector.broadcast %535 : f32 to vector<2x1xf32>
    %537 = arith.mulf %536, %110 : vector<2x1xf32>
    %538 = vector.broadcast %183 : f32 to vector<2x1xf32>
    %539 = arith.addf %538, %537 : vector<2x1xf32>
    %540 = vector.broadcast %539 : vector<2x1xf32> to vector<2x256xf32>
    %541 = arith.mulf %533, %540 : vector<2x256xf32>
    %cst_72 = arith.constant 0.000000e+00 : f32
    %542 = vector.shape_cast %534 : vector<1x256xi1> to vector<1x256xi1>
    %543 = vector.broadcast %542 : vector<1x256xi1> to vector<2x256xi1>
    %544 = vector.broadcast %cst_72 : f32 to vector<2x256xf32>
    %545 = arith.select %543, %541, %544 : vector<2x256xi1>, vector<2x256xf32>
    %546 = arith.addf %532, %545 : vector<2x256xf32>
    %547 = arith.andi %55, %90 : vector<1x256xi1>
    %548 = arith.subf %135, %184 : f32
    %549 = vector.broadcast %548 : f32 to vector<2x1xf32>
    %550 = arith.mulf %549, %110 : vector<2x1xf32>
    %551 = vector.broadcast %184 : f32 to vector<2x1xf32>
    %552 = arith.addf %551, %550 : vector<2x1xf32>
    %553 = vector.broadcast %552 : vector<2x1xf32> to vector<2x256xf32>
    %554 = arith.mulf %33, %553 : vector<2x256xf32>
    %cst_73 = arith.constant 0.000000e+00 : f32
    %555 = vector.shape_cast %547 : vector<1x256xi1> to vector<1x256xi1>
    %556 = vector.broadcast %555 : vector<1x256xi1> to vector<2x256xi1>
    %557 = vector.broadcast %cst_73 : f32 to vector<2x256xf32>
    %558 = arith.select %556, %554, %557 : vector<2x256xi1>, vector<2x256xf32>
    %559 = arith.addf %546, %558 : vector<2x256xf32>
    %c255_i32 = arith.constant 255 : i32
    %560 = tpu.dynamic_rotate %33 by %c255_i32 dim 1 : vector<2x256xf32>, i32 -> vector<2x256xf32>
    %561 = arith.andi %55, %95 : vector<1x256xi1>
    %562 = arith.subf %136, %185 : f32
    %563 = vector.broadcast %562 : f32 to vector<2x1xf32>
    %564 = arith.mulf %563, %110 : vector<2x1xf32>
    %565 = vector.broadcast %185 : f32 to vector<2x1xf32>
    %566 = arith.addf %565, %564 : vector<2x1xf32>
    %567 = vector.broadcast %566 : vector<2x1xf32> to vector<2x256xf32>
    %568 = arith.mulf %560, %567 : vector<2x256xf32>
    %cst_74 = arith.constant 0.000000e+00 : f32
    %569 = vector.shape_cast %561 : vector<1x256xi1> to vector<1x256xi1>
    %570 = vector.broadcast %569 : vector<1x256xi1> to vector<2x256xi1>
    %571 = vector.broadcast %cst_74 : f32 to vector<2x256xf32>
    %572 = arith.select %570, %568, %571 : vector<2x256xi1>, vector<2x256xf32>
    %573 = arith.addf %559, %572 : vector<2x256xf32>
    %c254_i32 = arith.constant 254 : i32
    %574 = tpu.dynamic_rotate %33 by %c254_i32 dim 1 : vector<2x256xf32>, i32 -> vector<2x256xf32>
    %575 = arith.andi %55, %100 : vector<1x256xi1>
    %576 = arith.subf %137, %186 : f32
    %577 = vector.broadcast %576 : f32 to vector<2x1xf32>
    %578 = arith.mulf %577, %110 : vector<2x1xf32>
    %579 = vector.broadcast %186 : f32 to vector<2x1xf32>
    %580 = arith.addf %579, %578 : vector<2x1xf32>
    %581 = vector.broadcast %580 : vector<2x1xf32> to vector<2x256xf32>
    %582 = arith.mulf %574, %581 : vector<2x256xf32>
    %cst_75 = arith.constant 0.000000e+00 : f32
    %583 = vector.shape_cast %575 : vector<1x256xi1> to vector<1x256xi1>
    %584 = vector.broadcast %583 : vector<1x256xi1> to vector<2x256xi1>
    %585 = vector.broadcast %cst_75 : f32 to vector<2x256xf32>
    %586 = arith.select %584, %582, %585 : vector<2x256xi1>, vector<2x256xf32>
    %587 = arith.addf %573, %586 : vector<2x256xf32>
    %c253_i32 = arith.constant 253 : i32
    %588 = tpu.dynamic_rotate %33 by %c253_i32 dim 1 : vector<2x256xf32>, i32 -> vector<2x256xf32>
    %589 = arith.andi %55, %105 : vector<1x256xi1>
    %590 = arith.subf %138, %187 : f32
    %591 = vector.broadcast %590 : f32 to vector<2x1xf32>
    %592 = arith.mulf %591, %110 : vector<2x1xf32>
    %593 = vector.broadcast %187 : f32 to vector<2x1xf32>
    %594 = arith.addf %593, %592 : vector<2x1xf32>
    %595 = vector.broadcast %594 : vector<2x1xf32> to vector<2x256xf32>
    %596 = arith.mulf %588, %595 : vector<2x256xf32>
    %cst_76 = arith.constant 0.000000e+00 : f32
    %597 = vector.shape_cast %589 : vector<1x256xi1> to vector<1x256xi1>
    %598 = vector.broadcast %597 : vector<1x256xi1> to vector<2x256xi1>
    %599 = vector.broadcast %cst_76 : f32 to vector<2x256xf32>
    %600 = arith.select %598, %596, %599 : vector<2x256xi1>, vector<2x256xf32>
    %601 = arith.addf %587, %600 : vector<2x256xf32>
    %c243_i32 = arith.constant 243 : i32
    %602 = tpu.dynamic_rotate %33 by %c243_i32 dim 1 : vector<2x256xf32>, i32 -> vector<2x256xf32>
    %603 = arith.andi %60, %75 : vector<1x256xi1>
    %604 = arith.subf %139, %188 : f32
    %605 = vector.broadcast %604 : f32 to vector<2x1xf32>
    %606 = arith.mulf %605, %110 : vector<2x1xf32>
    %607 = vector.broadcast %188 : f32 to vector<2x1xf32>
    %608 = arith.addf %607, %606 : vector<2x1xf32>
    %609 = vector.broadcast %608 : vector<2x1xf32> to vector<2x256xf32>
    %610 = arith.mulf %602, %609 : vector<2x256xf32>
    %cst_77 = arith.constant 0.000000e+00 : f32
    %611 = vector.shape_cast %603 : vector<1x256xi1> to vector<1x256xi1>
    %612 = vector.broadcast %611 : vector<1x256xi1> to vector<2x256xi1>
    %613 = vector.broadcast %cst_77 : f32 to vector<2x256xf32>
    %614 = arith.select %612, %610, %613 : vector<2x256xi1>, vector<2x256xf32>
    %615 = arith.addf %601, %614 : vector<2x256xf32>
    %c242_i32 = arith.constant 242 : i32
    %616 = tpu.dynamic_rotate %33 by %c242_i32 dim 1 : vector<2x256xf32>, i32 -> vector<2x256xf32>
    %617 = arith.andi %60, %80 : vector<1x256xi1>
    %618 = arith.subf %140, %189 : f32
    %619 = vector.broadcast %618 : f32 to vector<2x1xf32>
    %620 = arith.mulf %619, %110 : vector<2x1xf32>
    %621 = vector.broadcast %189 : f32 to vector<2x1xf32>
    %622 = arith.addf %621, %620 : vector<2x1xf32>
    %623 = vector.broadcast %622 : vector<2x1xf32> to vector<2x256xf32>
    %624 = arith.mulf %616, %623 : vector<2x256xf32>
    %cst_78 = arith.constant 0.000000e+00 : f32
    %625 = vector.shape_cast %617 : vector<1x256xi1> to vector<1x256xi1>
    %626 = vector.broadcast %625 : vector<1x256xi1> to vector<2x256xi1>
    %627 = vector.broadcast %cst_78 : f32 to vector<2x256xf32>
    %628 = arith.select %626, %624, %627 : vector<2x256xi1>, vector<2x256xf32>
    %629 = arith.addf %615, %628 : vector<2x256xf32>
    %c241_i32 = arith.constant 241 : i32
    %630 = tpu.dynamic_rotate %33 by %c241_i32 dim 1 : vector<2x256xf32>, i32 -> vector<2x256xf32>
    %631 = arith.andi %60, %85 : vector<1x256xi1>
    %632 = arith.subf %141, %190 : f32
    %633 = vector.broadcast %632 : f32 to vector<2x1xf32>
    %634 = arith.mulf %633, %110 : vector<2x1xf32>
    %635 = vector.broadcast %190 : f32 to vector<2x1xf32>
    %636 = arith.addf %635, %634 : vector<2x1xf32>
    %637 = vector.broadcast %636 : vector<2x1xf32> to vector<2x256xf32>
    %638 = arith.mulf %630, %637 : vector<2x256xf32>
    %cst_79 = arith.constant 0.000000e+00 : f32
    %639 = vector.shape_cast %631 : vector<1x256xi1> to vector<1x256xi1>
    %640 = vector.broadcast %639 : vector<1x256xi1> to vector<2x256xi1>
    %641 = vector.broadcast %cst_79 : f32 to vector<2x256xf32>
    %642 = arith.select %640, %638, %641 : vector<2x256xi1>, vector<2x256xf32>
    %643 = arith.addf %629, %642 : vector<2x256xf32>
    %c240_i32 = arith.constant 240 : i32
    %644 = tpu.dynamic_rotate %33 by %c240_i32 dim 1 : vector<2x256xf32>, i32 -> vector<2x256xf32>
    %645 = arith.andi %60, %90 : vector<1x256xi1>
    %646 = arith.subf %142, %191 : f32
    %647 = vector.broadcast %646 : f32 to vector<2x1xf32>
    %648 = arith.mulf %647, %110 : vector<2x1xf32>
    %649 = vector.broadcast %191 : f32 to vector<2x1xf32>
    %650 = arith.addf %649, %648 : vector<2x1xf32>
    %651 = vector.broadcast %650 : vector<2x1xf32> to vector<2x256xf32>
    %652 = arith.mulf %644, %651 : vector<2x256xf32>
    %cst_80 = arith.constant 0.000000e+00 : f32
    %653 = vector.shape_cast %645 : vector<1x256xi1> to vector<1x256xi1>
    %654 = vector.broadcast %653 : vector<1x256xi1> to vector<2x256xi1>
    %655 = vector.broadcast %cst_80 : f32 to vector<2x256xf32>
    %656 = arith.select %654, %652, %655 : vector<2x256xi1>, vector<2x256xf32>
    %657 = arith.addf %643, %656 : vector<2x256xf32>
    %c239_i32 = arith.constant 239 : i32
    %658 = tpu.dynamic_rotate %33 by %c239_i32 dim 1 : vector<2x256xf32>, i32 -> vector<2x256xf32>
    %659 = arith.andi %60, %95 : vector<1x256xi1>
    %660 = arith.subf %143, %192 : f32
    %661 = vector.broadcast %660 : f32 to vector<2x1xf32>
    %662 = arith.mulf %661, %110 : vector<2x1xf32>
    %663 = vector.broadcast %192 : f32 to vector<2x1xf32>
    %664 = arith.addf %663, %662 : vector<2x1xf32>
    %665 = vector.broadcast %664 : vector<2x1xf32> to vector<2x256xf32>
    %666 = arith.mulf %658, %665 : vector<2x256xf32>
    %cst_81 = arith.constant 0.000000e+00 : f32
    %667 = vector.shape_cast %659 : vector<1x256xi1> to vector<1x256xi1>
    %668 = vector.broadcast %667 : vector<1x256xi1> to vector<2x256xi1>
    %669 = vector.broadcast %cst_81 : f32 to vector<2x256xf32>
    %670 = arith.select %668, %666, %669 : vector<2x256xi1>, vector<2x256xf32>
    %671 = arith.addf %657, %670 : vector<2x256xf32>
    %c238_i32 = arith.constant 238 : i32
    %672 = tpu.dynamic_rotate %33 by %c238_i32 dim 1 : vector<2x256xf32>, i32 -> vector<2x256xf32>
    %673 = arith.andi %60, %100 : vector<1x256xi1>
    %674 = arith.subf %144, %193 : f32
    %675 = vector.broadcast %674 : f32 to vector<2x1xf32>
    %676 = arith.mulf %675, %110 : vector<2x1xf32>
    %677 = vector.broadcast %193 : f32 to vector<2x1xf32>
    %678 = arith.addf %677, %676 : vector<2x1xf32>
    %679 = vector.broadcast %678 : vector<2x1xf32> to vector<2x256xf32>
    %680 = arith.mulf %672, %679 : vector<2x256xf32>
    %cst_82 = arith.constant 0.000000e+00 : f32
    %681 = vector.shape_cast %673 : vector<1x256xi1> to vector<1x256xi1>
    %682 = vector.broadcast %681 : vector<1x256xi1> to vector<2x256xi1>
    %683 = vector.broadcast %cst_82 : f32 to vector<2x256xf32>
    %684 = arith.select %682, %680, %683 : vector<2x256xi1>, vector<2x256xf32>
    %685 = arith.addf %671, %684 : vector<2x256xf32>
    %c237_i32 = arith.constant 237 : i32
    %686 = tpu.dynamic_rotate %33 by %c237_i32 dim 1 : vector<2x256xf32>, i32 -> vector<2x256xf32>
    %687 = arith.andi %60, %105 : vector<1x256xi1>
    %688 = arith.subf %145, %194 : f32
    %689 = vector.broadcast %688 : f32 to vector<2x1xf32>
    %690 = arith.mulf %689, %110 : vector<2x1xf32>
    %691 = vector.broadcast %194 : f32 to vector<2x1xf32>
    %692 = arith.addf %691, %690 : vector<2x1xf32>
    %693 = vector.broadcast %692 : vector<2x1xf32> to vector<2x256xf32>
    %694 = arith.mulf %686, %693 : vector<2x256xf32>
    %cst_83 = arith.constant 0.000000e+00 : f32
    %695 = vector.shape_cast %687 : vector<1x256xi1> to vector<1x256xi1>
    %696 = vector.broadcast %695 : vector<1x256xi1> to vector<2x256xi1>
    %697 = vector.broadcast %cst_83 : f32 to vector<2x256xf32>
    %698 = arith.select %696, %694, %697 : vector<2x256xi1>, vector<2x256xf32>
    %699 = arith.addf %685, %698 : vector<2x256xf32>
    %c227_i32 = arith.constant 227 : i32
    %700 = tpu.dynamic_rotate %33 by %c227_i32 dim 1 : vector<2x256xf32>, i32 -> vector<2x256xf32>
    %701 = arith.andi %65, %75 : vector<1x256xi1>
    %702 = arith.subf %146, %195 : f32
    %703 = vector.broadcast %702 : f32 to vector<2x1xf32>
    %704 = arith.mulf %703, %110 : vector<2x1xf32>
    %705 = vector.broadcast %195 : f32 to vector<2x1xf32>
    %706 = arith.addf %705, %704 : vector<2x1xf32>
    %707 = vector.broadcast %706 : vector<2x1xf32> to vector<2x256xf32>
    %708 = arith.mulf %700, %707 : vector<2x256xf32>
    %cst_84 = arith.constant 0.000000e+00 : f32
    %709 = vector.shape_cast %701 : vector<1x256xi1> to vector<1x256xi1>
    %710 = vector.broadcast %709 : vector<1x256xi1> to vector<2x256xi1>
    %711 = vector.broadcast %cst_84 : f32 to vector<2x256xf32>
    %712 = arith.select %710, %708, %711 : vector<2x256xi1>, vector<2x256xf32>
    %713 = arith.addf %699, %712 : vector<2x256xf32>
    %c226_i32 = arith.constant 226 : i32
    %714 = tpu.dynamic_rotate %33 by %c226_i32 dim 1 : vector<2x256xf32>, i32 -> vector<2x256xf32>
    %715 = arith.andi %65, %80 : vector<1x256xi1>
    %716 = arith.subf %147, %196 : f32
    %717 = vector.broadcast %716 : f32 to vector<2x1xf32>
    %718 = arith.mulf %717, %110 : vector<2x1xf32>
    %719 = vector.broadcast %196 : f32 to vector<2x1xf32>
    %720 = arith.addf %719, %718 : vector<2x1xf32>
    %721 = vector.broadcast %720 : vector<2x1xf32> to vector<2x256xf32>
    %722 = arith.mulf %714, %721 : vector<2x256xf32>
    %cst_85 = arith.constant 0.000000e+00 : f32
    %723 = vector.shape_cast %715 : vector<1x256xi1> to vector<1x256xi1>
    %724 = vector.broadcast %723 : vector<1x256xi1> to vector<2x256xi1>
    %725 = vector.broadcast %cst_85 : f32 to vector<2x256xf32>
    %726 = arith.select %724, %722, %725 : vector<2x256xi1>, vector<2x256xf32>
    %727 = arith.addf %713, %726 : vector<2x256xf32>
    %c225_i32 = arith.constant 225 : i32
    %728 = tpu.dynamic_rotate %33 by %c225_i32 dim 1 : vector<2x256xf32>, i32 -> vector<2x256xf32>
    %729 = arith.andi %65, %85 : vector<1x256xi1>
    %730 = arith.subf %148, %197 : f32
    %731 = vector.broadcast %730 : f32 to vector<2x1xf32>
    %732 = arith.mulf %731, %110 : vector<2x1xf32>
    %733 = vector.broadcast %197 : f32 to vector<2x1xf32>
    %734 = arith.addf %733, %732 : vector<2x1xf32>
    %735 = vector.broadcast %734 : vector<2x1xf32> to vector<2x256xf32>
    %736 = arith.mulf %728, %735 : vector<2x256xf32>
    %cst_86 = arith.constant 0.000000e+00 : f32
    %737 = vector.shape_cast %729 : vector<1x256xi1> to vector<1x256xi1>
    %738 = vector.broadcast %737 : vector<1x256xi1> to vector<2x256xi1>
    %739 = vector.broadcast %cst_86 : f32 to vector<2x256xf32>
    %740 = arith.select %738, %736, %739 : vector<2x256xi1>, vector<2x256xf32>
    %741 = arith.addf %727, %740 : vector<2x256xf32>
    %c224_i32 = arith.constant 224 : i32
    %742 = tpu.dynamic_rotate %33 by %c224_i32 dim 1 : vector<2x256xf32>, i32 -> vector<2x256xf32>
    %743 = arith.andi %65, %90 : vector<1x256xi1>
    %744 = arith.subf %149, %198 : f32
    %745 = vector.broadcast %744 : f32 to vector<2x1xf32>
    %746 = arith.mulf %745, %110 : vector<2x1xf32>
    %747 = vector.broadcast %198 : f32 to vector<2x1xf32>
    %748 = arith.addf %747, %746 : vector<2x1xf32>
    %749 = vector.broadcast %748 : vector<2x1xf32> to vector<2x256xf32>
    %750 = arith.mulf %742, %749 : vector<2x256xf32>
    %cst_87 = arith.constant 0.000000e+00 : f32
    %751 = vector.shape_cast %743 : vector<1x256xi1> to vector<1x256xi1>
    %752 = vector.broadcast %751 : vector<1x256xi1> to vector<2x256xi1>
    %753 = vector.broadcast %cst_87 : f32 to vector<2x256xf32>
    %754 = arith.select %752, %750, %753 : vector<2x256xi1>, vector<2x256xf32>
    %755 = arith.addf %741, %754 : vector<2x256xf32>
    %c223_i32 = arith.constant 223 : i32
    %756 = tpu.dynamic_rotate %33 by %c223_i32 dim 1 : vector<2x256xf32>, i32 -> vector<2x256xf32>
    %757 = arith.andi %65, %95 : vector<1x256xi1>
    %758 = arith.subf %150, %199 : f32
    %759 = vector.broadcast %758 : f32 to vector<2x1xf32>
    %760 = arith.mulf %759, %110 : vector<2x1xf32>
    %761 = vector.broadcast %199 : f32 to vector<2x1xf32>
    %762 = arith.addf %761, %760 : vector<2x1xf32>
    %763 = vector.broadcast %762 : vector<2x1xf32> to vector<2x256xf32>
    %764 = arith.mulf %756, %763 : vector<2x256xf32>
    %cst_88 = arith.constant 0.000000e+00 : f32
    %765 = vector.shape_cast %757 : vector<1x256xi1> to vector<1x256xi1>
    %766 = vector.broadcast %765 : vector<1x256xi1> to vector<2x256xi1>
    %767 = vector.broadcast %cst_88 : f32 to vector<2x256xf32>
    %768 = arith.select %766, %764, %767 : vector<2x256xi1>, vector<2x256xf32>
    %769 = arith.addf %755, %768 : vector<2x256xf32>
    %c222_i32 = arith.constant 222 : i32
    %770 = tpu.dynamic_rotate %33 by %c222_i32 dim 1 : vector<2x256xf32>, i32 -> vector<2x256xf32>
    %771 = arith.andi %65, %100 : vector<1x256xi1>
    %772 = arith.subf %151, %200 : f32
    %773 = vector.broadcast %772 : f32 to vector<2x1xf32>
    %774 = arith.mulf %773, %110 : vector<2x1xf32>
    %775 = vector.broadcast %200 : f32 to vector<2x1xf32>
    %776 = arith.addf %775, %774 : vector<2x1xf32>
    %777 = vector.broadcast %776 : vector<2x1xf32> to vector<2x256xf32>
    %778 = arith.mulf %770, %777 : vector<2x256xf32>
    %cst_89 = arith.constant 0.000000e+00 : f32
    %779 = vector.shape_cast %771 : vector<1x256xi1> to vector<1x256xi1>
    %780 = vector.broadcast %779 : vector<1x256xi1> to vector<2x256xi1>
    %781 = vector.broadcast %cst_89 : f32 to vector<2x256xf32>
    %782 = arith.select %780, %778, %781 : vector<2x256xi1>, vector<2x256xf32>
    %783 = arith.addf %769, %782 : vector<2x256xf32>
    %c221_i32 = arith.constant 221 : i32
    %784 = tpu.dynamic_rotate %33 by %c221_i32 dim 1 : vector<2x256xf32>, i32 -> vector<2x256xf32>
    %785 = arith.andi %65, %105 : vector<1x256xi1>
    %786 = arith.subf %152, %201 : f32
    %787 = vector.broadcast %786 : f32 to vector<2x1xf32>
    %788 = arith.mulf %787, %110 : vector<2x1xf32>
    %789 = vector.broadcast %201 : f32 to vector<2x1xf32>
    %790 = arith.addf %789, %788 : vector<2x1xf32>
    %791 = vector.broadcast %790 : vector<2x1xf32> to vector<2x256xf32>
    %792 = arith.mulf %784, %791 : vector<2x256xf32>
    %cst_90 = arith.constant 0.000000e+00 : f32
    %793 = vector.shape_cast %785 : vector<1x256xi1> to vector<1x256xi1>
    %794 = vector.broadcast %793 : vector<1x256xi1> to vector<2x256xi1>
    %795 = vector.broadcast %cst_90 : f32 to vector<2x256xf32>
    %796 = arith.select %794, %792, %795 : vector<2x256xi1>, vector<2x256xf32>
    %797 = arith.addf %783, %796 : vector<2x256xf32>
    %c211_i32 = arith.constant 211 : i32
    %798 = tpu.dynamic_rotate %33 by %c211_i32 dim 1 : vector<2x256xf32>, i32 -> vector<2x256xf32>
    %799 = arith.andi %70, %75 : vector<1x256xi1>
    %800 = arith.subf %153, %202 : f32
    %801 = vector.broadcast %800 : f32 to vector<2x1xf32>
    %802 = arith.mulf %801, %110 : vector<2x1xf32>
    %803 = vector.broadcast %202 : f32 to vector<2x1xf32>
    %804 = arith.addf %803, %802 : vector<2x1xf32>
    %805 = vector.broadcast %804 : vector<2x1xf32> to vector<2x256xf32>
    %806 = arith.mulf %798, %805 : vector<2x256xf32>
    %cst_91 = arith.constant 0.000000e+00 : f32
    %807 = vector.shape_cast %799 : vector<1x256xi1> to vector<1x256xi1>
    %808 = vector.broadcast %807 : vector<1x256xi1> to vector<2x256xi1>
    %809 = vector.broadcast %cst_91 : f32 to vector<2x256xf32>
    %810 = arith.select %808, %806, %809 : vector<2x256xi1>, vector<2x256xf32>
    %811 = arith.addf %797, %810 : vector<2x256xf32>
    %c210_i32 = arith.constant 210 : i32
    %812 = tpu.dynamic_rotate %33 by %c210_i32 dim 1 : vector<2x256xf32>, i32 -> vector<2x256xf32>
    %813 = arith.andi %70, %80 : vector<1x256xi1>
    %814 = arith.subf %154, %203 : f32
    %815 = vector.broadcast %814 : f32 to vector<2x1xf32>
    %816 = arith.mulf %815, %110 : vector<2x1xf32>
    %817 = vector.broadcast %203 : f32 to vector<2x1xf32>
    %818 = arith.addf %817, %816 : vector<2x1xf32>
    %819 = vector.broadcast %818 : vector<2x1xf32> to vector<2x256xf32>
    %820 = arith.mulf %812, %819 : vector<2x256xf32>
    %cst_92 = arith.constant 0.000000e+00 : f32
    %821 = vector.shape_cast %813 : vector<1x256xi1> to vector<1x256xi1>
    %822 = vector.broadcast %821 : vector<1x256xi1> to vector<2x256xi1>
    %823 = vector.broadcast %cst_92 : f32 to vector<2x256xf32>
    %824 = arith.select %822, %820, %823 : vector<2x256xi1>, vector<2x256xf32>
    %825 = arith.addf %811, %824 : vector<2x256xf32>
    %c209_i32 = arith.constant 209 : i32
    %826 = tpu.dynamic_rotate %33 by %c209_i32 dim 1 : vector<2x256xf32>, i32 -> vector<2x256xf32>
    %827 = arith.andi %70, %85 : vector<1x256xi1>
    %828 = arith.subf %155, %204 : f32
    %829 = vector.broadcast %828 : f32 to vector<2x1xf32>
    %830 = arith.mulf %829, %110 : vector<2x1xf32>
    %831 = vector.broadcast %204 : f32 to vector<2x1xf32>
    %832 = arith.addf %831, %830 : vector<2x1xf32>
    %833 = vector.broadcast %832 : vector<2x1xf32> to vector<2x256xf32>
    %834 = arith.mulf %826, %833 : vector<2x256xf32>
    %cst_93 = arith.constant 0.000000e+00 : f32
    %835 = vector.shape_cast %827 : vector<1x256xi1> to vector<1x256xi1>
    %836 = vector.broadcast %835 : vector<1x256xi1> to vector<2x256xi1>
    %837 = vector.broadcast %cst_93 : f32 to vector<2x256xf32>
    %838 = arith.select %836, %834, %837 : vector<2x256xi1>, vector<2x256xf32>
    %839 = arith.addf %825, %838 : vector<2x256xf32>
    %c208_i32 = arith.constant 208 : i32
    %840 = tpu.dynamic_rotate %33 by %c208_i32 dim 1 : vector<2x256xf32>, i32 -> vector<2x256xf32>
    %841 = arith.andi %70, %90 : vector<1x256xi1>
    %842 = arith.subf %156, %205 : f32
    %843 = vector.broadcast %842 : f32 to vector<2x1xf32>
    %844 = arith.mulf %843, %110 : vector<2x1xf32>
    %845 = vector.broadcast %205 : f32 to vector<2x1xf32>
    %846 = arith.addf %845, %844 : vector<2x1xf32>
    %847 = vector.broadcast %846 : vector<2x1xf32> to vector<2x256xf32>
    %848 = arith.mulf %840, %847 : vector<2x256xf32>
    %cst_94 = arith.constant 0.000000e+00 : f32
    %849 = vector.shape_cast %841 : vector<1x256xi1> to vector<1x256xi1>
    %850 = vector.broadcast %849 : vector<1x256xi1> to vector<2x256xi1>
    %851 = vector.broadcast %cst_94 : f32 to vector<2x256xf32>
    %852 = arith.select %850, %848, %851 : vector<2x256xi1>, vector<2x256xf32>
    %853 = arith.addf %839, %852 : vector<2x256xf32>
    %c207_i32 = arith.constant 207 : i32
    %854 = tpu.dynamic_rotate %33 by %c207_i32 dim 1 : vector<2x256xf32>, i32 -> vector<2x256xf32>
    %855 = arith.andi %70, %95 : vector<1x256xi1>
    %856 = arith.subf %157, %206 : f32
    %857 = vector.broadcast %856 : f32 to vector<2x1xf32>
    %858 = arith.mulf %857, %110 : vector<2x1xf32>
    %859 = vector.broadcast %206 : f32 to vector<2x1xf32>
    %860 = arith.addf %859, %858 : vector<2x1xf32>
    %861 = vector.broadcast %860 : vector<2x1xf32> to vector<2x256xf32>
    %862 = arith.mulf %854, %861 : vector<2x256xf32>
    %cst_95 = arith.constant 0.000000e+00 : f32
    %863 = vector.shape_cast %855 : vector<1x256xi1> to vector<1x256xi1>
    %864 = vector.broadcast %863 : vector<1x256xi1> to vector<2x256xi1>
    %865 = vector.broadcast %cst_95 : f32 to vector<2x256xf32>
    %866 = arith.select %864, %862, %865 : vector<2x256xi1>, vector<2x256xf32>
    %867 = arith.addf %853, %866 : vector<2x256xf32>
    %c206_i32 = arith.constant 206 : i32
    %868 = tpu.dynamic_rotate %33 by %c206_i32 dim 1 : vector<2x256xf32>, i32 -> vector<2x256xf32>
    %869 = arith.andi %70, %100 : vector<1x256xi1>
    %870 = arith.subf %158, %207 : f32
    %871 = vector.broadcast %870 : f32 to vector<2x1xf32>
    %872 = arith.mulf %871, %110 : vector<2x1xf32>
    %873 = vector.broadcast %207 : f32 to vector<2x1xf32>
    %874 = arith.addf %873, %872 : vector<2x1xf32>
    %875 = vector.broadcast %874 : vector<2x1xf32> to vector<2x256xf32>
    %876 = arith.mulf %868, %875 : vector<2x256xf32>
    %cst_96 = arith.constant 0.000000e+00 : f32
    %877 = vector.shape_cast %869 : vector<1x256xi1> to vector<1x256xi1>
    %878 = vector.broadcast %877 : vector<1x256xi1> to vector<2x256xi1>
    %879 = vector.broadcast %cst_96 : f32 to vector<2x256xf32>
    %880 = arith.select %878, %876, %879 : vector<2x256xi1>, vector<2x256xf32>
    %881 = arith.addf %867, %880 : vector<2x256xf32>
    %c205_i32 = arith.constant 205 : i32
    %882 = tpu.dynamic_rotate %33 by %c205_i32 dim 1 : vector<2x256xf32>, i32 -> vector<2x256xf32>
    %883 = arith.andi %70, %105 : vector<1x256xi1>
    %884 = arith.subf %159, %208 : f32
    %885 = vector.broadcast %884 : f32 to vector<2x1xf32>
    %886 = arith.mulf %885, %110 : vector<2x1xf32>
    %887 = vector.broadcast %208 : f32 to vector<2x1xf32>
    %888 = arith.addf %887, %886 : vector<2x1xf32>
    %889 = vector.broadcast %888 : vector<2x1xf32> to vector<2x256xf32>
    %890 = arith.mulf %882, %889 : vector<2x256xf32>
    %cst_97 = arith.constant 0.000000e+00 : f32
    %891 = vector.shape_cast %883 : vector<1x256xi1> to vector<1x256xi1>
    %892 = vector.broadcast %891 : vector<1x256xi1> to vector<2x256xi1>
    %893 = vector.broadcast %cst_97 : f32 to vector<2x256xf32>
    %894 = arith.select %892, %890, %893 : vector<2x256xi1>, vector<2x256xf32>
    %895 = arith.addf %881, %894 : vector<2x256xf32>
    %896 = vector.extract_strided_slice %895 {offsets = [0, 0], sizes = [1, 256], strides = [1, 1]} : vector<2x256xf32> to vector<1x256xf32>
    %897 = vector.extract_strided_slice %895 {offsets = [1, 0], sizes = [1, 256], strides = [1, 1]} : vector<2x256xf32> to vector<1x256xf32>
    %898 = arith.addf %896, %897 : vector<1x256xf32>
    %899 = vector.broadcast %209 : f32 to vector<1x256xf32>
    %900 = arith.addf %898, %899 : vector<1x256xf32>
    %901 = arith.negf %900 : vector<1x256xf32>
    %902 = math.exp %901 : vector<1x256xf32>
    %cst_98 = arith.constant 1.000000e+00 : f32
    %903 = vector.broadcast %cst_98 : f32 to vector<1x256xf32>
    %904 = arith.addf %903, %902 : vector<1x256xf32>
    %905 = arith.divf %903, %904 : vector<1x256xf32>
    %906 = vector.shape_cast %905 : vector<1x256xf32> to vector<1x1x256xf32>
    %907 = vector.broadcast %906 : vector<1x1x256xf32> to vector<1x32x256xf32>
    %908 = arith.mulf %907, %28 : vector<1x32x256xf32>
    %c0_99 = arith.constant 0 : index
    %c0_100 = arith.constant 0 : index
    %c0_101 = arith.constant 0 : index
    %909 = vector.load %arg8[%c0_99, %c0_100, %c0_101] : memref<1x32x256xf32, #tpu.memory_space<vmem>>, vector<1x32x256xf32>
    tpu.vector_store %arg8[%c0_99, %c0_100, %c0_101], %908 {strides = array<i32>} : memref<1x32x256xf32, #tpu.memory_space<vmem>>, vector<1x32x256xf32>,
    return
  }
  func.func @transform_0(%arg0: i32) -> (i32, i32, i32) {
    %c0_i32 = arith.constant 0 : i32
    %c0_i32_0 = arith.constant 0 : i32
    %c0_i32_1 = arith.constant 0 : i32
    return %arg0, %c0_i32, %c0_i32_0 : i32, i32, i32
  }
  func.func @transform_1(%arg0: i32) -> (i32, i32) {
    %c0_i32 = arith.constant 0 : i32
    %c0_i32_0 = arith.constant 0 : i32
    %c0_i32_1 = arith.constant 0 : i32
    return %c0_i32, %c0_i32_0 : i32, i32
  }
  func.func @transform_2(%arg0: i32) -> (i32, i32) {
    %c0_i32 = arith.constant 0 : i32
    %c0_i32_0 = arith.constant 0 : i32
    %c0_i32_1 = arith.constant 0 : i32
    return %c0_i32, %c0_i32_0 : i32, i32
  }
  func.func @transform_3(%arg0: i32) -> (i32, i32) {
    %c0_i32 = arith.constant 0 : i32
    %c0_i32_0 = arith.constant 0 : i32
    %c0_i32_1 = arith.constant 0 : i32
    return %c0_i32, %c0_i32_0 : i32, i32
  }
  func.func @transform_4(%arg0: i32) -> (i32, i32) {
    %c0_i32 = arith.constant 0 : i32
    %c0_i32_0 = arith.constant 0 : i32
    %c0_i32_1 = arith.constant 0 : i32
    return %c0_i32, %c0_i32_0 : i32, i32
  }
  func.func @transform_5(%arg0: i32) -> (i32, i32) {
    %c0_i32 = arith.constant 0 : i32
    %c0_i32_0 = arith.constant 0 : i32
    %c0_i32_1 = arith.constant 0 : i32
    return %c0_i32, %c0_i32_0 : i32, i32
  }
  func.func @transform_6(%arg0: i32) -> i32 {
    %c0_i32 = arith.constant 0 : i32
    %c0_i32_0 = arith.constant 0 : i32
    return %c0_i32 : i32
  }
  func.func @transform_7(%arg0: i32) -> (i32, i32, i32) {
    %c0_i32 = arith.constant 0 : i32
    %c0_i32_0 = arith.constant 0 : i32
    %c0_i32_1 = arith.constant 0 : i32
    return %arg0, %c0_i32, %c0_i32_0 : i32, i32, i32
  }
}

</mosaic_0001>

<bundles_post_ra>
// kernel: tpu_custom_call.1
= control target key start
LH: loop header
LB: loop body
LE: loop exit
PB: predicated region body
PF: predicated region fallthrough
CT: control target
= control target key end

     0   :  { %s4946_s0 = inlined_call_operand.hbm [shape: f32[2,32,256], index: 0, kind: input, shape index: {}]   ;;  %s4947_s1 = inlined_call_operand.vmem [shape: f32[32,8], index: 1, kind: input, shape index: {}]   ;;  %s4948_s2 = inlined_call_operand.vmem [shape: f32[1,8], index: 2, kind: input, shape index: {}]   ;;  %s4949_s3 = inlined_call_operand.vmem [shape: f32[8,32], index: 3, kind: input, shape index: {}]   ;;  %s4950_s4 = inlined_call_operand.vmem [shape: f32[1,32], index: 4, kind: input, shape index: {}]   ;;  %s4951_s5 = inlined_call_operand.vmem [shape: s32[2,256], index: 5, kind: input, shape index: {}]   ;;  %s4952_s6 = inlined_call_operand.vmem [shape: f32[99], index: 6, kind: input, shape index: {}]   ;;  %s4953_s7 = inlined_call_operand.hbm [shape: f32[2,32,256], index: 7, kind: output, shape index: {}]  }
   0x1   :  { %4972 = sst [smem:[#allocation21_spill]] %s4946_s0 }
   0x2   :  { %4973 = sst [smem:[#allocation22_spill]] %s4947_s1 }
   0x3   :  { %4974 = sst [smem:[#allocation23_spill]] %s4952_s6 }
   0x4   :  { %12 = vsyncpa [#allocation3], 0 }
   0x5   :  { %14 = vsyncpa [#allocation3 + $0x1], 0 }
   0x6   :  { %15 = vsyncpa [#allocation5], 0 }
   0x7   :  { %16 = vsyncpa [#allocation4], 0 }
   0x8   :  { %18 = vsyncpa [#allocation4 + $0x1], 0  ;;  %s2513_s24 = smov 0   ;;  %s2515_s25 = smov 0  }
   0x9   :  { %s2517_s26 = smov 0   ;;  %s2519_s27 = smov 0  }
   0xa LB: > { %4975 = sst [smem:[#allocation11_spill]] %s2411_s26  ;;  %s2534_s28 = sadd.s32 4294967295, %s2415_s27   ;;  %s2415_s27 = sphi %s2519_s27, %s5248_s27   ;;  %s2411_s26 = sphi %s2517_s26, %s5250_s26   ;;  %s2407_s25 = sphi %s2515_s25, %s5252_s25   ;;  %s2403_s24 = sphi %s2513_s24, %s5251_s24  }
   0xb   : > { %s2041_s29 = sadd.s32 4294967294, %s2415_s27   ;;  %s2538_s30 = sadd.s32 1, %s2415_s27  }
   0xc   : > { %4976 = sst [smem:[#allocation12_spill]] %s2538_s30  ;;  %s31_s8 = sadd.s32 1, %s2411_s26 }
   0xd   : > { %s28_s9 = ssub.s32 %s2415_s27, %s2538_s30  ;;  %p38_p0 = scmp.ne.s32.totalorder %s2411_s26, %s2407_s25 }
   0xe   : > { %p29_p1 = scmp.eq.s32.totalorder %s28_s9, 0  ;;  %p39_p2 = scmp.eq.s32.totalorder %s2415_s27, 0 }
   0xf   : > { %p44_p3 = scmp.ne.s32.totalorder %s2407_s25, %s2403_s24  ;;  %p45_p4 = scmp.eq.s32.totalorder %s2534_s28, 0 }
  0x10   : > { %s2550_s10 = scalar_select %p29_p1, %s2411_s26, %s31_s8  }
  0x11   : > { %p2552_p5 = por %p39_p2, %p38_p0  ;;  %p2558_p6 = por %p45_p4, %p44_p3 }
  0x12   : > { %4977 = sst [smem:[#allocation13_spill]] %s2550_s10  ;;  %p194_p7 = scmp.eq.s32.totalorder %s2534_s28, 1 }
  0x13   : > { %p200_p8 = scmp.eq.s32.totalorder %s2041_s29, 1  ;;  %p2042_p9 = scmp.ge.s32.totalorder %s2415_s27, 1 }
  0x14   : > { %p207_p10 = scmp.lt.s32.totalorder %s2415_s27, 3  ;;  %p2565_p11 = por %p194_p7, %p38_p0 }
  0x15   : > { %p2569_p12 = por %p200_p8, %p44_p3  ;;  %s4983_s6 = sld [smem:[#allocation23_spill]] }
  0x16   : > { %p2573_p13 = pnand %p2042_p9, %p207_p10  ;;  %p2185_p2 = scmp.lt.s32.totalorder %s2415_s27, 2 }
  0x17   : > { %s245_s19 = sand.u32 1, %s2411_s26   ;;  %s2417_s22 = smov [#allocation6]  }
  0x18   : > { %p2172_p1 = pneg %p2573_p13  ;;  %p2589_p3 = pnand %p2185_p2, %p2552_p5 }
  0x19   : > { %s2045_s21 = sshll.u32 %s245_s19, 6  ;;  %s2162_s23 = sshll.u32 %s2415_s27, 6 }
  0x1a   : > { %p2173_p7 = pnand %p2172_p1, %p45_p4  ;;  %s249_s29 = scalar_lea.vmem [#allocation2], %s2045_s21 }
  0x1b   : > { %s234_s18 = sshll.u32 %s4983_s6, 4  ;;  %s257_s8 = sshll.u32 %s249_s29, 4  ;;  %s235_s18 = int_to_ptr.vmem [resolvable:$true] %s234_s18  ;;  %s258_s8 = int_to_ptr.vmem [resolvable:$true] %s257_s8 }
  0x1c   : > { %2175 = dma.vmem_to_smem (!%p2173_p7), %s235_s18, 16, %s2417_s22, [#allocation5]  }
  0x1d   : > { %s4985_s0 = sld [smem:[#allocation21_spill]]  ;;  %s246_s10 = scalar_lea.sflag [#allocation3], %s245_s19 }
  0x1e   : > { %p2319_p8 = pneg %p2589_p3 }
  0x23   : > { %s254_s17 = scalar_lea.hbm %s4985_s0, %s2162_s23  ;;  %s2322_s21 = scalar_lea.hbm %s4985_s0, 128 }
  0x24   : > { %s255_s6 = sshll.u32 %s254_s17, 4  ;;  %s256_s6 = int_to_ptr.hbm [resolvable:$true] %s255_s6 }
  0x25   : > { %s2315_s11 = sshra.s32 %s256_s6, 4  ;;  %s2316_s11 = int_to_ptr.hbm [resolvable:$true] %s2315_s11 }
  0x26   : > { %s2317_s26 = scalar_lea.hbm %s2316_s11, 64  ;;  %p2323_p1 = scmp.lt.s32.totalorder %s2316_s11, %s4985_s0 }
  0x27   : > { %p2318_p5 = scmp.ne.s32.totalorder %s2316_s11, %s2317_s26  ;;  %p2324_p2 = scmp.lt.s32.totalorder %s2322_s21, %s2317_s26 }
  0x29   : > { %p2320_p9 = pnand %p2319_p8, %p2318_p5  ;;  %p2325_p7 = por %p2324_p2, %p2323_p1 }
  0x2b   : > { %p2321_p10 = pneg %p2320_p9 }
  0x2d   : > { %p2326_p0 = pnand %p2325_p7, %p2321_p10 }
  0x2f   : > { %2329 = shalt.err (!%p2326_p0)
}
  0x30   : > { %s2418_s19 = smov 256   ;;  %s2419_s23 = smov 16  }
  0x31   : > { %2179 = dma.hbm_to_vmem [thread:$0]  (!%p2589_p3), %s256_s6, 1024, %s258_s8, %s246_s10, %s2418_s19, %s2418_s19, %s2419_s23  }
  0x32   : > { %269 = sbr.rel (%p2573_p13) target bundleno = 1054 (0x41e), region = 48 }
  0x37   : > { %s2610_s9 = sand.u32 1, %s2407_s25  }
  0x38   : > { %s4958_s30 = sshll.u32 %s2610_s9, 6  ;;  %s272_s26 = scalar_lea.sflag [#allocation3], %s2610_s9 }
  0x39   : > { %s275_s16 = scalar_lea.vmem [#allocation2], %s4958_s30 }
  0x3a   : > { %2390 = dma.done.wait (%p2558_p6), %s272_s26, 1024  }
  0x3b   : > { %2392 = vsyncadd (%p2558_p6), %s272_s26, 4294966272 }
  0x3c   : > { %2394 = dma.done.wait (%p45_p4), [#allocation5], 16  }
  0x3d   : > { %2396 = vsyncadd (%p45_p4), [#allocation5], 4294967280 }
  0x3e   : > { %286 = sfence }
  0x3f   : > { %v2624_v0 = vld [vmem:[%s275_s16] sm:$0xff]  ;;  %v2626_v1 = vld [vmem:[%s275_s16 + $0x8] sm:$0xff]  ;;  %v2638_v7 = vld [vmem:[%s275_s16 + $0x10] sm:$0xff]  ;;  %v2420_v16 = vmov 256.0   ;;  %s4986_s1 = sld [smem:[#allocation22_spill]]  ;;  %v360_v29 = vlaneseq  ;;  %vm365_vm1 = vcmask 130112  }
  0x40   : > { %v2628_v2 = vld [vmem:[%s275_s16 + $0x20] sm:$0xff]  ;;  %v344_v3 = vmax.f32 %v2624_v0, %v2626_v1  ;;  %v321_v4 = vadd.f32 %v2626_v1, %v2624_v0  ;;  %v2634_v5 = vld [vmem:[%s275_s16 + $0x28] sm:$0xff]  ;;  %v2640_v8 = vld [vmem:[%s275_s16 + $0x18] sm:$0xff]  ;;  %2283 = vrcp.f32 %v2420_v16  ;;  %vm369_vm2 = vcmask 195712   ;;  %s2422_s26 = smov 51   ;;  %s2424_s6 = smov 50  }
  0x41   : > { %v327_v6 = vadd.f32 %v2634_v5, %v2628_v2  ;;  %v2642_v9 = vld [vmem:[%s275_s16 + $0x30] sm:$0xff]  ;;  %v2644_v10 = vld [vmem:[%s275_s16 + $0x38] sm:$0xff]  ;;  %v347_v11 = vmax.f32 %v2638_v7, %v2640_v8  ;;  %v324_v12 = vadd.f32 %v2640_v8, %v2638_v7  ;;  %v350_v14 = vmax.f32 %v2628_v2, %v2634_v5  ;;  %v423_v59 = vld [vmem:[%s4949_s3] sm:$0xff]  ;;  %s2423_s16 = smov 49   ;;  %s2425_s10 = smov 48  }
  0x42   : > { %345 = vmax.xlane.f32.xlu2 %v344_v3  ;;  %322 = vadd.xlane.f32.xlu0 %v321_v4  ;;  %v330_v13 = vadd.f32 %v2644_v10, %v2642_v9  ;;  %v353_v15 = vmax.f32 %v2642_v9, %v2644_v10  ;;  %v2668_v31 = vand.u32 127, %v360_v29  ;;  %vm373_vm3 = vcmask 261312   ;;  %v2281_v60 = vld [vmem:[%s4948_s2] ss:$0 sm:$0xff]  ;;  %s2426_s12 = smov 46   ;;  %s2427_s15 = smov 47  }
  0x43   : > { %328 = vadd.xlane.f32.xlu1 %v327_v6  ;;  %vm388_vm4 = vcmask 1040384   ;;  %vm398_vm5 = vcmask 261120   ;;  %447 = vmatpush.msra.mxu1 %v423_v59  ;;  %vm428_vm6 = vcmask 64512   ;;  %v2682_v3 = vshrl.u32 %v360_v29, 7  ;;  %s2428_s20 = smov 45   ;;  %s2429_s8 = smov 34  }
  0x44   : > { %v363_v34 = vadd.s32 4294967288, %v2668_v31  ;;  %v367_v37 = vadd.s32 4294967280, %v2668_v31  ;;  %v371_v42 = vadd.s32 4294967272, %v2668_v31  ;;  %s2430_s17 = smov 35   ;;  %s2431_s11 = smov 33  }
  0x45   : > { %v393_v17 = vld [vmem:[%s4986_s1 + $0x18] sm:$0xff]  ;;  %v392_v18 = vld [vmem:[%s4986_s1 + $0x10] sm:$0xff]  ;;  %v391_v20 = vld [vmem:[%s4986_s1 + $0x8] sm:$0xff]  ;;  %2276 = vset.pattern.permute.xlu2 %v2682_v3  ;;  %v490_v4 = vadd.s32 16, %v2682_v3  ;;  %v484_v6 = vadd.s32 8, %v2682_v3  ;;  %s2432_s18 = smov 31  }
  0x46   : > { %414 = vmatpush.msra.mxu0 %v393_v17  ;;  %v2284_v19 = vpop.eup %2283  ;;  %v390_v21 = vld [vmem:[%s4986_s1] sm:$0xff]  ;;  %s2433_s22 = smov 32   ;;  %s2434_s21 = smov 30  }
  0x47   : > { %v334_v22 = vmul.f32 256.0, %v2284_v19  ;;  %vm338_vm0 = vweird.f32 %v2284_v19  ;;  %2278 = vset.pattern.permute.xlu1 %v490_v4  ;;  %2277 = vset.pattern.permute.xlu0 %v484_v6  ;;  %s2435_s29 = smov 19   ;;  %s2436_s19 = smov 29  }
  0x48   : > { %415 = vmatpush.msra.mxu0 %v392_v18  ;;  %s2437_s23 = smov 18   ;;  %s4077_s30 = sld [smem:[#allocation6 + $0x56]] }
  0x49   : > { %v335_v23 = vsub.f32 1.0, %v334_v22 }
  0x4a   : > { %348 = vmax.xlane.f32.xlu2 %v347_v11  ;;  %325 = vadd.xlane.f32.xlu0 %v324_v12  ;;  %v2282_v11 = vld [vmem:[%s4950_s4] ss:$0 sm:$0xff] }
  0x4b   : > { %331 = vadd.xlane.f32.xlu1 %v330_v13  ;;  %416 = vmatpush.msra.mxu0 %v391_v20  ;;  %v336_v24 = vmul.f32 %v2284_v19, %v335_v23 }
  0x4d   : > { %417 = vmatpush.msra.mxu0 %v390_v21  ;;  %v337_v27 = vadd.f32 %v2284_v19, %v336_v24 }
  0x4f   : > { %v339_v30 = vsel %vm338_vm0, %v2284_v19, %v337_v27 }
  0x52   : > { %351 = vmax.xlane.f32.xlu0 %v350_v14 }
  0x53   : > { %354 = vmax.xlane.f32.xlu1 %v353_v15 }
  0xb5   : > { %v323_v25 = vpop.xlane.xlu0 %322  ;;  %v346_v26 = vpop.xlane.xlu2 %345 }
  0xb6   : > { %v329_v28 = vpop.xlane.xlu1 %328  ;;  %v340_v32 = vmul.f32 %v339_v30, %v323_v25  ;;  %v380_v44 = vperm.slane %v346_v26, %v2668_v31 }
  0xb7   : > { %v342_v38 = vmul.f32 %v339_v30, %v329_v28 }
  0xb8   : > { %v362_v41 = vperm.slane %v340_v32, %v2668_v31 }
  0xb9   : > { %v368_v47 = vperm.slane %v342_v38, %v367_v37 }
  0xbd   : > { %v326_v33 = vpop.xlane.xlu0 %325  ;;  %v349_v39 = vpop.xlane.xlu2 %348 }
  0xbe   : > { %v341_v35 = vmul.f32 %v339_v30, %v326_v33  ;;  %v332_v36 = vpop.xlane.xlu1 %331  ;;  %v381_v45 = vperm.slane %v349_v39, %v363_v34  ;;  %v2421_v33 = vmov 32.0  }
  0xbf   : > { %v343_v43 = vmul.f32 %v339_v30, %v332_v36  ;;  %v496_v30 = vadd.s32 24, %v2682_v3 }
  0xc0   : > { %v364_v40 = vperm.slane %v341_v35, %v363_v34  ;;  %v382_v53 = vsel %vm365_vm1, %v381_v45, %v380_v44 }
  0xc1   : > { %v372_v48 = vperm.slane %v343_v43, %v371_v42 }
  0xc2   : > { %v366_v46 = vsel %vm365_vm1, %v364_v40, %v362_v41 }
  0xc3   : > { %v370_v52 = vsel %vm369_vm2, %v368_v47, %v366_v46 }
  0xc4   : > { %v374_v56 = vsel %vm373_vm3, %v372_v48, %v370_v52 }
  0xc5   : > { %v352_v49 = vpop.xlane.xlu0 %351 }
  0xc6   : > { %v383_v50 = vperm.slane %v352_v49, %v367_v37  ;;  %v355_v51 = vpop.xlane.xlu1 %354 }
  0xc7   : > { %v385_v54 = vperm.slane %v355_v51, %v371_v42 }
  0xc8   : > { %v384_v55 = vsel %vm369_vm2, %v383_v50, %v382_v53 }
  0xc9   : > { %v386_v57 = vsel %vm373_vm3, %v385_v54, %v384_v55 }
  0xca   : > { %v389_v58 = vsel %vm388_vm4, %v374_v56, %v386_v57 }
  0xcb   : > { %2052 = vmatmul.msk.f32.vlgmr.msra.gmra.mxu0 %vm398_vm5, %v389_v58 }
 0x148   : > { %v419_v61 = vpop.f32.mrf.mxu0 }
 0x149   : > { %v420_v62 = vadd.f32 %v2281_v60, %v419_v61 }
 0x14b   : > { %v422_v63 = vmax.f32 %v420_v62, 0.0 }
 0x14d   : > { %2053 = vmatmul.msk.f32.vlgmr.msra.gmra.mxu1 %vm428_vm6, %v422_v63 }
 0x1ca   : > { %v449_v12 = vpop.f32.mrf.mxu1 }
 0x1cb   : > { %v450_v13 = vadd.f32 %v2282_v11, %v449_v12 }
 0x1cd   : > { %v453_v14 = vrot.slane %v450_v13, 1 }
 0x1cf   : > { %v455_v15 = vadd.f32 %v453_v14, %v450_v13 }
 0x1d1   : > { %v2054_v16 = vmul.f32 -1.442695, %v455_v15 }
 0x1d3   : > { %2285 = vpow2.f32 %v2054_v16 }
 0x1d9   : > { %v2286_v17 = vpop.eup %2285 }
 0x1da   : > { %v459_v18 = vadd.f32 1.0, %v2286_v17 }
 0x1dc   : > { %2287 = vrcp.f32 %v459_v18  ;;  %v471_v22 = vand.u32 2147483648, %v459_v18  ;;  %v469_v24 = vand.u32 2147483647, %v459_v18  ;;  %vm465_vm8 = vweird.f32 %v459_v18 }
 0x1dd   : > { %2289 = vrcp.f32 %v2421_v33 }
 0x1de   : > { %v472_v26 = vor.u32 1.1754944e-38, %v471_v22  ;;  %vm470_vm10 = vcmp.eq.f32.partialorder %v469_v24, 8.507059e+37 }
 0x1e2   : > { %v2288_v19 = vpop.eup %2287 }
 0x1e3   : > { %v461_v20 = vmul.f32 %v2288_v19, %v459_v18  ;;  %vm466_vm7 = vweird.f32 %v2288_v19  ;;  %v2290_v35 = vpop.eup %2289 }
 0x1e4   : > { %vm467_vm9 = vmor %vm465_vm8, %vm466_vm7  ;;  %v545_v44 = vmul.f32 32.0, %v2290_v35  ;;  %vm549_vm11 = vweird.f32 %v2290_v35  ;;  %vm602_vm8 = vcmp.lt.s32.totalorder %v2682_v3, 1 }
 0x1e5   : > { %v462_v21 = vsub.f32 1.0, %v461_v20 }
 0x1e6   : > { %v546_v49 = vsub.f32 1.0, %v545_v44 }
 0x1e7   : > { %v463_v23 = vmul.f32 %v2288_v19, %v462_v21 }
 0x1e8   : > { %v547_v58 = vmul.f32 %v2290_v35, %v546_v49 }
 0x1e9   : > { %v464_v25 = vadd.f32 %v2288_v19, %v463_v23 }
 0x1ea   : > { %v548_v12 = vadd.f32 %v2290_v35, %v547_v58 }
 0x1eb   : > { %v468_v27 = vsel %vm467_vm9, %v2288_v19, %v464_v25 }
 0x1ec   : > { %v473_v28 = vsel %vm470_vm10, %v472_v26, %v468_v27  ;;  %v550_v19 = vsel %vm549_vm11, %v2290_v35, %v548_v12 }
 0x1ed   : > { %v475_v29 = vperm.slane %v473_v28, 0 }
 0x1ef   : > { %492 = vperm.xlu1 %2278, %v475_v29   ;;  %486 = vperm.xlu0 %2277, %v475_v29  }
 0x1f0   : > { %480 = vperm.xlu2 %2276, %v475_v29  }
 0x1f7   : > { %2280 = vset.pattern.permute.xlu0 %v496_v30 }
 0x1f8   : > { %2279 = vset.pattern.permute.xlu2 %v496_v30 }
 0x200   : > { %498 = vperm.xlu2 %2279, %v475_v29   ;;  %v2792_v29 = vld [vmem:[%s4951_s5] ss:$2 sm:$0x3] }
 0x201   : > { %vm558_vm12 = vcmp.ge.s32.totalorder %v2792_v29, 3  ;;  %vm559_vm13 = vcmp.le.s32.totalorder %v2792_v29, 18 }
 0x202   : > { %vm2809_vm0 = vmand %vm558_vm12, %vm559_vm13  ;;  %vm708_vm12 = vcmp.lt.s32.totalorder %v2668_v31, 51  ;;  %vm756_vm13 = vcmp.lt.s32.totalorder %v2668_v31, 49 }
 0x24a   : > { %v481_v32 = vpop.permute.xlu2 %480 }
 0x24b   : > { %v2692_v36 = vmul.f32 %v481_v32, %v2624_v0  ;;  %v2695_v37 = vmul.f32 %v481_v32, %v2626_v1  ;;  %v2799_v32 = vld [vmem:[%s4951_s5 + $0x1] ss:$2 sm:$0x3] }
 0x24c   : > { %vm579_vm14 = vcmp.ge.s32.totalorder %v2799_v32, 3  ;;  %vm580_vm15 = vcmp.le.s32.totalorder %v2799_v32, 18  ;;  %vm585_vm2 = vcmp.ge.s32.totalorder %v2799_v32, 1  ;;  %vm586_vm3 = vcmp.le.s32.totalorder %v2799_v32, 16 }
 0x24d   : > { %4987 = vst [vmem:[#allocation14_spill] sm:$0xff] %v2695_v37  ;;  %vm2813_vm1 = vmand %vm579_vm14, %vm580_vm15  ;;  %vm583_vm5 = vcmp.le.s32.totalorder %v2799_v32, 17  ;;  %vm588_vm14 = vcmp.ge.s32.totalorder %v2799_v32, 0  ;;  %vm589_vm15 = vcmp.le.s32.totalorder %v2799_v32, 15 }
 0x24e   : > { %vm711_vm6 = vmand %vm2809_vm0, %vm2813_vm1 }
 0x24f   : > { %vm2834_vm7 = vmand %vm585_vm2, %vm586_vm3 }
 0x250   : > { %vm759_vm10 = vmand %vm2809_vm0, %vm2834_vm7 }
 0x251   : > { %vm2911_vm2 = vmand %vm588_vm14, %vm589_vm15  ;;  %vm594_vm14 = vcmp.ge.s32.totalorder %v2799_v32, 4294967294  ;;  %vm595_vm15 = vcmp.le.s32.totalorder %v2799_v32, 13 }
 0x25a   : > { %v499_v34 = vpop.permute.xlu2 %498 }
 0x25b   : > { %v2698_v38 = vmul.f32 %v499_v34, %v2642_v9  ;;  %v2701_v39 = vmul.f32 %v499_v34, %v2644_v10 }
 0x25d   : > { %4988 = vst [vmem:[#allocation15_spill] sm:$0xff] %v2698_v38 }
 0x25e   : > { %4989 = vst [vmem:[#allocation16_spill] sm:$0xff] %v2701_v39 }
 0x261   : > { %v493_v40 = vpop.permute.xlu1 %492  ;;  %v487_v41 = vpop.permute.xlu0 %486 }
 0x262   : > { %v2704_v42 = vmul.f32 %v493_v40, %v2628_v2  ;;  %v2707_v43 = vmul.f32 %v493_v40, %v2634_v5  ;;  %v2710_v0 = vmul.f32 %v487_v41, %v2638_v7  ;;  %v2713_v1 = vmul.f32 %v487_v41, %v2640_v8 }
 0x263   : > { %v5000_v41 = vmov 0 }
 0x264   : > { %4990 = vst [vmem:[#allocation17_spill] sm:$0xff] %v2704_v42  ;;  %v508_v9 = vmax.f32 %v2692_v36, %v2704_v42  ;;  %v517_v10 = vmax.f32 %v2695_v37, %v2707_v43  ;;  %v509_v2 = vmax.f32 %v2710_v0, %v2698_v38  ;;  %v518_v5 = vmax.f32 %v2713_v1, %v2701_v39 }
 0x265   : > { %4991 = vst [vmem:[#allocation18_spill] sm:$0xff] %v2707_v43  ;;  %v526_v7 = vadd.f32 %v2710_v0, %v2692_v36  ;;  %v535_v8 = vadd.f32 %v2713_v1, %v2695_v37 }
 0x266   : > { %4992 = vst [vmem:[#allocation19_spill] sm:$0xff] %v2710_v0  ;;  %v510_v45 = vmax.f32 %v508_v9, %v509_v2  ;;  %v519_v46 = vmax.f32 %v517_v10, %v518_v5  ;;  %v2444_v9 = vmov 0.0   ;;  %v4959_v2 = vmov 0  }
 0x267   : > { %4993 = vst [vmem:[#allocation20_spill] sm:$0xff] %v2713_v1  ;;  %v527_v47 = vadd.f32 %v526_v7, %v2704_v42  ;;  %v536_v48 = vadd.f32 %v535_v8, %v2707_v43  ;;  %v2851_v10 = vsel %vm602_vm8, 1.0, %v2444_v9  ;;  %v719_v5 = vsel %vm711_vm6, 1, %v4959_v2 }
 0x268   : > { %v511_v50 = vrot.slane %v510_v45, 4  ;;  %v520_v51 = vrot.slane %v519_v46, 4  ;;  %vm732_vm8 = vcmp.lt.s32.totalorder %v2668_v31, 50 }
 0x269   : > { %v528_v52 = vadd.f32 %v527_v47, %v2698_v38  ;;  %v537_v53 = vadd.f32 %v536_v48, %v2701_v39  ;;  %v720_v47 = vperm.slane %v719_v5, 0  ;;  %v721_v48 = vperm.slane %v719_v5, 1 }
 0x26a   : > { %v512_v54 = vmax.f32 %v510_v45, %v511_v50  ;;  %v521_v55 = vmax.f32 %v519_v46, %v520_v51  ;;  %v767_v45 = vsel %vm759_vm10, 1, %v4959_v2 }
 0x26b   : > { %v529_v56 = vrot.slane %v528_v52, 4  ;;  %v538_v57 = vrot.slane %v537_v53, 4  ;;  %vm2915_vm3 = vcmp.eq.s32.totalorder %v720_v47, 1 }
 0x26c   : > { %v513_v59 = vrot.slane %v512_v54, 2  ;;  %v522_v60 = vrot.slane %v521_v55, 2 }
 0x26d   : > { %v530_v61 = vadd.f32 %v529_v56, %v528_v52  ;;  %v539_v62 = vadd.f32 %v538_v57, %v537_v53 }
 0x26e   : > { %v514_v63 = vmax.f32 %v512_v54, %v513_v59  ;;  %v523_v4 = vmax.f32 %v521_v55, %v522_v60  ;;  %v768_v59 = vperm.slane %v767_v45, 0 }
 0x26f   : > { %v531_v6 = vrot.slane %v530_v61, 2  ;;  %v540_v11 = vrot.slane %v539_v62, 2 }
 0x270   : > { %v515_v15 = vrot.slane %v514_v63, 1  ;;  %v524_v16 = vrot.slane %v523_v4, 1  ;;  %vm2927_vm6 = vcmp.eq.s32.totalorder %v768_v59, 1 }
 0x271   : > { %v532_v13 = vadd.f32 %v531_v6, %v530_v61  ;;  %v541_v14 = vadd.f32 %v540_v11, %v539_v62  ;;  %v5002_v6 = vmov 0 }
 0x272   : > { %v516_v22 = vmax.f32 %v514_v63, %v515_v15  ;;  %v525_v23 = vmax.f32 %v523_v4, %v524_v16  ;;  %v5003_v6 = vsel %vm2911_vm2, 4294967295, %v5002_v6 }
 0x273   : > { %v533_v17 = vrot.slane %v532_v13, 1  ;;  %v542_v18 = vrot.slane %v541_v14, 1 }
 0x275   : > { %v534_v20 = vadd.f32 %v533_v17, %v532_v13  ;;  %v543_v21 = vadd.f32 %v542_v18, %v541_v14  ;;  %v769_v14 = vperm.slane %v767_v45, 1 }
 0x277   : > { %v551_v24 = vmul.f32 %v550_v19, %v534_v20  ;;  %v552_v25 = vmul.f32 %v550_v19, %v543_v21 }
 0x279   : > { %v2732_v26 = vsel %vm388_vm4, %v516_v22, %v551_v24  ;;  %v2735_v27 = vsel %vm388_vm4, %v525_v23, %v552_v25  ;;  %vm582_vm4 = vcmp.ge.s32.totalorder %v2799_v32, 2 }
 0x27a   : > { %706 = vrot.lane.b32.xlu1 %v2735_v27, %s2422_s26  ;;  %752 = vrot.lane.b32.xlu0 %v2732_v26, %s2423_s16  ;;  %vm2841_vm9 = vmand %vm582_vm4, %vm583_vm5  ;;  %vm2919_vm4 = vcmp.eq.s32.totalorder %v721_v48, 1 }
 0x27b   : > { %704 = vrot.lane.b32.xlu2 %v2732_v26, %s2422_s26  ;;  %s4957_s26 = smov 16   ;;  %v5001_v41 = vsel %vm2841_vm9, 4294967295, %v5000_v41  ;;  %vm735_vm11 = vmand %vm2809_vm0, %vm2841_vm9 }
 0x27c   : > { %v743_v52 = vsel %vm735_vm11, 1, %v4959_v2  ;;  %vm783_vm5 = vmand %vm2809_vm0, %vm2911_vm2 }
 0x27d   : > { %v744_v62 = vperm.slane %v743_v52, 0  ;;  %v745_v63 = vperm.slane %v743_v52, 1  ;;  %v791_v24 = vsel %vm783_vm5, 1, %v4959_v2 }
 0x27e   : > { %v793_v47 = vperm.slane %v791_v24, 1 }
 0x27f   : > { %vm2936_vm10 = vcmp.eq.s32.totalorder %v744_v62, 1  ;;  %vm2940_vm11 = vcmp.eq.s32.totalorder %v745_v63, 1 }
 0x282   : > { %730 = vrot.lane.b32.xlu1 %v2735_v27, %s2424_s6  ;;  %778 = vrot.lane.b32.xlu0 %v2735_v27, %s2425_s10 }
 0x283   : > { %728 = vrot.lane.b32.xlu2 %v2732_v26, %s2424_s6  ;;  %s2440_s6 = smov 15  }
 0x28a   : > { %776 = vrot.lane.b32.xlu1 %v2732_v26, %s2425_s10  ;;  %824 = vrot.lane.b32.xlu0 %v2732_v26, %s2426_s12  ;;  %s2776_s10 = sld [smem:[#allocation6]] }
 0x28b   : > { %754 = vrot.lane.b32.xlu2 %v2735_v27, %s2423_s16  ;;  %s2439_s16 = smov 17  }
 0x292   : > { %802 = vrot.lane.b32.xlu1 %v2735_v27, %s2427_s15  ;;  %850 = vrot.lane.b32.xlu0 %v2735_v27, %s2428_s20 }
 0x293   : > { %800 = vrot.lane.b32.xlu2 %v2732_v26, %s2427_s15  ;;  %s2441_s15 = smov 13  }
 0x29a   : > { %848 = vrot.lane.b32.xlu1 %v2732_v26, %s2428_s20  ;;  %896 = vrot.lane.b32.xlu0 %v2732_v26, %s2429_s8  ;;  %s2783_s20 = sld [smem:[#allocation6 + $0x2]] }
 0x29b   : > { %826 = vrot.lane.b32.xlu2 %v2735_v27, %s2426_s12  ;;  %s2778_s12 = sld [smem:[#allocation6 + $0x31]] }
 0x2a1   : > { %v715_v8 = vstv %s2778_s12 }
 0x2a2   : > { %874 = vrot.lane.b32.xlu1 %v2735_v27, %s2430_s17  ;;  %922 = vrot.lane.b32.xlu0 %v2735_v27, %s2431_s11 }
 0x2a3   : > { %872 = vrot.lane.b32.xlu2 %v2732_v26, %s2430_s17  ;;  %s2832_s17 = sld [smem:[#allocation6 + $0x3]] }
 0x2aa   : > { %920 = vrot.lane.b32.xlu1 %v2732_v26, %s2431_s11  ;;  %968 = vrot.lane.b32.xlu0 %v2732_v26, %s2432_s18  ;;  %s2446_s11 = smov 1  }
 0x2ab   : > { %898 = vrot.lane.b32.xlu2 %v2735_v27, %s2429_s8  ;;  %s2787_s8 = sld [smem:[#allocation6 + $0x33]] }
 0x2b1   : > { %v763_v58 = vstv %s2787_s8 }
 0x2b2   : > { %946 = vrot.lane.b32.xlu1 %v2735_v27, %s2433_s22  ;;  %994 = vrot.lane.b32.xlu0 %v2735_v27, %s2434_s21 }
 0x2b3   : > { %944 = vrot.lane.b32.xlu2 %v2732_v26, %s2433_s22  ;;  %s2877_s22 = sld [smem:[#allocation6 + $0x36]] }
 0x2ba   : > { %992 = vrot.lane.b32.xlu1 %v2732_v26, %s2434_s21  ;;  %1040 = vrot.lane.b32.xlu0 %v2732_v26, %s2435_s29  ;;  %s2805_s21 = sld [smem:[#allocation6 + $0x1]] }
 0x2bb   : > { %970 = vrot.lane.b32.xlu2 %v2735_v27, %s2432_s18  ;;  %s2865_s18 = sld [smem:[#allocation6 + $0x5]] }
 0x2c2   : > { %1018 = vrot.lane.b32.xlu1 %v2735_v27, %s2436_s19  ;;  %1066 = vrot.lane.b32.xlu0 %v2735_v27, %s2437_s23 }
 0x2c3   : > { %1016 = vrot.lane.b32.xlu2 %v2732_v26, %s2436_s19  ;;  %s2442_s19 = smov 14  }
 0x2ca   : > { %1064 = vrot.lane.b32.xlu1 %v2732_v26, %s2437_s23  ;;  %1112 = vrot.lane.b32.xlu0 %v2732_v26, %s4957_s26  ;;  %s2443_s23 = smov 3  }
 0x2cb   : > { %1042 = vrot.lane.b32.xlu2 %v2735_v27, %s2435_s29  ;;  %s2807_s29 = sld [smem:[#allocation6 + $0x32]] }
 0x2d1   : > { %v739_v61 = vstv %s2807_s29 }
 0x2d2   : > { %1090 = vrot.lane.b32.xlu1 %v2735_v27, %s2439_s16  ;;  %1138 = vrot.lane.b32.xlu0 %v2735_v27, %s2440_s6 }
 0x2d3   : > { %1088 = vrot.lane.b32.xlu2 %v2732_v26, %s2439_s16  ;;  %s712_s16 = ssub.f32 %s2776_s10, %s2778_s12 }
 0x2d4   : > { %s2838_s10 = sld [smem:[#allocation6 + $0x34]] }
 0x2d5   : > { %v2774_v28 = vpop.permute.xlu2 %704  ;;  %v713_v44 = vstv %s712_s16  ;;  %s2965_s16 = sld [smem:[#allocation6 + $0x37]] }
 0x2d6   : > { %v714_v3 = vmul.f32 %v2851_v10, %v713_v44 }
 0x2d8   : > { %v716_v4 = vadd.f32 %v715_v8, %v714_v3  ;;  %v5014_v8 = vmov 0 }
 0x2da   : > { %1136 = vrot.lane.b32.xlu1 %v2732_v26, %s2440_s6  ;;  %1184 = vrot.lane.b32.xlu0 %v2732_v26, %s2441_s15  ;;  %s760_s6 = ssub.f32 %s2783_s20, %s2787_s8  ;;  %s2447_s8 = smov 2   ;;  %v787_v45 = vstv %s2838_s10 }
 0x2db   : > { %1114 = vrot.lane.b32.xlu2 %v2735_v27, %s4957_s26  ;;  %s736_s20 = ssub.f32 %s2805_s21, %s2807_s29  ;;  %s2448_s29 = smov 127  }
 0x2dc   : > { %v761_v7 = vstv %s760_s6  ;;  %s784_s12 = ssub.f32 %s2832_s17, %s2838_s10  ;;  %s2449_s17 = smov 125  }
 0x2dd   : > { %v2794_v30 = vpop.permute.xlu2 %728  ;;  %v737_v46 = vstv %s736_s20  ;;  %v762_v50 = vmul.f32 %v2851_v10, %v761_v7  ;;  %s2905_s21 = sld [smem:[#allocation6 + $0x35]] }
 0x2de   : > { %v738_v60 = vmul.f32 %v2851_v10, %v737_v46  ;;  %v785_v17 = vstv %s784_s12  ;;  %v792_v46 = vperm.slane %v791_v24, 0  ;;  %s3021_s10 = sld [smem:[#allocation6 + $0x8]]  ;;  %v835_v24 = vstv %s2877_s22 }
 0x2df   : > { %v764_v13 = vadd.f32 %v763_v58, %v762_v50  ;;  %v786_v44 = vmul.f32 %v2851_v10, %v785_v17  ;;  %s3039_s20 = sld [smem:[#allocation6 + $0x39]] }
 0x2e0   : > { %v740_v16 = vadd.f32 %v739_v61, %v738_v60  ;;  %s3073_s12 = sld [smem:[#allocation6 + $0x38]] }
 0x2e1   : > { %v788_v59 = vadd.f32 %v787_v45, %v786_v44  ;;  %s4075_s26 = sld [smem:[#allocation6 + $0x25]] }
 0x2e2   : > { %1162 = vrot.lane.b32.xlu1 %v2735_v27, %s2442_s19  ;;  %1210 = vrot.lane.b32.xlu0 %v2735_v27, %s2443_s23 }
 0x2e3   : > { %1160 = vrot.lane.b32.xlu2 %v2732_v26, %s2442_s19  ;;  %s832_s19 = ssub.f32 %s2865_s18, %s2877_s22  ;;  %s2450_s22 = smov 126  }
 0x2e4   : > { %s3055_s18 = sld [smem:[#allocation6 + $0x7]] }
 0x2e5   : > { %v755_v35 = vpop.permute.xlu2 %754 }
 0x2ea   : > { %1208 = vrot.lane.b32.xlu1 %v2732_v26, %s2443_s23  ;;  %1256 = vrot.lane.b32.xlu0 %v2732_v26, %s2446_s11  ;;  %s2955_s23 = sld [smem:[#allocation6 + $0x6]] }
 0x2eb   : > { %1186 = vrot.lane.b32.xlu2 %v2735_v27, %s2441_s15  ;;  %s2902_s15 = sld [smem:[#allocation6 + $0x4]] }
 0x2ec   : > { %v707_v49 = vpop.permute.xlu1 %706  ;;  %v753_v51 = vpop.permute.xlu0 %752 }
 0x2ed   : > { %v709_v53 = vsel %vm708_vm12, %v2774_v28, %v707_v49  ;;  %v710_v54 = vsel %vm708_vm12, %v707_v49, %v2774_v28  ;;  %v757_v55 = vsel %vm756_vm13, %v753_v51, %v755_v35  ;;  %v758_v56 = vsel %vm756_vm13, %v755_v35, %v753_v51  ;;  %v2896_v57 = vpop.permute.xlu2 %800 }
 0x2ee   : > { %vm591_vm12 = vcmp.ge.s32.totalorder %v2799_v32, 4294967295  ;;  %vm592_vm13 = vcmp.le.s32.totalorder %v2799_v32, 14  ;;  %v717_v20 = vmul.f32 %v716_v4, %v710_v54  ;;  %v718_v21 = vmul.f32 %v716_v4, %v709_v53 }
 0x2ef   : > { %v765_v9 = vmul.f32 %v764_v13, %v758_v56  ;;  %v766_v5 = vmul.f32 %v764_v13, %v757_v55  ;;  %vm2971_vm5 = vmand %vm591_vm12, %vm592_vm13  ;;  %v833_v55 = vstv %s832_s19  ;;  %s880_s19 = ssub.f32 %s3055_s18, %s3073_s12  ;;  %s2454_s18 = smov 112  }
 0x2f0   : > { %v5015_v8 = vsel %vm2971_vm5, 4294967295, %v5014_v8  ;;  %v724_v48 = vsel %vm2915_vm3, %v717_v20, 0.0  ;;  %v725_v49 = vsel %vm2919_vm4, %v718_v21, 0.0  ;;  %vm2994_vm12 = vmand %vm594_vm14, %vm595_vm15  ;;  %vm780_vm3 = vcmp.lt.s32.totalorder %v2668_v31, 48 }
 0x2f1   : > { %s808_s6 = ssub.f32 %s2902_s15, %s2905_s21  ;;  %vm807_vm4 = vmand %vm2809_vm0, %vm2971_vm5  ;;  %v772_v56 = vsel %vm2927_vm6, %v765_v9, 0.0  ;;  %vm3023_vm6 = vcmp.eq.s32.totalorder %v793_v47, 1  ;;  %vm597_vm14 = vcmp.ge.s32.totalorder %v2799_v32, 4294967293  ;;  %vm598_vm15 = vcmp.le.s32.totalorder %v2799_v32, 12  ;;  %s2451_s15 = smov 115  }
 0x2f2   : > { %1234 = vrot.lane.b32.xlu1 %v2735_v27, %s2447_s8  ;;  %1299 = vrot.lane.b32.xlu0 %v2735_v27, %s2448_s29  ;;  %vm831_vm13 = vmand %vm2809_vm0, %vm2994_vm12  ;;  %v815_v13 = vsel %vm807_vm4, 1, %v4959_v2  ;;  %v834_v21 = vmul.f32 %v2851_v10, %v833_v55 }
 0x2f3   : > { %1232 = vrot.lane.b32.xlu2 %v2732_v26, %s2447_s8  ;;  %v809_v63 = vstv %s808_s6  ;;  %v816_v9 = vperm.slane %v815_v13, 0  ;;  %s3104_s8 = sld [smem:[#allocation6 + $0x3a]] }
 0x2f4   : > { %v731_v22 = vpop.permute.xlu1 %730  ;;  %v779_v23 = vpop.permute.xlu0 %778  ;;  %v836_v45 = vadd.f32 %v835_v24, %v834_v21  ;;  %s3167_s6 = sld [smem:[#allocation6 + $0x3c]] }
 0x2f5   : > { %v733_v25 = vsel %vm732_vm8, %v2794_v30, %v731_v22  ;;  %v734_v28 = vsel %vm732_vm8, %v731_v22, %v2794_v30  ;;  %v827_v35 = vpop.permute.xlu2 %826  ;;  %vm2975_vm8 = vcmp.eq.s32.totalorder %v769_v14, 1  ;;  %v810_v22 = vmul.f32 %v2851_v10, %v809_v63 }
 0x2f6   : > { %v741_v7 = vmul.f32 %v740_v16, %v734_v28  ;;  %v742_v3 = vmul.f32 %v740_v16, %v733_v25  ;;  %v773_v58 = vsel %vm2975_vm8, %v766_v5, 0.0  ;;  %v811_v25 = vstv %s2905_s21  ;;  %vm3069_vm8 = vmand %vm597_vm14, %vm598_vm15  ;;  %s3098_s21 = sld [smem:[#allocation6 + $0x9]] }
 0x2f7   : > { %v817_v5 = vperm.slane %v815_v13, 1  ;;  %v812_v32 = vadd.f32 %v811_v25, %v810_v22  ;;  %vm855_vm4 = vmand %vm2809_vm0, %vm3069_vm8  ;;  %vm561_vm0 = vcmp.ge.s32.totalorder %v2792_v29, 2 }
 0x2f8   : > { %v748_v50 = vsel %vm2936_vm10, %v741_v7, 0.0  ;;  %v749_v51 = vsel %vm2940_vm11, %v742_v3, 0.0  ;;  %vm828_vm10 = vcmp.lt.s32.totalorder %v2668_v31, 46  ;;  %vm3017_vm11 = vcmp.eq.s32.totalorder %v792_v46, 1 }
 0x2f9   : > { %v750_v53 = vadd.f32 %v748_v50, %v724_v48  ;;  %v751_v54 = vadd.f32 %v749_v51, %v725_v49 }
 0x2fa   : > { %1297 = vrot.lane.b32.xlu1 %v2732_v26, %s2448_s29  ;;  %1345 = vrot.lane.b32.xlu0 %v2732_v26, %s2449_s17  ;;  %s904_s29 = ssub.f32 %s3021_s10, %s3039_s20 }
 0x2fb   : > { %v774_v60 = vadd.f32 %v772_v56, %v750_v53  ;;  %v775_v61 = vadd.f32 %v773_v58, %v751_v54  ;;  %1258 = vrot.lane.b32.xlu2 %v2735_v27, %s2446_s11  ;;  %s856_s11 = ssub.f32 %s2955_s23, %s2965_s16  ;;  %v863_v56 = vsel %vm855_vm4, 1, %v4959_v2  ;;  %s2452_s23 = smov 113  }
 0x2fc   : > { %v777_v11 = vpop.permute.xlu1 %776  ;;  %v825_v12 = vpop.permute.xlu0 %824  ;;  %v865_v13 = vperm.slane %v863_v56, 1  ;;  %v905_v24 = vstv %s904_s29  ;;  %s3183_s10 = sld [smem:[#allocation6 + $0xa]] }
 0x2fd   : > { %v781_v14 = vsel %vm780_vm3, %v777_v11, %v779_v23  ;;  %v782_v15 = vsel %vm780_vm3, %v779_v23, %v777_v11  ;;  %v829_v16 = vsel %vm828_vm10, %v825_v12, %v827_v35  ;;  %v830_v17 = vsel %vm828_vm10, %v827_v35, %v825_v12  ;;  %v3049_v18 = vpop.permute.xlu2 %872  ;;  %s3257_s29 = sld [smem:[#allocation6 + $0xe]] }
 0x2fe   : > { %v789_v19 = vmul.f32 %v788_v59, %v782_v15  ;;  %v790_v20 = vmul.f32 %v788_v59, %v781_v14  ;;  %v839_v23 = vsel %vm831_vm13, 1, %v4959_v2  ;;  %v857_v30 = vstv %s856_s11  ;;  %s3193_s11 = sld [smem:[#allocation6 + $0x3b]] }
 0x2ff   : > { %vm804_vm3 = vcmp.lt.s32.totalorder %v2668_v31, 47  ;;  %v840_v46 = vperm.slane %v839_v23, 0  ;;  %v841_v47 = vperm.slane %v839_v23, 1  ;;  %vm3088_vm10 = vcmp.eq.s32.totalorder %v816_v9, 1 }
 0x300   : > { %v796_v35 = vsel %vm3017_vm11, %v789_v19, 0.0  ;;  %v797_v44 = vsel %vm3023_vm6, %v790_v20, 0.0  ;;  %vm3092_vm11 = vcmp.eq.s32.totalorder %v817_v5, 1  ;;  %v858_v53 = vmul.f32 %v2851_v10, %v857_v30 }
 0x301   : > { %v798_v7 = vadd.f32 %v796_v35, %v774_v60  ;;  %v799_v3 = vadd.f32 %v797_v44, %v775_v61  ;;  %vm562_vm6 = vcmp.le.s32.totalorder %v2792_v29, 17  ;;  %v837_v58 = vmul.f32 %v836_v45, %v830_v17 }
 0x302   : > { %1323 = vrot.lane.b32.xlu1 %v2735_v27, %s2450_s22  ;;  %1371 = vrot.lane.b32.xlu0 %v2735_v27, %s2451_s15  ;;  %v838_v59 = vmul.f32 %v836_v45, %v829_v16  ;;  %vm3108_vm13 = vcmp.eq.s32.totalorder %v840_v46, 1  ;;  %vm3112_vm14 = vcmp.eq.s32.totalorder %v841_v47, 1  ;;  %v864_v12 = vperm.slane %v863_v56, 0  ;;  %vm3127_vm15 = vmand %vm561_vm0, %vm562_vm6 }
 0x303   : > { %1321 = vrot.lane.b32.xlu2 %v2732_v26, %s2450_s22  ;;  %vm879_vm4 = vmand %vm3127_vm15, %vm2813_vm1  ;;  %v844_v17 = vsel %vm3108_vm13, %v837_v58, 0.0  ;;  %v881_v23 = vstv %s880_s19  ;;  %vm3153_vm0 = vcmp.eq.s32.totalorder %v865_v13, 1  ;;  %v906_v48 = vmul.f32 %v2851_v10, %v905_v24  ;;  %s3222_s22 = sld [smem:[#allocation6 + $0x3d]] }
 0x304   : > { %v803_v50 = vpop.permute.xlu1 %802  ;;  %v851_v51 = vpop.permute.xlu0 %850  ;;  %v845_v19 = vsel %vm3112_vm14, %v838_v59, 0.0  ;;  %vm903_vm6 = vmand %vm3127_vm15, %vm2841_vm9  ;;  %v887_v5 = vsel %vm879_vm4, 1, %v4959_v2  ;;  %v882_v49 = vmul.f32 %v2851_v10, %v881_v23  ;;  %vm876_vm13 = vcmp.lt.s32.totalorder %v2668_v31, 35  ;;  %s3277_s19 = sld [smem:[#allocation6 + $0x3f]] }
 0x305   : > { %v805_v33 = vsel %vm804_vm3, %v2896_v57, %v803_v50  ;;  %v806_v54 = vsel %vm804_vm3, %v803_v50, %v2896_v57  ;;  %v899_v55 = vpop.permute.xlu2 %898  ;;  %v859_v57 = vstv %s2965_s16  ;;  %vm852_vm3 = vcmp.lt.s32.totalorder %v2668_v31, 45  ;;  %s3147_s16 = sld [smem:[#allocation6 + $0xb]]  ;;  %vm927_vm14 = vmand %vm3127_vm15, %vm2834_vm7 }
 0x306   : > { %v813_v60 = vmul.f32 %v812_v32, %v806_v54  ;;  %v814_v61 = vmul.f32 %v812_v32, %v805_v33  ;;  %v860_v20 = vadd.f32 %v859_v57, %v858_v53  ;;  %v907_v50 = vstv %s3039_s20  ;;  %s2453_s20 = smov 114  }
 0x307   : > { %v883_v53 = vstv %s3073_s12  ;;  %v889_v56 = vperm.slane %v887_v5, 1  ;;  %s3216_s12 = sld [smem:[#allocation6 + $0xc]] }
 0x308   : > { %v820_v4 = vsel %vm3088_vm10, %v813_v60, 0.0  ;;  %v821_v11 = vsel %vm3092_vm11, %v814_v61, 0.0  ;;  %vm900_vm10 = vcmp.lt.s32.totalorder %v2668_v31, 34  ;;  %vm3149_vm11 = vcmp.eq.s32.totalorder %v864_v12, 1 }
 0x309   : > { %v822_v15 = vadd.f32 %v820_v4, %v798_v7  ;;  %v823_v16 = vadd.f32 %v821_v11, %v799_v3  ;;  %v908_v60 = vadd.f32 %v907_v50, %v906_v48  ;;  %v884_v61 = vadd.f32 %v883_v53, %v882_v49 }
 0x30a   : > { %1369 = vrot.lane.b32.xlu1 %v2732_v26, %s2451_s15  ;;  %1417 = vrot.lane.b32.xlu0 %v2732_v26, %s2452_s23  ;;  %vm3212_vm4 = vcmp.eq.s32.totalorder %v889_v56, 1 }
 0x30b   : > { %1347 = vrot.lane.b32.xlu2 %v2735_v27, %s2449_s17  ;;  %v846_v21 = vadd.f32 %v844_v17, %v822_v15  ;;  %v847_v22 = vadd.f32 %v845_v19, %v823_v16  ;;  %s928_s17 = ssub.f32 %s3098_s21, %s3104_s8 }
 0x30c   : > { %v849_v44 = vpop.permute.xlu1 %848  ;;  %v897_v9 = vpop.permute.xlu0 %896  ;;  %s976_s15 = ssub.f32 %s3147_s16, %s3167_s6 }
 0x30d   : > { %v853_v7 = vsel %vm852_vm3, %v849_v44, %v851_v51  ;;  %v854_v3 = vsel %vm852_vm3, %v851_v51, %v849_v44  ;;  %v901_v30 = vsel %vm900_vm10, %v897_v9, %v899_v55  ;;  %v902_v45 = vsel %vm900_vm10, %v899_v55, %v897_v9  ;;  %v3177_v32 = vpop.permute.xlu2 %944  ;;  %s952_s21 = ssub.f32 %s3183_s10, %s3193_s11  ;;  %s2457_s10 = smov 109  }
 0x30e   : > { %v861_v46 = vmul.f32 %v860_v20, %v854_v3  ;;  %v862_v47 = vmul.f32 %v860_v20, %v853_v7  ;;  %v911_v51 = vsel %vm903_vm6, 1, %v4959_v2  ;;  %v888_v55 = vperm.slane %v887_v5, 0  ;;  %vm951_vm6 = vmand %vm3127_vm15, %vm2911_vm2  ;;  %s3293_s16 = sld [smem:[#allocation6 + $0xd]] }
 0x30f   : > { %v929_v62 = vstv %s928_s17  ;;  %v912_v63 = vperm.slane %v911_v51, 0  ;;  %v913_v57 = vperm.slane %v911_v51, 1  ;;  %v935_v20 = vsel %vm927_vm14, 1, %v4959_v2  ;;  %s3303_s17 = sld [smem:[#allocation6 + $0x3e]] }
 0x310   : > { %v868_v33 = vsel %vm3149_vm11, %v861_v46, 0.0  ;;  %v869_v54 = vsel %vm3153_vm0, %v862_v47, 0.0  ;;  %vm3208_vm3 = vcmp.eq.s32.totalorder %v888_v55, 1  ;;  %v930_v19 = vmul.f32 %v2851_v10, %v929_v62 }
 0x311   : > { %v870_v58 = vadd.f32 %v868_v33, %v846_v21  ;;  %v871_v59 = vadd.f32 %v869_v54, %v847_v22  ;;  %v909_v21 = vmul.f32 %v908_v60, %v902_v45  ;;  %v910_v22 = vmul.f32 %v908_v60, %v901_v30 }
 0x312   : > { %1395 = vrot.lane.b32.xlu1 %v2735_v27, %s2453_s20  ;;  %1443 = vrot.lane.b32.xlu0 %v2735_v27, %s2454_s18  ;;  %vm3226_vm10 = vcmp.eq.s32.totalorder %v912_v63, 1  ;;  %vm3230_vm11 = vcmp.eq.s32.totalorder %v913_v57, 1  ;;  %v936_v5 = vperm.slane %v935_v20, 0  ;;  %v937_v7 = vperm.slane %v935_v20, 1 }
 0x313   : > { %1393 = vrot.lane.b32.xlu2 %v2732_v26, %s2453_s20  ;;  %vm924_vm0 = vcmp.lt.s32.totalorder %v2668_v31, 33  ;;  %v916_v45 = vsel %vm3226_vm10, %v909_v21, 0.0  ;;  %v917_v46 = vsel %vm3230_vm11, %v910_v22, 0.0  ;;  %v977_v50 = vstv %s976_s15  ;;  %vm999_vm11 = vmand %vm3127_vm15, %vm2994_vm12  ;;  %s3339_s20 = sld [smem:[#allocation6 + $0x40]] }
 0x314   : > { %v875_v12 = vpop.permute.xlu1 %874  ;;  %v923_v13 = vpop.permute.xlu0 %922  ;;  %v953_v51 = vstv %s952_s21  ;;  %vm3259_vm14 = vcmp.eq.s32.totalorder %v936_v5, 1  ;;  %v959_v56 = vsel %vm951_vm6, 1, %v4959_v2  ;;  %v978_v4 = vmul.f32 %v2851_v10, %v977_v50  ;;  %s3382_s15 = sld [smem:[#allocation6 + $0x11]] }
 0x315   : > { %v877_v15 = vsel %vm876_vm13, %v3049_v18, %v875_v12  ;;  %v878_v16 = vsel %vm876_vm13, %v875_v12, %v3049_v18  ;;  %v971_v17 = vpop.permute.xlu2 %970  ;;  %v931_v18 = vstv %s3104_s8  ;;  %s2455_s8 = smov 110   ;;  %vm972_vm13 = vcmp.lt.s32.totalorder %v2668_v31, 31  ;;  %s3402_s21 = sld [smem:[#allocation6 + $0x42]] }
 0x316   : > { %v885_v24 = vmul.f32 %v884_v61, %v878_v16  ;;  %v886_v23 = vmul.f32 %v884_v61, %v877_v15  ;;  %v932_v47 = vadd.f32 %v931_v18, %v930_v19  ;;  %v954_v11 = vmul.f32 %v2851_v10, %v953_v51 }
 0x317   : > { %v979_v12 = vstv %s3167_s6  ;;  %v955_v15 = vstv %s3193_s11  ;;  %v960_v19 = vperm.slane %v959_v56, 0  ;;  %v961_v20 = vperm.slane %v959_v56, 1  ;;  %s2456_s6 = smov 111   ;;  %s3328_s11 = sld [smem:[#allocation6 + $0xf]] }
 0x318   : > { %v892_v44 = vsel %vm3208_vm3, %v885_v24, 0.0  ;;  %v893_v9 = vsel %vm3212_vm4, %v886_v23, 0.0  ;;  %vm3263_vm3 = vcmp.eq.s32.totalorder %v937_v7, 1  ;;  %vm975_vm4 = vmand %vm3127_vm15, %vm2971_vm5  ;;  %v980_v24 = vadd.f32 %v979_v12, %v978_v4 }
 0x319   : > { %v894_v3 = vadd.f32 %v892_v44, %v870_v58  ;;  %v895_v30 = vadd.f32 %v893_v9, %v871_v59  ;;  %vm948_vm10 = vcmp.lt.s32.totalorder %v2668_v31, 32  ;;  %v956_v23 = vadd.f32 %v955_v15, %v954_v11 }
 0x31a   : > { %1441 = vrot.lane.b32.xlu1 %v2732_v26, %s2454_s18  ;;  %1489 = vrot.lane.b32.xlu0 %v2732_v26, %s2455_s8  ;;  %vm3322_vm6 = vcmp.eq.s32.totalorder %v961_v20, 1  ;;  %s1048_s18 = ssub.f32 %s3257_s29, %s3277_s19  ;;  %v1003_v33 = vstv %s3222_s22  ;;  %v1051_v9 = vstv %s3277_s19  ;;  %s2459_s19 = smov 99  }
 0x31b   : > { %1419 = vrot.lane.b32.xlu2 %v2735_v27, %s2452_s23  ;;  %v918_v48 = vadd.f32 %v916_v45, %v894_v3  ;;  %v919_v49 = vadd.f32 %v917_v46, %v895_v30  ;;  %s1000_s23 = ssub.f32 %s3216_s12, %s3222_s22  ;;  %s2458_s22 = smov 98  }
 0x31c   : > { %v921_v54 = vpop.permute.xlu1 %920  ;;  %v969_v55 = vpop.permute.xlu0 %968  ;;  %s1024_s12 = ssub.f32 %s3293_s16, %s3303_s17  ;;  %v1049_v12 = vstv %s1048_s18  ;;  %s2460_s16 = smov 97  }
 0x31d   : > { %v925_v58 = vsel %vm924_vm0, %v921_v54, %v923_v13  ;;  %v926_v59 = vsel %vm924_vm0, %v923_v13, %v921_v54  ;;  %v973_v60 = vsel %vm972_vm13, %v969_v55, %v971_v17  ;;  %v974_v61 = vsel %vm972_vm13, %v971_v17, %v969_v55  ;;  %v3287_v62 = vpop.permute.xlu2 %1016  ;;  %s3418_s29 = sld [smem:[#allocation6 + $0x10]] }
 0x31e   : > { %v933_v63 = vmul.f32 %v932_v47, %v926_v59  ;;  %v934_v57 = vmul.f32 %v932_v47, %v925_v58  ;;  %v983_v13 = vsel %vm975_vm4, 1, %v4959_v2  ;;  %v1001_v25 = vstv %s1000_s23  ;;  %s3428_s23 = sld [smem:[#allocation6 + $0x41]] }
 0x31f   : > { %v984_v35 = vperm.slane %v983_v13, 0  ;;  %v985_v18 = vperm.slane %v983_v13, 1  ;;  %vm3318_vm0 = vcmp.eq.s32.totalorder %v960_v19, 1  ;;  %vm564_vm13 = vcmp.ge.s32.totalorder %v2792_v29, 1  ;;  %s3492_s18 = sld [smem:[#allocation6 + $0x14]] }
 0x320   : > { %v940_v16 = vsel %vm3259_vm14, %v933_v63, 0.0  ;;  %v941_v17 = vsel %vm3263_vm3, %v934_v57, 0.0  ;;  %vm565_vm14 = vcmp.le.s32.totalorder %v2792_v29, 16  ;;  %v1002_v46 = vmul.f32 %v2851_v10, %v1001_v25 }
 0x321   : > { %v942_v21 = vadd.f32 %v940_v16, %v918_v48  ;;  %v943_v22 = vadd.f32 %v941_v17, %v919_v49  ;;  %v1007_v47 = vsel %vm999_vm11, 1, %v4959_v2  ;;  %v981_v48 = vmul.f32 %v980_v24, %v974_v61 }
 0x322   : > { %1467 = vrot.lane.b32.xlu1 %v2735_v27, %s2456_s6  ;;  %1515 = vrot.lane.b32.xlu0 %v2735_v27, %s2457_s10  ;;  %v982_v49 = vmul.f32 %v980_v24, %v973_v60  ;;  %vm3343_vm3 = vcmp.eq.s32.totalorder %v984_v35, 1  ;;  %vm3347_vm4 = vcmp.eq.s32.totalorder %v985_v18, 1  ;;  %v1008_v56 = vperm.slane %v1007_v47, 0 }
 0x323   : > { %1465 = vrot.lane.b32.xlu2 %v2732_v26, %s2456_s6  ;;  %v1009_v58 = vperm.slane %v1007_v47, 1  ;;  %vm996_vm11 = vcmp.lt.s32.totalorder %v2668_v31, 30  ;;  %v988_v63 = vsel %vm3343_vm3, %v981_v48, 0.0  ;;  %v1004_v29 = vadd.f32 %v1003_v33, %v1002_v46  ;;  %s3457_s6 = sld [smem:[#allocation6 + $0x43]] }
 0x324   : > { %v947_v5 = vpop.permute.xlu1 %946  ;;  %v995_v7 = vpop.permute.xlu0 %994  ;;  %v989_v57 = vsel %vm3347_vm4, %v982_v49, 0.0  ;;  %v1025_v13 = vstv %s1024_s12  ;;  %v1050_v18 = vmul.f32 %v2851_v10, %v1049_v12  ;;  %s3512_s12 = sld [smem:[#allocation6 + $0x45]] }
 0x325   : > { %v949_v3 = vsel %vm948_vm10, %v3177_v32, %v947_v5  ;;  %v950_v30 = vsel %vm948_vm10, %v947_v5, %v3177_v32  ;;  %v1043_v45 = vpop.permute.xlu2 %1042  ;;  %vm3362_vm10 = vmand %vm564_vm13, %vm565_vm14  ;;  %vm3384_vm13 = vcmp.eq.s32.totalorder %v1008_v56, 1  ;;  %vm3388_vm14 = vcmp.eq.s32.totalorder %v1009_v58, 1 }
 0x326   : > { %v957_v50 = vmul.f32 %v956_v23, %v950_v30  ;;  %v958_v51 = vmul.f32 %v956_v23, %v949_v3  ;;  %vm1047_vm3 = vmand %vm3362_vm10, %vm2813_vm1  ;;  %v1026_v44 = vmul.f32 %v2851_v10, %v1025_v13  ;;  %v1052_v49 = vadd.f32 %v1051_v9, %v1050_v18 }
 0x327   : > { %v1055_v5 = vsel %vm1047_vm3, 1, %v4959_v2  ;;  %vm1071_vm4 = vmand %vm3362_vm10, %vm2841_vm9 }
 0x328   : > { %v964_v54 = vsel %vm3318_vm0, %v957_v50, 0.0  ;;  %v965_v55 = vsel %vm3322_vm6, %v958_v51, 0.0  ;;  %vm1023_vm0 = vmand %vm3127_vm15, %vm3069_vm8  ;;  %vm1044_vm6 = vcmp.lt.s32.totalorder %v2668_v31, 19  ;;  %vm1020_vm15 = vcmp.lt.s32.totalorder %v2668_v31, 29 }
 0x329   : > { %v966_v60 = vadd.f32 %v964_v54, %v942_v21  ;;  %v967_v61 = vadd.f32 %v965_v55, %v943_v22  ;;  %v1031_v20 = vsel %vm1023_vm0, 1, %v4959_v2  ;;  %v1056_v53 = vperm.slane %v1055_v5, 0  ;;  %vm1095_vm3 = vmand %vm3362_vm10, %vm2834_vm7 }
 0x32a   : > { %1513 = vrot.lane.b32.xlu1 %v2732_v26, %s2457_s10  ;;  %1561 = vrot.lane.b32.xlu0 %v2732_v26, %s2458_s22  ;;  %v1033_v46 = vperm.slane %v1031_v20, 1  ;;  %v1057_v32 = vperm.slane %v1055_v5, 1  ;;  %s1120_s10 = ssub.f32 %s3382_s15, %s3402_s21  ;;  %v1123_v54 = vstv %s3402_s21 }
 0x32b   : > { %1491 = vrot.lane.b32.xlu2 %v2735_v27, %s2455_s8  ;;  %v990_v4 = vadd.f32 %v988_v63, %v966_v60  ;;  %v991_v11 = vadd.f32 %v989_v57, %v967_v61  ;;  %s1072_s8 = ssub.f32 %s3328_s11, %s3339_s20  ;;  %v1079_v57 = vsel %vm1071_vm4, 1, %v4959_v2 }
 0x32c   : > { %v993_v17 = vpop.permute.xlu1 %992  ;;  %v1041_v19 = vpop.permute.xlu0 %1040  ;;  %vm3447_vm0 = vcmp.eq.s32.totalorder %v1033_v46, 1  ;;  %s1096_s11 = ssub.f32 %s3418_s29, %s3428_s23 }
 0x32d   : > { %v997_v21 = vsel %vm996_vm11, %v993_v17, %v995_v7  ;;  %v998_v22 = vsel %vm996_vm11, %v995_v7, %v993_v17  ;;  %v1045_v24 = vsel %vm1044_vm6, %v1041_v19, %v1043_v45  ;;  %v1046_v23 = vsel %vm1044_vm6, %v1043_v45, %v1041_v19  ;;  %v3412_v14 = vpop.permute.xlu2 %1088  ;;  %s3528_s15 = sld [smem:[#allocation6 + $0x13]] }
 0x32e   : > { %v1005_v25 = vmul.f32 %v1004_v29, %v998_v22  ;;  %v1006_v35 = vmul.f32 %v1004_v29, %v997_v21  ;;  %v1027_v7 = vstv %s3303_s17  ;;  %v1032_v45 = vperm.slane %v1031_v20, 0  ;;  %s3451_s17 = sld [smem:[#allocation6 + $0x12]] }
 0x32f   : > { %v1028_v50 = vadd.f32 %v1027_v7, %v1026_v44  ;;  %v1073_v51 = vstv %s1072_s8  ;;  %v1053_v29 = vmul.f32 %v1052_v49, %v1046_v23  ;;  %vm3461_vm6 = vcmp.eq.s32.totalorder %v1056_v53, 1  ;;  %s3538_s8 = sld [smem:[#allocation6 + $0x44]]  ;;  %v3589_v7 = vld [vmem:[%s4951_s5] ss:$2 sm:$0x3] }
 0x330   : > { %v1012_v3 = vsel %vm3384_vm13, %v1005_v25, 0.0  ;;  %v1013_v30 = vsel %vm3388_vm14, %v1006_v35, 0.0  ;;  %vm3443_vm11 = vcmp.eq.s32.totalorder %v1032_v45, 1  ;;  %v1074_v63 = vmul.f32 %v2851_v10, %v1073_v51  ;;  %s3544_s29 = sld [smem:[#allocation6 + $0x18]] }
 0x331   : > { %v1014_v47 = vadd.f32 %v1012_v3, %v990_v4  ;;  %v1015_v48 = vadd.f32 %v1013_v30, %v991_v11  ;;  %v1054_v4 = vmul.f32 %v1052_v49, %v1045_v24  ;;  %vm3465_vm13 = vcmp.eq.s32.totalorder %v1057_v32, 1  ;;  %s3546_s21 = sld [smem:[#allocation6 + $0x49]] }
 0x332   : > { %1539 = vrot.lane.b32.xlu1 %v2735_v27, %s2459_s19  ;;  %1587 = vrot.lane.b32.xlu0 %v2735_v27, %s2460_s16  ;;  %v1080_v19 = vperm.slane %v1079_v57, 0  ;;  %v1081_v20 = vperm.slane %v1079_v57, 1  ;;  %vm1068_vm14 = vcmp.lt.s32.totalorder %v2668_v31, 18  ;;  %v1060_v24 = vsel %vm3461_vm6, %v1053_v29, 0.0 }
 0x333   : > { %1537 = vrot.lane.b32.xlu2 %v2732_v26, %s2459_s19  ;;  %v1061_v23 = vsel %vm3465_vm13, %v1054_v4, 0.0  ;;  %v1121_v44 = vstv %s1120_s10  ;;  %v1097_v9 = vstv %s1096_s11  ;;  %v1103_v45 = vsel %vm1095_vm3, 1, %v4959_v2  ;;  %s2462_s19 = smov 96   ;;  %vm1143_vm13 = vmand %vm3362_vm10, %vm2971_vm5  ;;  %s1192_s10 = ssub.f32 %s3492_s18, %s3512_s12 }
 0x334   : > { %v1019_v55 = vpop.permute.xlu1 %1018  ;;  %v1067_v56 = vpop.permute.xlu0 %1066  ;;  %vm3494_vm4 = vcmp.eq.s32.totalorder %v1080_v19, 1  ;;  %v1122_v32 = vmul.f32 %v2851_v10, %v1121_v44  ;;  %v1098_v33 = vmul.f32 %v2851_v10, %v1097_v9  ;;  %vm1092_vm6 = vcmp.lt.s32.totalorder %v2668_v31, 17  ;;  %s2464_s18 = smov 83  }
 0x335   : > { %v1021_v58 = vsel %vm1020_vm15, %v3287_v62, %v1019_v55  ;;  %v1022_v60 = vsel %vm1020_vm15, %v1019_v55, %v3287_v62  ;;  %v1115_v61 = vpop.permute.xlu2 %1114  ;;  %v1075_v62 = vstv %s3339_s20  ;;  %s2461_s20 = smov 95   ;;  %vm1116_vm15 = vcmp.lt.s32.totalorder %v2668_v31, 16  ;;  %s1168_s11 = ssub.f32 %s3528_s15, %s3538_s8 }
 0x336   : > { %v1029_v11 = vmul.f32 %v1028_v50, %v1022_v60  ;;  %v1030_v12 = vmul.f32 %v1028_v50, %v1021_v58  ;;  %v1076_v25 = vadd.f32 %v1075_v62, %v1074_v63  ;;  %v1105_v63 = vperm.slane %v1103_v45, 1  ;;  %s3613_s15 = sld [smem:[#allocation6 + $0x17]] }
 0x337   : > { %v1124_v4 = vadd.f32 %v1123_v54, %v1122_v32  ;;  %v1193_v54 = vstv %s1192_s10  ;;  %s3661_s10 = sld [smem:[#allocation6 + $0x47]] }
 0x338   : > { %v1036_v16 = vsel %vm3443_vm11, %v1029_v11, 0.0  ;;  %v1037_v17 = vsel %vm3447_vm0, %v1030_v12, 0.0  ;;  %vm3498_vm11 = vcmp.eq.s32.totalorder %v1081_v20, 1  ;;  %vm1119_vm0 = vmand %vm3362_vm10, %vm2911_vm2  ;;  %vm3563_vm3 = vcmp.eq.s32.totalorder %v1105_v63, 1 }
 0x339   : > { %v1038_v21 = vadd.f32 %v1036_v16, %v1014_v47  ;;  %v1039_v22 = vadd.f32 %v1037_v17, %v1015_v48  ;;  %v1127_v55 = vsel %vm1119_vm0, 1, %v4959_v2  ;;  %vm1140_vm0 = vcmp.lt.s32.totalorder %v2668_v31, 15 }
 0x33a   : > { %1585 = vrot.lane.b32.xlu1 %v2732_v26, %s2460_s16  ;;  %1633 = vrot.lane.b32.xlu0 %v2732_v26, %s2461_s20  ;;  %v1128_v13 = vperm.slane %v1127_v55, 0  ;;  %v1129_v15 = vperm.slane %v1127_v55, 1  ;;  %s3557_s16 = sld [smem:[#allocation6 + $0x15]]  ;;  %v1169_v55 = vstv %s1168_s11  ;;  %v1194_v62 = vmul.f32 %v2851_v10, %v1193_v54 }
 0x33b   : > { %1563 = vrot.lane.b32.xlu2 %v2735_v27, %s2458_s22  ;;  %v1062_v35 = vadd.f32 %v1060_v24, %v1038_v21  ;;  %v1063_v18 = vadd.f32 %v1061_v23, %v1039_v22  ;;  %s1144_s22 = ssub.f32 %s3451_s17, %s3457_s6  ;;  %v1151_v23 = vsel %vm1143_vm13, 1, %v4959_v2  ;;  %vm568_vm13 = vcmp.le.s32.totalorder %v3589_v7, 15 }
 0x33c   : > { %v1065_v3 = vpop.permute.xlu1 %1064  ;;  %v1113_v30 = vpop.permute.xlu0 %1112  ;;  %s3567_s17 = sld [smem:[#allocation6 + $0x46]]  ;;  %v1170_v16 = vmul.f32 %v2851_v10, %v1169_v55 }
 0x33d   : > { %v1069_v46 = vsel %vm1068_vm14, %v1065_v3, %v1067_v56  ;;  %v1070_v47 = vsel %vm1068_vm14, %v1067_v56, %v1065_v3  ;;  %v1117_v48 = vsel %vm1116_vm15, %v1113_v30, %v1115_v61  ;;  %v1118_v49 = vsel %vm1116_vm15, %v1115_v61, %v1113_v30  ;;  %v3522_v50 = vpop.permute.xlu2 %1160 }
 0x33e   : > { %v1077_v51 = vmul.f32 %v1076_v25, %v1070_v47  ;;  %v1078_v53 = vmul.f32 %v1076_v25, %v1069_v46  ;;  %v1099_v56 = vstv %s3428_s23  ;;  %v1104_v61 = vperm.slane %v1103_v45, 0  ;;  %s2463_s23 = smov 94  }
 0x33f   : > { %v1100_v11 = vadd.f32 %v1099_v56, %v1098_v33  ;;  %v1145_v12 = vstv %s1144_s22  ;;  %v1125_v25 = vmul.f32 %v1124_v4, %v1118_v49  ;;  %vm3575_vm15 = vcmp.eq.s32.totalorder %v1128_v13, 1  ;;  %s3617_s22 = sld [smem:[#allocation6 + $0x48]] }
 0x340   : > { %v1084_v58 = vsel %vm3494_vm4, %v1077_v51, 0.0  ;;  %v1085_v60 = vsel %vm3498_vm11, %v1078_v53, 0.0  ;;  %vm3559_vm14 = vcmp.eq.s32.totalorder %v1104_v61, 1  ;;  %v1146_v24 = vmul.f32 %v2851_v10, %v1145_v12 }
 0x341   : > { %v1086_v57 = vadd.f32 %v1084_v58, %v1062_v35  ;;  %v1087_v29 = vadd.f32 %v1085_v60, %v1063_v18  ;;  %v1126_v35 = vmul.f32 %v1124_v4, %v1117_v48  ;;  %vm3579_vm4 = vcmp.eq.s32.totalorder %v1129_v15, 1 }
 0x342   : > { %1611 = vrot.lane.b32.xlu1 %v2735_v27, %s2462_s19  ;;  %1659 = vrot.lane.b32.xlu0 %v2735_v27, %s2463_s23  ;;  %vm567_vm11 = vcmp.ge.s32.totalorder %v3589_v7, 0  ;;  %v1152_v45 = vperm.slane %v1151_v23, 0  ;;  %v1153_v46 = vperm.slane %v1151_v23, 1  ;;  %v1132_v49 = vsel %vm3575_vm15, %v1125_v25, 0.0 }
 0x343   : > { %1609 = vrot.lane.b32.xlu2 %v2732_v26, %s2462_s19  ;;  %v1133_v51 = vsel %vm3579_vm4, %v1126_v35, 0.0  ;;  %vm1191_vm4 = vmand %vm3362_vm10, %vm3069_vm8  ;;  %s3744_s19 = sld [smem:[#allocation6 + $0x1b]] }
 0x344   : > { %v1091_v17 = vpop.permute.xlu1 %1090  ;;  %v1139_v19 = vpop.permute.xlu0 %1138  ;;  %vm3623_vm15 = vcmp.eq.s32.totalorder %v1153_v46, 1 }
 0x345   : > { %v1093_v20 = vsel %vm1092_vm6, %v3412_v14, %v1091_v17  ;;  %v1094_v21 = vsel %vm1092_vm6, %v1091_v17, %v3412_v14  ;;  %v1187_v22 = vpop.permute.xlu2 %1186  ;;  %v1147_v14 = vstv %s3457_s6  ;;  %vm1167_vm6 = vmand %vm3362_vm10, %vm2994_vm12  ;;  %s1281_s6 = ssub.f32 %s3544_s29, %s3546_s21 }
 0x346   : > { %v1101_v18 = vmul.f32 %v1100_v11, %v1094_v21  ;;  %v1102_v44 = vmul.f32 %v1100_v11, %v1093_v20  ;;  %v1148_v53 = vadd.f32 %v1147_v14, %v1146_v24  ;;  %v1175_v63 = vsel %vm1167_vm6, 1, %v4959_v2  ;;  %s3694_s29 = sld [smem:[#allocation6 + $0x19]] }
 0x347   : > { %v1199_v20 = vsel %vm1191_vm4, 1, %v4959_v2  ;;  %v1171_v21 = vstv %s3538_s8  ;;  %v1176_v25 = vperm.slane %v1175_v63, 0  ;;  %v1177_v35 = vperm.slane %v1175_v63, 1  ;;  %s2466_s8 = smov 82  }
 0x348   : > { %v1108_v3 = vsel %vm3559_vm14, %v1101_v18, 0.0  ;;  %v1109_v30 = vsel %vm3563_vm3, %v1102_v44, 0.0  ;;  %vm1188_vm14 = vcmp.lt.s32.totalorder %v2668_v31, 13  ;;  %vm3619_vm3 = vcmp.eq.s32.totalorder %v1152_v45, 1 }
 0x349   : > { %v1110_v47 = vadd.f32 %v1108_v3, %v1086_v57  ;;  %v1111_v48 = vadd.f32 %v1109_v30, %v1087_v29  ;;  %v1172_v9 = vadd.f32 %v1171_v21, %v1170_v16  ;;  %v1200_v14 = vperm.slane %v1199_v20, 0 }
 0x34a   : > { %1657 = vrot.lane.b32.xlu1 %v2732_v26, %s2463_s23  ;;  %1705 = vrot.lane.b32.xlu0 %v2732_v26, %s2464_s18  ;;  %s3649_s23 = sld [smem:[#allocation6 + $0x16]]  ;;  %v1201_v3 = vperm.slane %v1199_v20, 1  ;;  %vm1212_vm4 = vcmp.lt.s32.totalorder %v2668_v31, 3 }
 0x34b   : > { %1635 = vrot.lane.b32.xlu2 %v2735_v27, %s2461_s20  ;;  %v1134_v32 = vadd.f32 %v1132_v49, %v1110_v47  ;;  %v1135_v33 = vadd.f32 %v1133_v51, %v1111_v48  ;;  %s1216_s20 = ssub.f32 %s3557_s16, %s3567_s17  ;;  %v1284_v49 = vstv %s3546_s21 }
 0x34c   : > { %v1137_v60 = vpop.permute.xlu1 %1136  ;;  %v1185_v61 = vpop.permute.xlu0 %1184  ;;  %s3705_s16 = sld [smem:[#allocation6 + $0x4a]] }
 0x34d   : > { %v1141_v57 = vsel %vm1140_vm0, %v1137_v60, %v1139_v19  ;;  %v1142_v29 = vsel %vm1140_vm0, %v1139_v19, %v1137_v60  ;;  %v1189_v4 = vsel %vm1188_vm14, %v1185_v61, %v1187_v22  ;;  %v1190_v11 = vsel %vm1188_vm14, %v1187_v22, %v1185_v61  ;;  %v3647_v12 = vpop.permute.xlu2 %1232  ;;  %vm3657_vm0 = vmand %vm567_vm11, %vm568_vm13  ;;  %s1264_s21 = ssub.f32 %s3613_s15, %s3617_s22 }
 0x34e   : > { %v1149_v13 = vmul.f32 %v1148_v53, %v1142_v29  ;;  %v1150_v15 = vmul.f32 %v1148_v53, %v1141_v57  ;;  %v1195_v19 = vstv %s3512_s12  ;;  %v1282_v22 = vstv %s1281_s6  ;;  %vm1280_vm10 = vmand %vm3657_vm0, %vm2911_vm2  ;;  %s2465_s12 = smov 93   ;;  %s3750_s6 = sld [smem:[#allocation6 + $0x4c]] }
 0x34f   : > { %v1196_v59 = vadd.f32 %v1195_v19, %v1194_v62  ;;  %vm1164_vm11 = vcmp.lt.s32.totalorder %v2668_v31, 14  ;;  %vm1215_vm6 = vmand %vm3657_vm0, %vm2813_vm1  ;;  %v1217_v5 = vstv %s1216_s20  ;;  %v1283_v30 = vmul.f32 %v2851_v10, %v1282_v22  ;;  %s3803_s15 = sld [smem:[#allocation6 + $0x1a]] }
 0x350   : > { %v1156_v24 = vsel %vm3619_vm3, %v1149_v13, 0.0  ;;  %v1157_v23 = vsel %vm3623_vm15, %v1150_v15, 0.0  ;;  %vm3697_vm13 = vcmp.eq.s32.totalorder %v1176_v25, 1  ;;  %vm3701_vm14 = vcmp.eq.s32.totalorder %v1177_v35, 1  ;;  %s1240_s11 = ssub.f32 %s3649_s23, %s3661_s10  ;;  %s2468_s23 = smov 81  }
 0x351   : > { %v1158_v18 = vadd.f32 %v1156_v24, %v1134_v32  ;;  %v1159_v44 = vadd.f32 %v1157_v23, %v1135_v33  ;;  %v3714_v51 = vsel %vm1280_vm10, 1, %v4959_v2  ;;  %v1218_v54 = vmul.f32 %v2851_v10, %v1217_v5  ;;  %vm1239_vm10 = vmand %vm3657_vm0, %vm2841_vm9  ;;  %s3807_s20 = sld [smem:[#allocation6 + $0x4b]] }
 0x352   : > { %1683 = vrot.lane.b32.xlu1 %v2735_v27, %s2465_s12  ;;  %1731 = vrot.lane.b32.xlu0 %v2735_v27, %s2466_s8  ;;  %v1223_v55 = vsel %vm1215_vm6, 1, %v4959_v2  ;;  %v1197_v56 = vmul.f32 %v1196_v59, %v1190_v11  ;;  %v1198_v58 = vmul.f32 %v1196_v59, %v1189_v4  ;;  %vm3733_vm3 = vcmp.eq.s32.totalorder %v1200_v14, 1 }
 0x353   : > { %1681 = vrot.lane.b32.xlu2 %v2732_v26, %s2465_s12  ;;  %vm3737_vm15 = vcmp.eq.s32.totalorder %v1201_v3, 1  ;;  %v1219_v57 = vstv %s3567_s17  ;;  %v3742_v29 = vadd.f32 %v1284_v49, %v1283_v30  ;;  %v1224_v13 = vperm.slane %v1223_v55, 0  ;;  %s2467_s17 = smov 80   ;;  %s3862_s12 = sld [smem:[#allocation6 + $0x1c]] }
 0x354   : > { %v1163_v47 = vpop.permute.xlu1 %1162  ;;  %v1211_v48 = vpop.permute.xlu0 %1210  ;;  %v1225_v15 = vperm.slane %v1223_v55, 1  ;;  %v1289_v19 = vperm.slane %v3714_v51, 0  ;;  %v1204_v20 = vsel %vm3733_vm3, %v1197_v56, 0.0  ;;  %v1205_v21 = vsel %vm3737_vm15, %v1198_v58, 0.0 }
 0x355   : > { %v1165_v53 = vsel %vm1164_vm11, %v3522_v50, %v1163_v47  ;;  %v1166_v32 = vsel %vm1164_vm11, %v1163_v47, %v3522_v50  ;;  %v1259_v33 = vpop.permute.xlu2 %1258  ;;  %v1220_v22 = vadd.f32 %v1219_v57, %v1218_v54  ;;  %vm1260_vm11 = vcmp.lt.s32.totalorder %v2668_v31, 1 }
 0x356   : > { %v1173_v60 = vmul.f32 %v1172_v9, %v1166_v32  ;;  %v1174_v61 = vmul.f32 %v1172_v9, %v1165_v53  ;;  %v1265_v25 = vstv %s1264_s21  ;;  %v1241_v35 = vstv %s1240_s11  ;;  %s3948_s11 = sld [smem:[#allocation6 + $0x1d]] }
 0x357   : > { %vm3772_vm6 = vcmp.eq.s32.totalorder %v1224_v13, 1  ;;  %v1247_v5 = vsel %vm1239_vm10, 1, %v4959_v2  ;;  %v1290_v14 = vperm.slane %v3714_v51, 1  ;;  %v1266_v53 = vmul.f32 %v2851_v10, %v1265_v25 }
 0x358   : > { %v1180_v11 = vsel %vm3697_vm13, %v1173_v60, 0.0  ;;  %v1181_v4 = vsel %vm3701_vm14, %v1174_v61, 0.0  ;;  %vm3776_vm13 = vcmp.eq.s32.totalorder %v1225_v15, 1  ;;  %vm1263_vm14 = vmand %vm3657_vm0, %vm2834_vm7  ;;  %v1242_v32 = vmul.f32 %v2851_v10, %v1241_v35 }
 0x359   : > { %v1182_v62 = vadd.f32 %v1180_v11, %v1158_v18  ;;  %v1183_v16 = vadd.f32 %v1181_v4, %v1159_v44  ;;  %v1243_v54 = vstv %s3661_s10  ;;  %v3819_v55 = vmul.f32 %v3742_v29, %v2735_v27  ;;  %s2469_s10 = smov 79  }
 0x35a   : > { %1729 = vrot.lane.b32.xlu1 %v2732_v26, %s2466_s8  ;;  %1777 = vrot.lane.b32.xlu0 %v2732_v26, %s2467_s17  ;;  %v1248_v60 = vperm.slane %v1247_v5, 0  ;;  %v1249_v61 = vperm.slane %v1247_v5, 1  ;;  %vm3827_vm3 = vcmp.eq.s32.totalorder %v1290_v14, 1  ;;  %vm1236_vm15 = vcmp.lt.s32.totalorder %v2668_v31, 2  ;;  %s3877_s8 = sld [smem:[#allocation6 + $0x4d]] }
 0x35b   : > { %1707 = vrot.lane.b32.xlu2 %v2735_v27, %s2464_s18  ;;  %v1206_v24 = vadd.f32 %v1204_v20, %v1182_v62  ;;  %v1207_v23 = vadd.f32 %v1205_v21, %v1183_v16  ;;  %s1305_s18 = ssub.f32 %s3694_s29, %s3705_s16  ;;  %v1244_v4 = vadd.f32 %v1243_v54, %v1242_v32  ;;  %vm3843_vm10 = vcmp.eq.s32.totalorder %v1289_v19, 1 }
 0x35c   : > { %v1209_v59 = vpop.permute.xlu1 %1208  ;;  %v1257_v9 = vpop.permute.xlu0 %1256  ;;  %v3849_v20 = vmul.f32 %v3742_v29, %v2732_v26  ;;  %v1294_v19 = vsel %vm3827_vm3, %v3819_v55, 0.0  ;;  %s1329_s29 = ssub.f32 %s3803_s15, %s3807_s20  ;;  %vm1301_vm3 = vcmp.lt.s32.totalorder %v2668_v31, 127 }
 0x35d   : > { %v1213_v3 = vsel %vm1212_vm4, %v1209_v59, %v1211_v48  ;;  %v1214_v30 = vsel %vm1212_vm4, %v1211_v48, %v1209_v59  ;;  %v1261_v45 = vsel %vm1260_vm11, %v1257_v9, %v1259_v33  ;;  %v1262_v46 = vsel %vm1260_vm11, %v1259_v33, %v1257_v9  ;;  %v3801_v47 = vpop.permute.xlu2 %1321  ;;  %vm1304_vm4 = vmand %vm3657_vm0, %vm2971_vm5  ;;  %s4022_s15 = sld [smem:[#allocation6 + $0x4f]] }
 0x35e   : > { %v1221_v49 = vmul.f32 %v1220_v22, %v1214_v30  ;;  %v1222_v51 = vmul.f32 %v1220_v22, %v1213_v3  ;;  %v1267_v48 = vstv %s3617_s22  ;;  %v1271_v33 = vsel %vm1263_vm14, 1, %v4959_v2  ;;  %s1353_s22 = ssub.f32 %s3744_s19, %s3750_s6 }
 0x35f   : > { %v1268_v11 = vadd.f32 %v1267_v48, %v1266_v53  ;;  %v1306_v13 = vstv %s1305_s18  ;;  %v1272_v15 = vperm.slane %v1271_v33, 0  ;;  %v1273_v62 = vperm.slane %v1271_v33, 1  ;;  %s3965_s19 = sld [smem:[#allocation6 + $0x4e]] }
 0x360   : > { %v1228_v56 = vsel %vm3772_vm6, %v1221_v49, 0.0  ;;  %v1229_v58 = vsel %vm3776_vm13, %v1222_v51, 0.0  ;;  %vm3851_vm11 = vcmp.eq.s32.totalorder %v1248_v60, 1  ;;  %vm3855_vm6 = vcmp.eq.s32.totalorder %v1249_v61, 1  ;;  %s1377_s21 = ssub.f32 %s3862_s12, %s3877_s8 }
 0x361   : > { %v1230_v63 = vadd.f32 %v1228_v56, %v1206_v24  ;;  %v1231_v50 = vadd.f32 %v1229_v58, %v1207_v23  ;;  %v1354_v25 = vstv %s1353_s22  ;;  %v1307_v44 = vmul.f32 %v2851_v10, %v1306_v13  ;;  %s4016_s18 = sld [smem:[#allocation6 + $0x1e]] }
 0x362   : > { %1755 = vrot.lane.b32.xlu1 %v2735_v27, %s2468_s23  ;;  %1803 = vrot.lane.b32.xlu0 %v2735_v27, %s2469_s10  ;;  %v1312_v59 = vsel %vm1304_vm4, 1, %v4959_v2  ;;  %v1269_v9 = vmul.f32 %v1268_v11, %v1262_v46  ;;  %v1270_v5 = vmul.f32 %v1268_v11, %v1261_v45  ;;  %vm3881_vm13 = vcmp.eq.s32.totalorder %v1272_v15, 1  ;;  %s4026_s22 = sld [smem:[#allocation6 + $0x50]] }
 0x363   : > { %1753 = vrot.lane.b32.xlu2 %v2732_v26, %s2468_s23  ;;  %vm3885_vm14 = vcmp.eq.s32.totalorder %v1273_v62, 1  ;;  %v1308_v49 = vstv %s3705_s16  ;;  %v1293_v51 = vsel %vm3843_vm10, %v3849_v20, 0.0  ;;  %v1313_v53 = vperm.slane %v1312_v59, 0  ;;  %s2470_s16 = smov 77   ;;  %s4032_s23 = sld [smem:[#allocation6 + $0x21]] }
 0x364   : > { %v1235_v24 = vpop.permute.xlu1 %1234  ;;  %v1300_v23 = vpop.permute.xlu0 %1299  ;;  %v1314_v32 = vperm.slane %v1312_v59, 1  ;;  %v1355_v54 = vmul.f32 %v2851_v10, %v1354_v25  ;;  %v1276_v55 = vsel %vm3881_vm13, %v1269_v9, 0.0  ;;  %v1277_v56 = vsel %vm3885_vm14, %v1270_v5, 0.0 }
 0x365   : > { %v1237_v29 = vsel %vm1236_vm15, %v3647_v12, %v1235_v24  ;;  %v1238_v35 = vsel %vm1236_vm15, %v1235_v24, %v3647_v12  ;;  %v1348_v18 = vpop.permute.xlu2 %1347  ;;  %v1309_v58 = vadd.f32 %v1308_v49, %v1307_v44  ;;  %vm1328_vm15 = vmand %vm3657_vm0, %vm2994_vm12  ;;  %v1330_v60 = vstv %s1329_s29  ;;  %s4046_s29 = sld [smem:[#allocation6 + $0x20]] }
 0x366   : > { %v1245_v14 = vmul.f32 %v1244_v4, %v1238_v35  ;;  %v1246_v3 = vmul.f32 %v1244_v4, %v1237_v29  ;;  %vm1349_vm4 = vcmp.lt.s32.totalorder %v2668_v31, 125  ;;  %vm3915_vm10 = vcmp.eq.s32.totalorder %v1313_v53, 1 }
 0x367   : > { %vm570_vm13 = vcmp.ge.s32.totalorder %v3589_v7, 4294967295  ;;  %vm571_vm14 = vcmp.le.s32.totalorder %v3589_v7, 14  ;;  %v1331_v20 = vmul.f32 %v2851_v10, %v1330_v60  ;;  %v1336_v21 = vsel %vm1328_vm15, 1, %v4959_v2  ;;  %s1425_s12 = ssub.f32 %s4016_s18, %s4022_s15 }
 0x368   : > { %v1252_v46 = vsel %vm3851_vm11, %v1245_v14, 0.0  ;;  %v1253_v45 = vsel %vm3855_vm6, %v1246_v3, 0.0  ;;  %vm3919_vm11 = vcmp.eq.s32.totalorder %v1314_v32, 1  ;;  %vm1352_vm6 = vmand %vm3657_vm0, %vm3069_vm8  ;;  %v1332_v59 = vstv %s3807_s20  ;;  %s4024_s20 = sld [smem:[#allocation6 + $0x1f]] }
 0x369   : > { %v1254_v48 = vadd.f32 %v1252_v46, %v1230_v63  ;;  %v1255_v33 = vadd.f32 %v1253_v45, %v1231_v50  ;;  %v1356_v50 = vstv %s3750_s6  ;;  %v1360_v44 = vsel %vm1352_vm6, 1, %v4959_v2  ;;  %s2471_s6 = smov 78   ;;  %s4070_s18 = sld [smem:[#allocation6 + $0x23]] }
 0x36a   : > { %1801 = vrot.lane.b32.xlu1 %v2732_v26, %s2469_s10  ;;  %1849 = vrot.lane.b32.xlu0 %v2732_v26, %s2470_s16  ;;  %v1338_v5 = vperm.slane %v1336_v21, 1  ;;  %v1357_v30 = vadd.f32 %v1356_v50, %v1355_v54  ;;  %vm1325_vm0 = vcmp.lt.s32.totalorder %v2668_v31, 126  ;;  %v1333_v12 = vadd.f32 %v1332_v59, %v1331_v20  ;;  %s4034_s10 = sld [smem:[#allocation6 + $0x52]] }
 0x36b   : > { %v1278_v61 = vadd.f32 %v1276_v55, %v1254_v48  ;;  %v1279_v63 = vadd.f32 %v1277_v56, %v1255_v33  ;;  %1779 = vrot.lane.b32.xlu2 %v2735_v27, %s2467_s17  ;;  %v1378_v49 = vstv %s1377_s21  ;;  %v1362_v46 = vperm.slane %v1360_v44, 1  ;;  %s1401_s17 = ssub.f32 %s3948_s11, %s3965_s19 }
 0x36c   : > { %v1298_v4 = vpop.permute.xlu1 %1297  ;;  %v1346_v13 = vpop.permute.xlu0 %1345  ;;  %v1380_v50 = vstv %s3877_s8  ;;  %s4050_s21 = sld [smem:[#allocation6 + $0x51]] }
 0x36d   : > { %v1302_v15 = vsel %vm1301_vm3, %v1298_v4, %v1300_v23  ;;  %v1303_v62 = vsel %vm1301_vm3, %v1300_v23, %v1298_v4  ;;  %v3933_v16 = vpop.permute.xlu2 %1393  ;;  %v1350_v25 = vsel %vm1349_vm4, %v1346_v13, %v1348_v18  ;;  %v1351_v23 = vsel %vm1349_vm4, %v1348_v18, %v1346_v13  ;;  %vm3961_vm3 = vmand %vm570_vm13, %vm571_vm14  ;;  %s4056_s11 = sld [smem:[#allocation6 + $0x22]] }
 0x36e   : > { %v1310_v22 = vmul.f32 %v1309_v58, %v1302_v15  ;;  %v1311_v24 = vmul.f32 %v1309_v58, %v1303_v62  ;;  %v1295_v29 = vadd.f32 %v1293_v51, %v1278_v61  ;;  %v1296_v35 = vadd.f32 %v1294_v19, %v1279_v63  ;;  %vm1376_vm15 = vmand %vm3961_vm3, %vm2813_vm1  ;;  %s1449_s8 = ssub.f32 %s4024_s20, %s4026_s22 }
 0x36f   : > { %v1337_v18 = vperm.slane %v1336_v21, 0  ;;  %v1361_v51 = vperm.slane %v1360_v44, 0  ;;  %v1384_v56 = vsel %vm1376_vm15, 1, %v4959_v2  ;;  %v1358_v58 = vmul.f32 %v1357_v30, %v1350_v25  ;;  %vm1400_vm14 = vmand %vm3961_vm3, %vm2841_vm9  ;;  %s4072_s20 = sld [smem:[#allocation6 + $0x54]] }
 0x370   : > { %v1317_v19 = vsel %vm3915_vm10, %v1310_v22, 0.0  ;;  %v1318_v17 = vsel %vm3919_vm11, %v1311_v24, 0.0  ;;  %vm3982_vm10 = vcmp.eq.s32.totalorder %v1338_v5, 1  ;;  %v1359_v60 = vmul.f32 %v1357_v30, %v1351_v23 }
 0x371   : > { %v1319_v14 = vadd.f32 %v1317_v19, %v1295_v29  ;;  %v1320_v3 = vadd.f32 %v1318_v17, %v1296_v35  ;;  %vm3978_vm4 = vcmp.eq.s32.totalorder %v1337_v18, 1  ;;  %vm1363_vm11 = vcmp.eq.s32.totalorder %v1361_v51, 1 }
 0x372   : > { %1827 = vrot.lane.b32.xlu1 %v2735_v27, %s2471_s6  ;;  %vm1364_vm6 = vcmp.eq.s32.totalorder %v1362_v46, 1  ;;  %v1385_v13 = vperm.slane %v1384_v56, 0  ;;  %v1386_v15 = vperm.slane %v1384_v56, 1  ;;  %v1365_v62 = vsel %vm1363_vm11, %v1358_v58, 0.0  ;;  %s1473_s0 = ssub.f32 %s4046_s29, %s4050_s21 }
 0x373   : > { %1825 = vrot.lane.b32.xlu2 %v2732_v26, %s2471_s6  ;;  %v1379_v26 = vmul.f32 %v2851_v10, %v1378_v49  ;;  %v1366_v20 = vsel %vm1364_vm6, %v1359_v60, 0.0  ;;  %vm1373_vm13 = vcmp.lt.s32.totalorder %v2668_v31, 115  ;;  %v1402_v25 = vstv %s1401_s17  ;;  %s4062_s6 = sld [smem:[#allocation6 + $0x24]]  ;;  %vm1424_vm6 = vmand %vm3961_vm3, %vm2834_vm7 }
 0x374   : > { %v1324_v32 = vpop.permute.xlu1 %1323  ;;  %v1372_v48 = vpop.permute.xlu0 %1371  ;;  %vm1388_vm15 = vcmp.eq.s32.totalorder %v1386_v15, 1  ;;  %v1403_v17 = vmul.f32 %v2851_v10, %v1402_v25  ;;  %v1408_v18 = vsel %vm1400_vm14, 1, %v4959_v2  ;;  %v1404_v5 = vstv %s3965_s19  ;;  %s4060_s19 = sld [smem:[#allocation6 + $0x53]]  ;;  %vm1496_vm14 = vmand %vm3961_vm3, %vm2994_vm12 }
 0x375   : > { %v1326_v33 = vsel %vm1325_vm0, %v3801_v47, %v1324_v32  ;;  %v1327_v54 = vsel %vm1325_vm0, %v1324_v32, %v3801_v47  ;;  %v3988_v55 = vpop.permute.xlu2 %1419  ;;  %v1381_v21 = vadd.f32 %v1380_v50, %v1379_v26  ;;  %vm1387_vm0 = vcmp.eq.s32.totalorder %v1385_v13, 1  ;;  %s4068_s17 = sld [smem:[#allocation6 + $0x55]] }
 0x376   : > { %v1334_v61 = vmul.f32 %v1333_v12, %v1326_v33  ;;  %v1335_v63 = vmul.f32 %v1333_v12, %v1327_v54  ;;  %v1409_v49 = vperm.slane %v1408_v18, 0  ;;  %v1410_v51 = vperm.slane %v1408_v18, 1  ;;  %s4200_s29 = sld [smem:[#allocation6 + $0x28]] }
 0x377   : > { %v1405_v46 = vadd.f32 %v1404_v5, %v1403_v17  ;;  %v1432_v13 = vsel %vm1424_vm6, 1, %v4959_v2  ;;  %v1450_v25 = vstv %s1449_s8  ;;  %v1452_v5 = vstv %s4026_s22  ;;  %vm1472_vm6 = vmand %vm3961_vm3, %vm2971_vm5  ;;  %s1545_s22 = ssub.f32 %s4070_s18, %s4072_s20 }
 0x378   : > { %v1341_v57 = vsel %vm3978_vm4, %v1334_v61, 0.0  ;;  %v1342_v47 = vsel %vm3982_vm10, %v1335_v63, 0.0  ;;  %vm1397_vm4 = vcmp.lt.s32.totalorder %v2668_v31, 114  ;;  %vm1411_vm10 = vcmp.eq.s32.totalorder %v1409_v49, 1  ;;  %s4160_s8 = sld [smem:[#allocation6 + $0x26]] }
 0x379   : > { %v1343_v11 = vadd.f32 %v1341_v57, %v1319_v14  ;;  %v1344_v4 = vadd.f32 %v1342_v47, %v1320_v3  ;;  %vm1412_vm11 = vcmp.eq.s32.totalorder %v1410_v51, 1  ;;  %s4394_s18 = sld [smem:[#allocation6 + $0x2b]] }
 0x37a   : > { %s1521_s1 = ssub.f32 %s4056_s11, %s4060_s19 }
 0x37b   : > { %1851 = vrot.lane.b32.xlu2 %v2735_v27, %s2470_s16  ;;  %v1367_v22 = vadd.f32 %v1365_v62, %v1343_v11  ;;  %v1368_v24 = vadd.f32 %v1366_v20, %v1344_v4  ;;  %v1426_v4 = vstv %s1425_s12  ;;  %s4088_s12 = sld [smem:[#allocation6 + $0x27]] }
 0x37c   : > { %v1370_v23 = vpop.permute.xlu1 %1369  ;;  %v4006_v29 = vpop.permute.xlu0 %1417  ;;  %v1427_v15 = vmul.f32 %v2851_v10, %v1426_v4  ;;  %s4093_s16 = sld [smem:[#allocation6 + $0x58]] }
 0x37d   : > { %v1374_v35 = vsel %vm1373_vm13, %v1370_v23, %v1372_v48  ;;  %v1375_v44 = vsel %vm1373_vm13, %v1372_v48, %v1370_v23  ;;  %v4008_v59 = vpop.permute.xlu2 %1465  ;;  %vm1448_vm13 = vmand %vm3961_vm3, %vm2911_vm2  ;;  %s4232_s11 = sld [smem:[#allocation6 + $0x2a]] }
 0x37e   : > { %v1382_v19 = vmul.f32 %v1381_v21, %v1374_v35  ;;  %v1383_v27 = vmul.f32 %v1381_v21, %v1375_v44  ;;  %v1428_v21 = vstv %s4022_s15  ;;  %v1456_v35 = vsel %vm1448_vm13, 1, %v4959_v2  ;;  %s5126_s15 = ssub.f32 %s4032_s23, %s4034_s10 }
 0x37f   : > { %v1429_v44 = vadd.f32 %v1428_v21, %v1427_v15  ;;  %s1569_s23 = ssub.f32 %s4062_s6, %s4068_s17 }
 0x380   : > { %v1389_v14 = vsel %vm1387_vm0, %v1382_v19, 0.0  ;;  %v1390_v3 = vsel %vm1388_vm15, %v1383_v27, 0.0  ;;  %vm573_vm0 = vcmp.ge.s32.totalorder %v3589_v7, 4294967294  ;;  %vm574_vm15 = vcmp.le.s32.totalorder %v3589_v7, 13  ;;  %s4344_s6 = sld [smem:[#allocation6 + $0x29]] }
 0x381   : > { %v1391_v30 = vadd.f32 %v1389_v14, %v1367_v22  ;;  %v1392_v12 = vadd.f32 %v1390_v3, %v1368_v24  ;;  %v1433_v22 = vperm.slane %v1432_v13, 0  ;;  %v1434_v24 = vperm.slane %v1432_v13, 1 }
 0x382   : > { %v1451_v19 = vmul.f32 %v2851_v10, %v1450_v25  ;;  %v1498_v27 = vstv %s5126_s15  ;;  %v1504_v14 = vsel %vm1496_vm14, 1, %v4959_v2  ;;  %v1457_v3 = vperm.slane %v1456_v35, 0  ;;  %s4455_s15 = sld [smem:[#allocation6 + $0x5e]] }
 0x383   : > { %vm5133_vm14 = vcmp.lt.s32.totalorder %v2668_v31, 113  ;;  %v1480_v13 = vsel %vm1472_vm6, 1, %v4959_v2  ;;  %v1570_v15 = vstv %s1569_s23 }
 0x384   : > { %v1396_v45 = vpop.permute.xlu1 %1395  ;;  %v4014_v53 = vpop.permute.xlu0 %1443  ;;  %v1422_v51 = vsel %vm5133_vm14, %v4006_v29, %v3988_v55  ;;  %vm5134_vm13 = vmmov %vm5133_vm14  ;;  %vm4193_vm6 = vcmp.eq.s32.totalorder %v1457_v3, 1  ;;  %v1571_v3 = vmul.f32 %v2851_v10, %v1570_v15 }
 0x385   : > { %v1398_v32 = vsel %vm1397_vm4, %v3933_v16, %v1396_v45  ;;  %v1399_v48 = vsel %vm1397_vm4, %v1396_v45, %v3933_v16  ;;  %v4020_v33 = vpop.permute.xlu2 %1491  ;;  %vm4132_vm4 = vmand %vm573_vm0, %vm574_vm15  ;;  %v1499_v45 = vmul.f32 %v2851_v10, %v1498_v27  ;;  %v1524_v27 = vstv %s4060_s19  ;;  %s4245_s19 = sld [smem:[#allocation6 + $0x5b]] }
 0x386   : > { %v1406_v54 = vmul.f32 %v1405_v46, %v1398_v32  ;;  %v1407_v26 = vmul.f32 %v1405_v46, %v1399_v48  ;;  %v1423_v46 = vsel %vm5134_vm13, %v3988_v55, %v4006_v29  ;;  %vm1520_vm0 = vmand %vm3961_vm3, %vm3069_vm8  ;;  %v1522_v32 = vstv %s1521_s1  ;;  %s1641_s1 = ssub.f32 %s4088_s12, %s4093_s16 }
 0x387   : > { %v4153_v48 = vadd.f32 %v1452_v5, %v1451_v19  ;;  %v1476_v29 = vstv %s4050_s21  ;;  %v1523_v25 = vmul.f32 %v2851_v10, %v1522_v32  ;;  %v1481_v5 = vperm.slane %v1480_v13, 0  ;;  %vm5139_vm3 = vmand %vm4132_vm4, %vm2841_vm9  ;;  %s4219_s21 = sld [smem:[#allocation6 + $0x59]] }
 0x388   : > { %v1413_v56 = vsel %vm1411_vm10, %v1406_v54, 0.0  ;;  %v1414_v58 = vsel %vm1412_vm11, %v1407_v26, 0.0  ;;  %vm4111_vm10 = vcmp.eq.s32.totalorder %v1433_v22, 1  ;;  %vm4115_vm11 = vcmp.eq.s32.totalorder %v1434_v24, 1  ;;  %s4436_s12 = sld [smem:[#allocation6 + $0x2d]] }
 0x389   : > { %v4028_v60 = vadd.f32 %v1413_v56, %v1391_v30  ;;  %v4030_v61 = vadd.f32 %v1414_v58, %v1392_v12  ;;  %v1458_v30 = vperm.slane %v1456_v35, 1  ;;  %v1474_v12 = vstv %s1473_s0  ;;  %s1593_s0 = ssub.f32 %s4075_s26, %s4077_s30 }
 0x38a   : > { %v1500_v54 = vstv %s4034_s10  ;;  %v1505_v26 = vperm.slane %v1504_v14, 0  ;;  %v1506_v56 = vperm.slane %v1504_v14, 1  ;;  %v1475_v55 = vmul.f32 %v2851_v10, %v1474_v12  ;;  %s4191_s10 = sld [smem:[#allocation6 + $0x57]] }
 0x38b   : > { %v4178_v22 = vmul.f32 %v1429_v44, %v1422_v51  ;;  %v4180_v24 = vmul.f32 %v1429_v44, %v1423_v46  ;;  %v4189_v35 = vsel %vm1520_vm0, 1, %v4959_v2  ;;  %v1501_v44 = vadd.f32 %v1500_v54, %v1499_v45 }
 0x38c   : > { %v4036_v16 = vpop.permute.xlu1 %1441  ;;  %v4038_v63 = vpop.permute.xlu0 %1489  ;;  %vm4202_vm15 = vcmp.eq.s32.totalorder %v1458_v30, 1  ;;  %v1482_v14 = vperm.slane %v1480_v13, 1  ;;  %v4213_v12 = vsel %vm5139_vm3, 1, %v4959_v2  ;;  %vm4221_vm14 = vcmp.eq.s32.totalorder %v1505_v26, 1 }
 0x38d   : > { %v4040_v50 = vpop.permute.xlu2 %1537  ;;  %vm4225_vm13 = vcmp.eq.s32.totalorder %v1506_v56, 1  ;;  %v1477_v46 = vadd.f32 %v1476_v29, %v1475_v55  ;;  %v1529_v45 = vperm.slane %v4189_v35, 0  ;;  %v1530_v32 = vperm.slane %v4189_v35, 1 }
 0x38e   : > { %v1572_v54 = vstv %s4068_s17  ;;  %v1437_v26 = vsel %vm4111_vm10, %v4178_v22, 0.0  ;;  %v1438_v13 = vsel %vm4115_vm11, %v4180_v24, 0.0  ;;  %v4240_v56 = vadd.f32 %v1524_v27, %v1523_v25  ;;  %vm5145_vm10 = vmand %vm4132_vm4, %vm2813_vm1  ;;  %s4376_s17 = sld [smem:[#allocation6 + $0x5a]] }
 0x38f   : > { %v1546_v55 = vstv %s1545_s22  ;;  %vm5144_vm3 = vcmp.lt.s32.totalorder %v2668_v31, 112  ;;  %v1577_v17 = vperm.slane %v4213_v12, 0  ;;  %v4259_v18 = vsel %vm5145_vm10, 1, %v4959_v2 }
 0x390   : > { %v1446_v29 = vsel %vm5144_vm3, %v4036_v16, %v4014_v53  ;;  %v1594_v15 = vstv %s1593_s0  ;;  %vm5146_vm11 = vmmov %vm5144_vm3  ;;  %vm4268_vm3 = vcmp.eq.s32.totalorder %v1481_v5, 1  ;;  %vm4272_vm0 = vcmp.eq.s32.totalorder %v1482_v14, 1  ;;  %s1617_s26 = ssub.f32 %s4160_s8, %s4191_s10 }
 0x391   : > { %v1447_v22 = vsel %vm5146_vm11, %v4014_v53, %v4036_v16  ;;  %v4276_v35 = vadd.f32 %v1572_v54, %v1571_v3  ;;  %v1578_v27 = vperm.slane %v4213_v12, 1  ;;  %v1642_v53 = vstv %s1641_s1  ;;  %s4536_s0 = sld [smem:[#allocation6 + $0x2c]] }
 0x392   : > { %vm5151_vm11 = vcmp.lt.s32.totalorder %v2668_v31, 110  ;;  %v1547_v3 = vmul.f32 %v2851_v10, %v1546_v55  ;;  %v1548_v12 = vstv %s4072_s20  ;;  %v1454_v54 = vmul.f32 %v4153_v48, %v1446_v29  ;;  %s4410_s20 = sld [smem:[#allocation6 + $0x5c]] }
 0x393   : > { %v1494_v5 = vsel %vm5151_vm11, %v4038_v63, %v4020_v33  ;;  %vm5152_vm9 = vmmov %vm5151_vm11  ;;  %v1553_v39 = vperm.slane %v4259_v18, 0  ;;  %v1554_v38 = vperm.slane %v4259_v18, 1  ;;  %v1595_v43 = vmul.f32 %v2851_v10, %v1594_v15  ;;  %s4549_s8 = sld [smem:[#allocation6 + $0x5d]] }
 0x394   : > { %v4052_v57 = vpop.permute.xlu1 %1467  ;;  %v4054_v47 = vpop.permute.xlu0 %1515  ;;  %v1495_v14 = vsel %vm5152_vm9, %v4020_v33, %v4038_v63  ;;  %v1455_v42 = vmul.f32 %v4153_v48, %v1447_v22  ;;  %v1596_v33 = vstv %s4077_s30  ;;  %v5153_v63 = vmov 0   ;;  %vm5154_vm11 = vmand %vm4132_vm4, %vm2834_vm7  ;;  %s1665_s30 = ssub.f32 %s4200_s29, %s4219_s21 }
 0x395   : > { %v4058_v11 = vpop.permute.xlu2 %1563  ;;  %v4314_v55 = vsel %vm5154_vm11, 1, %v5153_v63  ;;  %v1643_v29 = vmul.f32 %v2851_v10, %v1642_v53  ;;  %v4321_v18 = vmul.f32 %v1501_v44, %v1494_v5  ;;  %v4323_v48 = vmul.f32 %v1501_v44, %v1495_v14  ;;  %vm1616_vm11 = vmand %vm4132_vm4, %vm2911_vm2  ;;  %s1689_s23 = ssub.f32 %s4344_s6, %s4376_s17 }
 0x396   : > { %vm5155_vm9 = vcmp.lt.s32.totalorder %v2668_v31, 111  ;;  %v1439_v44 = vadd.f32 %v1437_v26, %v4028_v60  ;;  %v1440_v53 = vadd.f32 %v1438_v13, %v4030_v61  ;;  %v4341_v5 = vadd.f32 %v1548_v12, %v1547_v3  ;;  %s1785_s1 = ssub.f32 %s4436_s12, %s4455_s15 }
 0x397   : > { %v1470_v15 = vsel %vm5155_vm9, %v4008_v59, %v4052_v57  ;;  %vm5156_vm10 = vmmov %vm5155_vm9  ;;  %v1644_v14 = vstv %s4093_s16  ;;  %v1461_v37 = vsel %vm4193_vm6, %v1454_v54, 0.0  ;;  %vm4348_vm9 = vcmp.eq.s32.totalorder %v1529_v45, 1  ;;  %s1713_s16 = ssub.f32 %s4232_s11, %s4245_s19 }
 0x398   : > { %v1471_v22 = vsel %vm5156_vm10, %v4052_v57, %v4008_v59  ;;  %vm4352_vm10 = vcmp.eq.s32.totalorder %v1530_v32, 1  ;;  %v4356_v0 = vadd.f32 %v1596_v33, %v1595_v43  ;;  %v1601_v60 = vperm.slane %v4314_v55, 0  ;;  %vm5161_vm6 = vmand %vm4132_vm4, %vm2971_vm5  ;;  %s1737_s22 = ssub.f32 %s4394_s18, %s4410_s20 }
 0x399   : > { %v1602_v61 = vperm.slane %v4314_v55, 1  ;;  %v1462_v19 = vsel %vm4202_vm15, %v1455_v42, 0.0  ;;  %v1478_v45 = vmul.f32 %v1477_v46, %v1470_v15  ;;  %v1479_v32 = vmul.f32 %v1477_v46, %v1471_v22  ;;  %s4601_s29 = sld [smem:[#allocation6 + $0x5f]] }
 0x39a   : > { %v4374_v43 = vsel %vm5161_vm6, 1, %v5153_v63  ;;  %v1509_v26 = vsel %vm4221_vm14, %v4321_v18, 0.0  ;;  %v1510_v42 = vsel %vm4225_vm13, %v4323_v48, 0.0  ;;  %vm4384_vm15 = vcmp.eq.s32.totalorder %v1577_v17, 1  ;;  %s4662_s11 = sld [smem:[#allocation6 + $0x30]] }
 0x39b   : > { %v4388_v46 = vadd.f32 %v1644_v14, %v1643_v29  ;;  %v1618_v13 = vstv %s1617_s26  ;;  %v1463_v54 = vadd.f32 %v1461_v37, %v1439_v44  ;;  %vm4396_vm6 = vcmp.eq.s32.totalorder %v1578_v27, 1  ;;  %s4736_s6 = sld [smem:[#allocation6 + $0x60]] }
 0x39c   : > { %v4084_v62 = vpop.permute.xlu1 %1513  ;;  %v4086_v20 = vpop.permute.xlu0 %1561  ;;  %v4406_v51 = vsel %vm1616_vm11, 1, %v5153_v63  ;;  %vm577_vm14 = vcmp.le.s32.totalorder %v3589_v7, 12  ;;  %v1464_v37 = vadd.f32 %v1462_v19, %v1440_v53  ;;  %vm5166_vm5 = vcmp.lt.s32.totalorder %v2668_v31, 109  ;;  %s2154_s18 = sld [smem:[#allocation6 + $0x62]] }
 0x39d   : > { %v4091_v23 = vpop.permute.xlu2 %1609  ;;  %v1518_v17 = vsel %vm5166_vm5, %v4084_v62, %v4054_v47  ;;  %vm5167_vm11 = vmmov %vm5166_vm5  ;;  %vm4420_vm2 = vcmp.eq.s32.totalorder %v1553_v39, 1  ;;  %vm4424_vm13 = vcmp.eq.s32.totalorder %v1554_v38, 1  ;;  %v1649_v18 = vperm.slane %v4374_v43, 0 }
 0x39e   : > { %v1519_v27 = vsel %vm5167_vm11, %v4054_v47, %v4084_v62  ;;  %v1485_v48 = vsel %vm4268_vm3, %v1478_v45, 0.0  ;;  %v1486_v15 = vsel %vm4272_vm0, %v1479_v32, 0.0  ;;  %v1650_v39 = vperm.slane %v4374_v43, 1 }
 0x39f   : > { %v1619_v47 = vmul.f32 %v2851_v10, %v1618_v13  ;;  %vm5172_vm11 = vcmp.lt.s32.totalorder %v2668_v31, 98  ;;  %v1620_v62 = vstv %s4191_s10  ;;  %v1625_v24 = vperm.slane %v4406_v51, 0  ;;  %s4591_s10 = sld [smem:[#allocation6 + $0x2e]] }
 0x3a0   : > { %v1566_v38 = vsel %vm5172_vm11, %v4086_v20, %v4058_v11  ;;  %v1666_v25 = vstv %s1665_s30  ;;  %vm5173_vm0 = vcmp.ge.s32.totalorder %v3589_v7, 4294967293  ;;  %v1526_v44 = vmul.f32 %v4240_v56, %v1518_v17  ;;  %s4726_s30 = sld [smem:[#allocation6 + $0x2f]] }
 0x3a1   : > { %vm4451_vm3 = vmand %vm5173_vm0, %vm577_vm14  ;;  %v1527_v53 = vmul.f32 %v4240_v56, %v1519_v27  ;;  %v1567_v14 = vsel %vm5172_vm11, %v4058_v11, %v4086_v20  ;;  %v1714_v7 = vstv %s1713_s16  ;;  %v1487_v45 = vadd.f32 %v1485_v48, %v1463_v54 }
 0x3a2   : > { %vm1664_vm14 = vmand %vm4132_vm4, %vm2994_vm12  ;;  %v1488_v56 = vadd.f32 %v1486_v15, %v1464_v37  ;;  %vm5176_vm0 = vcmp.lt.s32.totalorder %v2668_v31, 99  ;;  %v4482_v32 = vmul.f32 %v4276_v35, %v1566_v38  ;;  %vm1613_vm5 = vcmp.lt.s32.totalorder %v2668_v31, 96 }
 0x3a3   : > { %vm5177_vm11 = vmmov %vm5176_vm0  ;;  %v4485_v13 = vadd.f32 %v1620_v62, %v1619_v47  ;;  %v1626_v54 = vperm.slane %v4406_v51, 1  ;;  %v1667_v37 = vmul.f32 %v2851_v10, %v1666_v25  ;;  %v4498_v17 = vsel %vm1664_vm14, 1, %v5153_v63 }
 0x3a4   : > { %v4156_v58 = vpop.permute.xlu1 %1539  ;;  %v4158_v4 = vpop.permute.xlu0 %1587  ;;  %v1715_v48 = vmul.f32 %v2851_v10, %v1714_v7  ;;  %v1533_v15 = vsel %vm4348_vm9, %v1526_v44, 0.0  ;;  %v1534_v47 = vsel %vm4352_vm10, %v1527_v53, 0.0  ;;  %v1511_v62 = vadd.f32 %v1509_v26, %v1487_v45  ;;  %vm1688_vm10 = vmand %vm4132_vm4, %vm3069_vm8 }
 0x3a5   : > { %v4174_v21 = vpop.permute.xlu2 %1635  ;;  %v1542_v11 = vsel %vm5176_vm0, %v4040_v50, %v4156_v58  ;;  %v1543_v20 = vsel %vm5177_vm11, %v4156_v58, %v4040_v50  ;;  %vm1712_vm0 = vmand %vm4451_vm3, %vm2813_vm1  ;;  %v4494_v50 = vmul.f32 %v4276_v35, %v1567_v14  ;;  %v1668_v58 = vstv %s4219_s21  ;;  %s1761_s21 = ssub.f32 %s4536_s0, %s4549_s8 }
 0x3a6   : > { %v1550_v35 = vmul.f32 %v4341_v5, %v1542_v11  ;;  %v1551_v38 = vmul.f32 %v4341_v5, %v1543_v20  ;;  %v1512_v25 = vadd.f32 %v1510_v42, %v1488_v56  ;;  %vm4517_vm14 = vcmp.eq.s32.totalorder %v1601_v60, 1  ;;  %s1809_s26 = ssub.f32 %s4591_s10, %s4601_s29 }
 0x3a7   : > { %vm4523_vm9 = vcmp.eq.s32.totalorder %v1602_v61, 1  ;;  %v1716_v57 = vstv %s4245_s19  ;;  %v4534_v5 = vsel %vm1712_vm0, 1, %v5153_v63  ;;  %v1581_v55 = vsel %vm4384_vm15, %v4482_v32, 0.0  ;;  %s4680_s19 = sld [smem:[#allocation6 + $0x61]] }
 0x3a8   : > { %v4541_v60 = vadd.f32 %v1668_v58, %v1667_v37  ;;  %v1673_v61 = vperm.slane %v4498_v17, 0  ;;  %v1674_v26 = vperm.slane %v4498_v17, 1  ;;  %v1535_v34 = vadd.f32 %v1533_v15, %v1511_v62 }
 0x3a9   : > { %v1536_v42 = vadd.f32 %v1534_v47, %v1512_v25  ;;  %v1582_v9 = vsel %vm4396_vm6, %v4494_v50, 0.0  ;;  %vm4554_vm1 = vcmp.eq.s32.totalorder %v1649_v18, 1  ;;  %v1690_v53 = vstv %s1689_s23 }
 0x3aa   : > { %v1557_v7 = vsel %vm4420_vm2, %v1550_v35, 0.0  ;;  %v1558_v45 = vsel %vm4424_vm13, %v1551_v38, 0.0  ;;  %v4565_v56 = vadd.f32 %v1716_v57, %v1715_v48  ;;  %v1721_v30 = vperm.slane %v4534_v5, 0 }
 0x3ab   : > { %vm5184_vm6 = vcmp.lt.s32.totalorder %v2668_v31, 97  ;;  %vm4576_vm11 = vcmp.eq.s32.totalorder %v1625_v24, 1  ;;  %vm4580_vm13 = vcmp.eq.s32.totalorder %v1626_v54, 1  ;;  %v1722_v20 = vperm.slane %v4534_v5, 1 }
 0x3ac   : > { %v4283_v2 = vpop.permute.xlu1 %1585  ;;  %v4288_v16 = vpop.permute.xlu0 %1633  ;;  %vm5185_vm2 = vmmov %vm5184_vm6  ;;  %v1696_v32 = vsel %vm1688_vm10, 1, %v5153_v63  ;;  %v1692_v24 = vstv %s4376_s17  ;;  %v1738_v54 = vstv %s1737_s22  ;;  %v1559_v37 = vadd.f32 %v1557_v7, %v1535_v34  ;;  %s1833_s17 = ssub.f32 %s4726_s30, %s4736_s6  ;;  %s5242_s22 = sshll.u32 %s2610_s9, 6 }
 0x3ad   : > { %v4317_v1 = vpop.permute.xlu2 %1681  ;;  %v1590_v18 = vsel %vm5184_vm6, %v4283_v2, %v4158_v4  ;;  %v1591_v33 = vsel %vm5185_vm2, %v4158_v4, %v4283_v2  ;;  %v1691_v4 = vmul.f32 %v2851_v10, %v1690_v53  ;;  %v1560_v49 = vadd.f32 %v1558_v45, %v1536_v42  ;;  %s1857_s16 = ssub.f32 %s4662_s11, %s4680_s19  ;;  %s312_s0 = scalar_lea.vmem [#allocation7], %s5242_s22 }
 0x3ae   : > { %vm5190_vm4 = vcmp.lt.s32.totalorder %v2668_v31, 95  ;;  %vm5191_vm10 = vnez %v5001_v41  ;;  %v1786_v48 = vstv %s1785_s1  ;;  %v1598_v15 = vmul.f32 %v4356_v0, %v1590_v18  ;;  %s1941_s1 = scalar_lea.sflag [#allocation4], %s2610_s9 }
 0x3af   : > { %v1638_v50 = vsel %vm5190_vm4, %v4288_v16, %v4174_v21  ;;  %vm1736_vm6 = vmand %vm4451_vm3, %vm5191_vm10  ;;  %v1599_v47 = vmul.f32 %v4356_v0, %v1591_v33  ;;  %vm4617_vm2 = vcmp.eq.s32.totalorder %v1650_v39, 1  ;;  %v1697_v38 = vperm.slane %v1696_v32, 0 }
 0x3b0   : > { %v1698_v62 = vperm.slane %v1696_v32, 1  ;;  %v1739_v0 = vmul.f32 %v2851_v10, %v1738_v54  ;;  %v1740_v43 = vstv %s4410_s20  ;;  %v1639_v39 = vsel %vm5190_vm4, %v4174_v21, %v4288_v16  ;;  %s2163_s20 = sshll.u32 %s2534_s28, 6  ;;  %s1953_s28 = sshll.u32 %s312_s0, 4  ;;  %s1954_s28 = int_to_ptr.vmem [resolvable:$true] %s1953_s28 }
 0x3b1   : > { %v4636_v57 = vmul.f32 %v4388_v46, %v1638_v50  ;;  %v1744_v34 = vsel %vm1736_vm6, 1, %v5153_v63  ;;  %v1787_v42 = vmul.f32 %v2851_v10, %v1786_v48  ;;  %v1583_v53 = vadd.f32 %v1581_v55, %v1559_v37  ;;  %vm1760_vm6 = vmand %vm4451_vm3, %vm2834_vm7  ;;  %s1952_s23 = scalar_lea.hbm %s4953_s7, %s2163_s20 }
 0x3b2   : > { %v1584_v7 = vadd.f32 %v1582_v9, %v1560_v49  ;;  %vm4642_vm10 = vcmp.eq.s32.totalorder %v1673_v61, 1  ;;  %v1693_v21 = vadd.f32 %v1692_v24, %v1691_v4  ;;  %v1788_v16 = vstv %s4455_s15 }
 0x3b3   : > { %v1605_v55 = vsel %vm4517_vm14, %v1598_v15, 0.0  ;;  %v1606_v61 = vsel %vm4523_vm9, %v1599_v47, 0.0  ;;  %v1647_v45 = vmul.f32 %v4388_v46, %v1639_v39  ;;  %vm4665_vm4 = vcmp.eq.s32.totalorder %v1697_v38, 1 }
 0x3b4   : > { %v4390_v3 = vpop.permute.xlu1 %1611  ;;  %v4392_v12 = vpop.permute.xlu0 %1659  ;;  %vm4669_vm0 = vcmp.eq.s32.totalorder %v1698_v62, 1  ;;  %vm1733_vm14 = vcmp.lt.s32.totalorder %v2668_v31, 82  ;;  %v4674_v59 = vadd.f32 %v1740_v43, %v1739_v0  ;;  %v1745_v33 = vperm.slane %v1744_v34, 0 }
 0x3b5   : > { %v4464_v19 = vpop.permute.xlu2 %1707  ;;  %v1614_v41 = vsel %vm1613_vm5, %v4091_v23, %v4390_v3  ;;  %v1615_v25 = vsel %vm1613_vm5, %v4390_v3, %v4091_v23  ;;  %vm4646_vm5 = vcmp.eq.s32.totalorder %v1674_v26, 1  ;;  %v1746_v32 = vperm.slane %v1744_v34, 1 }
 0x3b6   : > { %v1622_v26 = vmul.f32 %v4485_v13, %v1614_v41  ;;  %v1623_v9 = vmul.f32 %v4485_v13, %v1615_v25  ;;  %vm5202_vm9 = vnez %v5003_v6  ;;  %v1653_v46 = vsel %vm4554_vm1, %v4636_v57, 0.0 }
 0x3b7   : > { %vm1784_vm15 = vmand %vm4451_vm3, %vm5202_vm9  ;;  %v4685_v13 = vadd.f32 %v1788_v16, %v1787_v42  ;;  %v1762_v4 = vstv %s1761_s21  ;;  %v1768_v6 = vsel %vm1760_vm6, 1, %v5153_v63  ;;  %v1607_v24 = vadd.f32 %v1605_v55, %v1583_v53 }
 0x3b8   : > { %v1608_v54 = vadd.f32 %v1606_v61, %v1584_v7  ;;  %vm5203_vm9 = vcmp.lt.s32.totalorder %v2668_v31, 94  ;;  %v1629_v40 = vsel %vm4576_vm11, %v1622_v26, 0.0  ;;  %v1630_v48 = vsel %vm4580_vm13, %v1623_v9, 0.0 }
 0x3b9   : > { %vm5204_vm1 = vmmov %vm5203_vm9  ;;  %v4710_v15 = vsel %vm1784_vm15, 1, %v5153_v63  ;;  %v1764_v47 = vstv %s4549_s8  ;;  %vm5205_vm7 = vcmp.lt.s32.totalorder %v2668_v31, 93  ;;  %v1763_v29 = vmul.f32 %v2851_v10, %v1762_v4  ;;  %s1955_s8 = sshll.u32 %s1952_s23, 4  ;;  %s1956_s8 = int_to_ptr.hbm [resolvable:$true] %s1955_s8 }
 0x3ba   : > { %vm5206_vm6 = vmmov %vm5205_vm7  ;;  %v1769_v62 = vperm.slane %v1768_v6, 0  ;;  %vm5207_vm11 = vnez %v5015_v8  ;;  %vm4732_vm13 = vcmp.eq.s32.totalorder %v1721_v30, 1  ;;  %v1810_v25 = vstv %s1809_s26  ;;  %s2359_s10 = sshra.s32 %s1956_s8, 4  ;;  %s2360_s10 = int_to_ptr.hbm [resolvable:$true] %s2359_s10 }
 0x3bb   : > { %vm1808_vm15 = vmand %vm4451_vm3, %vm5207_vm11  ;;  %v1654_v0 = vsel %vm4617_vm2, %v1647_v45, 0.0  ;;  %v1631_v43 = vadd.f32 %v1629_v40, %v1607_v24  ;;  %v1632_v39 = vadd.f32 %v1630_v48, %v1608_v54  ;;  %vm4751_vm2 = vcmp.eq.s32.totalorder %v1746_v32, 1  ;;  %p2366_p0 = scmp.lt.s32.totalorder %s2360_s10, %s4953_s7 }
 0x3bc   : > { %v4500_v27 = vpop.permute.xlu1 %1657  ;;  %v4503_v51 = vpop.permute.xlu0 %1705  ;;  %v1793_v42 = vperm.slane %v4710_v15, 0  ;;  %v4762_v5 = vsel %vm1808_vm15, 1, %v5153_v63  ;;  %v1765_v53 = vadd.f32 %v1764_v47, %v1763_v29  ;;  %v1811_v7 = vmul.f32 %v2851_v10, %v1810_v25 }
 0x3bd   : > { %v4593_v2 = vpop.permute.xlu2 %1753  ;;  %v1662_v37 = vsel %vm5203_vm9, %v4500_v27, %v4392_v12  ;;  %v1663_v44 = vsel %vm5204_vm1, %v4392_v12, %v4500_v27  ;;  %vm4742_vm9 = vcmp.eq.s32.totalorder %v1722_v20, 1  ;;  %v1794_v20 = vperm.slane %v4710_v15, 1 }
 0x3be   : > { %v1670_v11 = vmul.f32 %v4541_v60, %v1662_v37  ;;  %v1671_v41 = vmul.f32 %v4541_v60, %v1663_v44  ;;  %vm1805_vm1 = vcmp.lt.s32.totalorder %v2668_v31, 79  ;;  %vm5216_vm11 = vcmp.lt.s32.totalorder %v2668_v31, 83 }
 0x3bf   : > { %v1710_v8 = vsel %vm5216_vm11, %v4503_v51, %v4464_v19  ;;  %vm4778_vm15 = vcmp.eq.s32.totalorder %v1769_v62, 1  ;;  %v1812_v26 = vstv %s4601_s29  ;;  %v1655_v9 = vadd.f32 %v1653_v46, %v1631_v43  ;;  %s2361_s29 = scalar_lea.hbm %s2360_s10, 64 }
 0x3c0   : > { %v1678_v16 = vsel %vm4646_vm5, %v1671_v41, 0.0  ;;  %v1656_v23 = vadd.f32 %v1654_v0, %v1632_v39  ;;  %v1718_v24 = vmul.f32 %v4565_v56, %v1710_v8  ;;  %v1858_v37 = vstv %s1857_s16  ;;  %p2362_p4 = scmp.ne.s32.totalorder %s2360_s10, %s2361_s29 }
 0x3c1   : > { %vm5222_vm5 = vcmp.lt.s32.totalorder %v2668_v31, 81  ;;  %v1818_v40 = vperm.slane %v4762_v5, 1  ;;  %v1860_v29 = vstv %s4680_s19  ;;  %v1834_v25 = vstv %s1833_s17  ;;  %s2365_s19 = scalar_lea.hbm %s4953_s7, 128 }
 0x3c2   : > { %v1725_v52 = vsel %vm4732_vm13, %v1718_v24, 0.0  ;;  %vm5230_vm13 = vcmp.lt.s32.totalorder %v2668_v31, 80  ;;  %p2363_p6 = pnand %p2362_p4, %p2565_p11  ;;  %p2367_p3 = scmp.lt.s32.totalorder %s2365_s19, %s2361_s29 }
 0x3c4   : > { %v1684_v58 = vpop.permute.xlu1 %1683  ;;  %v4607_v17 = vpop.permute.xlu0 %1731  ;;  %p2364_p13 = pneg %p2363_p6  ;;  %p2368_p5 = por %p2367_p3, %p2366_p0 }
 0x3c5   : > { %v1686_v38 = vsel %vm5205_vm7, %v4317_v1, %v1684_v58  ;;  %v1687_v12 = vsel %vm5206_vm6, %v1684_v58, %v4317_v1  ;;  %v4719_v27 = vpop.permute.xlu2 %1779  ;;  %v1770_v58 = vperm.slane %v1768_v6, 1  ;;  %vm4747_vm7 = vcmp.eq.s32.totalorder %v1745_v33, 1 }
 0x3c6   : > { %v1694_v30 = vmul.f32 %v1693_v21, %v1686_v38  ;;  %v1695_v57 = vmul.f32 %v1693_v21, %v1687_v12  ;;  %v1677_v21 = vsel %vm4642_vm10, %v1670_v11, 0.0  ;;  %vm5221_vm10 = vmmov %vm5216_vm11  ;;  %v1817_v33 = vperm.slane %v4762_v5, 0  ;;  %p2369_p8 = pnand %p2368_p5, %p2364_p13 }
 0x3c7   : > { %vm4782_vm6 = vcmp.eq.s32.totalorder %v1770_v58, 1  ;;  %v1711_v3 = vsel %vm5221_vm10, %v4464_v19, %v4503_v51  ;;  %v1679_v19 = vadd.f32 %v1677_v21, %v1655_v9  ;;  %v1680_v51 = vadd.f32 %v1678_v16, %v1656_v23 }
 0x3c8   : > { %v1701_v32 = vsel %vm4665_vm4, %v1694_v30, 0.0  ;;  %v1702_v4 = vsel %vm4669_vm0, %v1695_v57, 0.0  ;;  %v1719_v18 = vmul.f32 %v4565_v56, %v1711_v3  ;;  %vm5223_vm0 = vmmov %vm5222_vm5  ;;  %vm4823_vm11 = vcmp.eq.s32.totalorder %v1793_v42, 1 }
 0x3c9   : > { %vm1856_vm4 = vmand %vm4451_vm3, %vm3069_vm8  ;;  %vm4827_vm10 = vcmp.eq.s32.totalorder %v1794_v20, 1  ;;  %v1813_v38 = vadd.f32 %v1812_v26, %v1811_v7  ;;  %v1835_v42 = vmul.f32 %v2851_v10, %v1834_v25  ;;  %v1836_v5 = vstv %s4736_s6 }
 0x3ca   : > { %v1726_v41 = vsel %vm4742_vm9, %v1719_v18, 0.0  ;;  %v1864_v58 = vsel %vm1856_vm4, 1, %v5153_v63  ;;  %vm5231_vm8 = vmmov %vm5230_vm13  ;;  %vm1829_vm9 = vcmp.lt.s32.totalorder %v2668_v31, 78 }
 0x3cb   : > { %v1865_v3 = vperm.slane %v1864_v58, 0 }
 0x3cc   : > { %v1730_v49 = vpop.permute.xlu1 %1729  ;;  %v4703_v50 = vpop.permute.xlu0 %1777 }
 0x3cd   : > { %v1734_v46 = vsel %vm1733_vm14, %v1730_v49, %v4607_v17  ;;  %v1735_v6 = vsel %vm1733_vm14, %v4607_v17, %v1730_v49  ;;  %v1703_v17 = vadd.f32 %v1701_v32, %v1679_v19  ;;  %v1704_v49 = vadd.f32 %v1702_v4, %v1680_v51  ;;  %v1826_v15 = vpop.permute.xlu2 %1825  ;;  %vm1832_vm14 = vmand %vm4451_vm3, %vm2994_vm12  ;;  %v5239_v4 = vld [vmem:[#allocation14_spill] sm:$0xff] }
 0x3ce   : > { %v1742_v56 = vmul.f32 %v4674_v59, %v1734_v46  ;;  %v1743_v48 = vmul.f32 %v4674_v59, %v1735_v6  ;;  %v1859_v59 = vmul.f32 %v2851_v10, %v1858_v37  ;;  %vm1853_vm12 = vcmp.lt.s32.totalorder %v2668_v31, 77 }
 0x3cf   : > { %v1840_v0 = vsel %vm1832_vm14, 1, %v5153_v63  ;;  %v1727_v1 = vadd.f32 %v1725_v52, %v1703_v17  ;;  %v1728_v43 = vadd.f32 %v1726_v41, %v1704_v49  ;;  %v1782_v28 = vsel %vm5230_vm13, %v4703_v50, %v4719_v27 }
 0x3d0   : > { %v1749_v39 = vsel %vm4747_vm7, %v1742_v56, 0.0  ;;  %v1750_v60 = vsel %vm4751_vm2, %v1743_v48, 0.0  ;;  %v1783_v22 = vsel %vm5231_vm8, %v4719_v27, %v4703_v50  ;;  %v1841_v7 = vperm.slane %v1840_v0, 0 }
 0x3d1   : > { %v1751_v20 = vadd.f32 %v1749_v39, %v1727_v1  ;;  %v1842_v21 = vperm.slane %v1840_v0, 1  ;;  %v1790_v50 = vmul.f32 %v4685_v13, %v1782_v28  ;;  %v1791_v27 = vmul.f32 %v4685_v13, %v1783_v22 }
 0x3d2   : > { %vm4873_vm3 = vcmp.eq.s32.totalorder %v1818_v40, 1  ;;  %v1861_v61 = vadd.f32 %v1860_v29, %v1859_v59  ;;  %vm1867_vm2 = vcmp.eq.s32.totalorder %v1865_v3, 1  ;;  %v1881_v41 = vstv %s2154_s18 }
 0x3d3   : > { %vm4886_vm7 = vcmp.eq.s32.totalorder %v1842_v21, 1  ;;  %v1797_v6 = vsel %vm4823_vm11, %v1790_v50, 0.0  ;;  %v1798_v19 = vsel %vm4827_vm10, %v1791_v27, 0.0 }
 0x3d4   : > { %v1756_v45 = vpop.permute.xlu1 %1755  ;;  %v1804_v54 = vpop.permute.xlu0 %1803 }
 0x3d5   : > { %v1758_v14 = vsel %vm5222_vm5, %v4593_v2, %v1756_v45  ;;  %v1759_v44 = vsel %vm5223_vm0, %v1756_v45, %v4593_v2  ;;  %vm4831_vm5 = vcmp.eq.s32.totalorder %v1817_v33, 1  ;;  %v1852_v10 = vpop.permute.xlu2 %1851  ;;  %v1866_v45 = vperm.slane %v1864_v58, 1 }
 0x3d6   : > { %v1766_v62 = vmul.f32 %v1765_v53, %v1758_v14  ;;  %v1767_v11 = vmul.f32 %v1765_v53, %v1759_v44  ;;  %v1752_v53 = vadd.f32 %v1750_v60, %v1728_v43  ;;  %v1837_v33 = vadd.f32 %v1836_v5, %v1835_v42 }
 0x3d8   : > { %v1773_v34 = vsel %vm4778_vm15, %v1766_v62, 0.0  ;;  %v1774_v35 = vsel %vm4782_vm6, %v1767_v11, 0.0  ;;  %vm1868_vm6 = vcmp.eq.s32.totalorder %v1866_v45, 1 }
 0x3d9   : > { %v1775_v9 = vadd.f32 %v1773_v34, %v1751_v20  ;;  %v1776_v55 = vadd.f32 %v1774_v35, %v1752_v53 }
 0x3db   : > { %v1800_v37 = vadd.f32 %v1798_v19, %v1776_v55 }
 0x3dc   : > { %v1802_v30 = vpop.permute.xlu1 %1801  ;;  %v1850_v26 = vpop.permute.xlu0 %1849 }
 0x3dd   : > { %v1806_v63 = vsel %vm1805_vm1, %v1802_v30, %v1804_v54  ;;  %v1807_v57 = vsel %vm1805_vm1, %v1804_v54, %v1802_v30  ;;  %v1854_v32 = vsel %vm1853_vm12, %v1850_v26, %v1852_v10  ;;  %v1855_v13 = vsel %vm1853_vm12, %v1852_v10, %v1850_v26 }
 0x3de   : > { %v1814_v16 = vmul.f32 %v1813_v38, %v1806_v63  ;;  %v1815_v8 = vmul.f32 %v1813_v38, %v1807_v57  ;;  %vm4882_vm1 = vcmp.eq.s32.totalorder %v1841_v7, 1  ;;  %v1799_v54 = vadd.f32 %v1797_v6, %v1775_v9  ;;  %v5240_v6 = vld [vmem:[#allocation20_spill] sm:$0xff] }
 0x3df   : > { %v1862_v44 = vmul.f32 %v1861_v61, %v1854_v32  ;;  %v1863_v40 = vmul.f32 %v1861_v61, %v1855_v13  ;;  %v5238_v32 = vld [vmem:[#allocation19_spill] sm:$0xff] }
 0x3e0   : > { %v1821_v51 = vsel %vm4831_vm5, %v1814_v16, 0.0  ;;  %v1822_v31 = vsel %vm4873_vm3, %v1815_v8, 0.0 }
 0x3e1   : > { %v1823_v56 = vadd.f32 %v1821_v51, %v1799_v54  ;;  %v1824_v48 = vadd.f32 %v1822_v31, %v1800_v37  ;;  %v1869_v59 = vsel %vm1867_vm2, %v1862_v44, 0.0  ;;  %v1870_v29 = vsel %vm1868_vm6, %v1863_v40, 0.0  ;;  %v5241_v51 = vld [vmem:[#allocation17_spill] sm:$0xff] }
 0x3e4   : > { %v1828_v24 = vpop.permute.xlu1 %1827 }
 0x3e5   : > { %v1830_v18 = vsel %vm1829_vm9, %v1826_v15, %v1828_v24  ;;  %v1831_v14 = vsel %vm1829_vm9, %v1828_v24, %v1826_v15  ;;  %v5243_v24 = vld [vmem:[#allocation18_spill] sm:$0xff] }
 0x3e6   : > { %v1838_v17 = vmul.f32 %v1837_v33, %v1830_v18  ;;  %v1839_v49 = vmul.f32 %v1837_v33, %v1831_v14  ;;  %v5245_v18 = vld [vmem:[#allocation16_spill] sm:$0xff] }
 0x3e8   : > { %v1845_v2 = vsel %vm4882_vm1, %v1838_v17, 0.0  ;;  %v1846_v47 = vsel %vm4886_vm7, %v1839_v49, 0.0 }
 0x3e9   : > { %v1847_v38 = vadd.f32 %v1845_v2, %v1823_v56  ;;  %v1848_v12 = vadd.f32 %v1846_v47, %v1824_v48 }
 0x3eb   : > { %v1871_v15 = vadd.f32 %v1869_v59, %v1847_v38  ;;  %v1872_v52 = vadd.f32 %v1870_v29, %v1848_v12 }
 0x3ed   : > { %v1875_v62 = vrot.slane %v1871_v15, 1  ;;  %v1876_v11 = vrot.slane %v1872_v52, 1 }
 0x3ef   : > { %v1879_v58 = vadd.f32 %v1875_v62, %v1871_v15  ;;  %v1880_v25 = vadd.f32 %v1876_v11, %v1872_v52 }
 0x3f1   : > { %v1882_v0 = vadd.f32 %v1881_v41, %v1879_v58  ;;  %v1883_v1 = vadd.f32 %v1881_v41, %v1880_v25 }
 0x3f3   : > { %v2155_v43 = vmul.f32 -1.442695, %v1882_v0  ;;  %v2156_v39 = vmul.f32 -1.442695, %v1883_v1 }
 0x3f5   : > { %2291 = vpow2.f32 %v2155_v43 }
 0x3f6   : > { %2293 = vpow2.f32 %v2156_v39 }
 0x3fb   : > { %v2292_v60 = vpop.eup %2291 }
 0x3fc   : > { %v2294_v30 = vpop.eup %2293  ;;  %v1890_v28 = vadd.f32 1.0, %v2292_v60 }
 0x3fd   : > { %v1891_v22 = vadd.f32 1.0, %v2294_v30 }
 0x3fe   : > { %2295 = vrcp.f32 %v1890_v28  ;;  %v1903_v5 = vand.u32 2147483648, %v1890_v28  ;;  %v1901_v7 = vand.u32 2147483647, %v1890_v28  ;;  %vm1897_vm4 = vweird.f32 %v1890_v28 }
 0x3ff   : > { %2297 = vrcp.f32 %v1891_v22  ;;  %v1918_v21 = vand.u32 2147483648, %v1891_v22  ;;  %v1916_v27 = vand.u32 2147483647, %v1891_v22  ;;  %vm1912_vm11 = vweird.f32 %v1891_v22 }
 0x400   : > { %v1904_v8 = vor.u32 1.1754944e-38, %v1903_v5  ;;  %vm1902_vm10 = vcmp.eq.f32.partialorder %v1901_v7, 8.507059e+37 }
 0x401   : > { %v1919_v55 = vor.u32 1.1754944e-38, %v1918_v21  ;;  %vm1917_vm12 = vcmp.eq.f32.partialorder %v1916_v27, 8.507059e+37 }
 0x404   : > { %v2296_v63 = vpop.eup %2295 }
 0x405   : > { %v2298_v57 = vpop.eup %2297  ;;  %v1893_v34 = vmul.f32 %v2296_v63, %v1890_v28  ;;  %vm1898_vm15 = vweird.f32 %v2296_v63 }
 0x406   : > { %v1908_v35 = vmul.f32 %v2298_v57, %v1891_v22  ;;  %vm1913_vm0 = vweird.f32 %v2298_v57  ;;  %vm1899_vm14 = vmor %vm1897_vm4, %vm1898_vm15 }
 0x407   : > { %v1894_v42 = vsub.f32 1.0, %v1893_v34  ;;  %vm1914_vm5 = vmor %vm1912_vm11, %vm1913_vm0 }
 0x408   : > { %v1909_v20 = vsub.f32 1.0, %v1908_v35 }
 0x409   : > { %v1895_v53 = vmul.f32 %v2296_v63, %v1894_v42 }
 0x40a   : > { %v1910_v50 = vmul.f32 %v2298_v57, %v1909_v20 }
 0x40b   : > { %v1896_v16 = vadd.f32 %v2296_v63, %v1895_v53 }
 0x40c   : > { %v1911_v26 = vadd.f32 %v2298_v57, %v1910_v50 }
 0x40d   : > { %v1900_v9 = vsel %vm1899_vm14, %v2296_v63, %v1896_v16 }
 0x40e   : > { %v1905_v23 = vsel %vm1902_vm10, %v1904_v8, %v1900_v9  ;;  %v1915_v61 = vsel %vm1914_vm5, %v2298_v57, %v1911_v26 }
 0x40f   : > { %v1920_v10 = vsel %vm1917_vm12, %v1919_v55, %v1915_v61  ;;  %v1922_v3 = vperm.slane %v1905_v23, 0 }
 0x410   : > { %v1923_v45 = vperm.slane %v1920_v10, 0 }
 0x411   : > { %v1924_v33 = vmul.f32 %v1922_v3, %v2692_v36  ;;  %v1926_v13 = vmul.f32 %v1922_v3, %v5238_v32  ;;  %v1928_v31 = vmul.f32 %v1922_v3, %v5241_v51  ;;  %v5244_v36 = vld [vmem:[#allocation15_spill] sm:$0xff] }
 0x412   : > { %v1925_v46 = vmul.f32 %v1923_v45, %v5239_v4  ;;  %v1927_v19 = vmul.f32 %v1923_v45, %v5240_v6  ;;  %v1929_v54 = vmul.f32 %v1923_v45, %v5243_v24  ;;  %v1930_v37 = vmul.f32 %v1922_v3, %v5244_v36 }
 0x413   : > { %1932 = vst [vmem:[%s312_s0] sm:$0xff] %v1924_v33  ;;  %v1931_v14 = vmul.f32 %v1923_v45, %v5245_v18 }
 0x414   : > { %1933 = vst [vmem:[%s312_s0 + $0x8] sm:$0xff] %v1925_v46 }
 0x415   : > { %1934 = vst [vmem:[%s312_s0 + $0x10] sm:$0xff] %v1926_v13 }
 0x416   : > { %1935 = vst [vmem:[%s312_s0 + $0x18] sm:$0xff] %v1927_v19 }
 0x417   : > { %1936 = vst [vmem:[%s312_s0 + $0x20] sm:$0xff] %v1928_v31 }
 0x418   : > { %1937 = vst [vmem:[%s312_s0 + $0x28] sm:$0xff] %v1929_v54 }
 0x419   : > { %1938 = vst [vmem:[%s312_s0 + $0x30] sm:$0xff] %v1930_v37 }
 0x41a   : > { %1939 = vst [vmem:[%s312_s0 + $0x38] sm:$0xff] %v1931_v14 }
 0x41b   : > { %2372 = shalt.err (!%p2369_p8)
}
 0x41c   : > { %s2472_s9 = smov 256   ;;  %s5246_s6 = smov 16  }
 0x41d   : > { %2170 = dma.vmem_to_hbm [thread:$0]  (%p2565_p11), %s1954_s28, 1024, %s1956_s8, %s1941_s1, %s2472_s9, %s2472_s9, %s5246_s6  }
 0x41e PF: > { %s1970_s16 = sand.u32 1, %s2403_s24   ;;  %p5247_p9 = scmp.ge.s32.totalorder %s2415_s27, 2 }
 0x41f   : > { %s1971_s17 = scalar_lea.sflag [#allocation4], %s1970_s16 }
 0x420   : > { %p2181_p10 = pnand %p5247_p9, %p2569_p12 }
 0x422   : > { %p2182_p1 = pneg %p2181_p10 }
 0x424   : > { %2398 = dma.done.wait (%p2182_p1), %s1971_s17, 1024  }
 0x425   : > { %2400 = vsyncadd (%p2182_p1), %s1971_s17, 4294966272  ;;  %s5248_s27 = sld [smem:[#allocation12_spill]]  ;;  %s5251_s24 = smov %s2407_s25 }
 0x426   : > { %s5249_s18 = sld [smem:[#allocation11_spill]] }
 0x427   : > { %s5250_s26 = sld [smem:[#allocation13_spill]] }
 0x42b   : > { %p21_p2 = scmp.ge.s32.totalorder %s5248_s27, 4  }
 0x42c   : > { %s5252_s25 = smov %s5249_s18 }
 0x42d   :  { %23 = sbr.rel (!%p21_p2) target bundleno = 10 (0xa), region = 99 }
 0x432   :  { %1977 = vsyncpa [#allocation3], 1 }
 0x433   :  { %1979 = vsyncpa [#allocation3 + $0x1], 1 }
 0x434   :  { %1980 = vsyncpa [#allocation4], 1 }
 0x435   :  { %1982 = vsyncpa [#allocation4 + $0x1], 1 }
 0x436   :  { %1983 = vsyncpa [#allocation5], 1 }
 0x437   :  { %1985 = vsyncpa [#allocation5 + $0x1], 1 }

</bundles_post_ra>
